<compile_context>
chip_gen: v6e
topology: v6e:2x2x1
jax: 0.10.0
libtpu: 0.0.40
codegen_flags: <defaults>
</compile_context>

<pallas_src>
import numpy as np
import jax
import jax.numpy as jnp
from jax.experimental import pallas as pl
from jax.experimental.pallas import tpu as pltpu

N_CLASSES = 10
C = 512          # fixed by the module (Conv2d(512, 512, ...))
H = W = 7        # AvgPool2d(7) + view(N, -1) + Linear(512, .) forces 7x7 input
KH = KW = 3
EPS = 1e-5


def _model2_kernel(p_ref, w_ref, fcw_ref, fcb_ref, o_ref, acc_ref):
    k = pl.program_id(0)

    @pl.when(k == 0)
    def _():
        acc_ref[...] = jnp.zeros_like(acc_ref)

    # ReLU on the input patches (elementwise; zero padding is ReLU-invariant), then one
    # 1536-wide K-slice (3 conv taps) of the im2col conv GEMM.  bf16 x bf16 -> f32 acc.
    a = jnp.maximum(p_ref[...], 0.0)
    acc_ref[...] += jnp.dot(a, w_ref[...], preferred_element_type=jnp.float32)

    @pl.when(k == pl.num_programs(0) - 1)
    def _():
        y = acc_ref[...]                          # (n*49, C); BN scale already folded in
        n = o_ref.shape[0]
        hw = y.shape[0] // n
        # AvgPool2d(7): mean over the 49 spatial rows of each batch element (static
        # slices + sublane reduction on data already resident in VMEM).
        pooled = jnp.concatenate(
            [jnp.mean(y[i * hw:(i + 1) * hw, :], axis=0, keepdims=True)
             for i in range(n)], axis=0)          # (n, C)
        # Linear(512, n_classes); BN shift is folded into fcb by the wrapper.
        out = jnp.dot(pooled, fcw_ref[...],
                      preferred_element_type=jnp.float32) + fcb_ref[...]
        o_ref[...] = out.astype(o_ref.dtype)


def prepare_model2_params(conv_w, gamma, beta, running_mean, running_var, fc_w, fc_b):
    """One-time weight preparation: BN fold + kernel layout + bf16 cast.

    Hoisted out of the per-call path so the ~9.4 MB weight reshuffle is not repeated
    on every forward pass.
    """
    inv_std = 1.0 / jnp.sqrt(running_var + EPS)
    scale = gamma * inv_std                                    # (C,)
    shift = beta - running_mean * scale                        # (C,)

    # PyTorch conv weight (O, I, kh, kw) -> (kh*kw*I, O) matching im2col K ordering,
    # with the per-output-channel BN scale folded into the columns.
    w_mat = jnp.transpose(conv_w, (2, 3, 1, 0)).reshape(KH * KW * C, C)
    w_mat = (w_mat * scale[None, :]).astype(jnp.bfloat16)      # (4608, 512) bf16

    fcw = fc_w.T.astype(jnp.float32)                           # (512, n_cls)
    # The avg-pool rows have total weight 1, so the per-channel BN shift passes through
    # the pool unchanged and folds directly into the FC bias.
    fcb = (fc_b + shift @ fc_w.T).reshape(1, -1).astype(jnp.float32)   # (1, n_cls)
    return w_mat, fcw, fcb


def model2_forward(x_nchw, w_mat, fcw, fcb):
    n = x_nchw.shape[0]
    n_cls = fcw.shape[1]
    rows = n * H * W

    # ---- activation-side glue: NHWC + pad + im2col (bf16, ~0.9 MB at batch=2) ----
    x = jnp.transpose(x_nchw, (0, 2, 3, 1)).astype(jnp.bfloat16)      # NHWC
    x_pad = jnp.pad(x, ((0, 0), (1, 1), (1, 1), (0, 0)))              # pad=1
    cols = []
    for ky in range(KH):
        for kx in range(KW):
            cols.append(x_pad[:, ky:ky + H, kx:kx + W, :].reshape(rows, C))
    patches = jnp.concatenate(cols, axis=1)                           # (98, 4608) bf16

    k_total = KH * KW * C          # 4608
    tk = KH * C                    # 1536 -> 3 grid steps, 3 conv taps per step
    grid_k = k_total // tk

    out = pl.pallas_call(
        _model2_kernel,
        out_shape=jax.ShapeDtypeStruct((n, n_cls), jnp.float32),
        grid_spec=pltpu.PrefetchScalarGridSpec(
            num_scalar_prefetch=0,
            grid=(grid_k,),
            in_specs=[
                pl.BlockSpec((rows, tk), lambda k: (0, k)),     # im2col patches (K-slice)
                pl.BlockSpec((tk, C), lambda k: (k, 0)),        # BN-folded conv weight
                pl.BlockSpec((C, n_cls), lambda k: (0, 0)),     # fc weight^T
                pl.BlockSpec((1, n_cls), lambda k: (0, 0)),     # fc bias (+ BN shift)
            ],
            out_specs=pl.BlockSpec((n, n_cls), lambda k: (0, 0)),
            scratch_shapes=[pltpu.VMEM((rows, C), jnp.float32)],
        ),
        compiler_params=pltpu.CompilerParams(
            dimension_semantics=("arbitrary",),
        ),
    )(patches, w_mat, fcw, fcb)
    return out


def _reference(x, conv_w, gamma, beta, rmean, rvar, fc_w, fc_b):
    xr = jnp.maximum(x, 0.0)
    y = jax.lax.conv_general_dilated(
        xr, conv_w, window_strides=(1, 1), padding=((1, 1), (1, 1)),
        dimension_numbers=("NCHW", "OIHW", "NCHW"))
    inv_std = 1.0 / jnp.sqrt(rvar + EPS)
    y = (y - rmean[None, :, None, None]) * (gamma * inv_std)[None, :, None, None] \
        + beta[None, :, None, None]
    pooled = jnp.mean(y, axis=(2, 3))          # AvgPool2d(7) -> (N, 512)
    return pooled @ fc_w.T + fc_b


if __name__ == "__main__":
    key = jax.random.PRNGKey(0)
    ks = jax.random.split(key, 8)

    batch = 2
    x = jax.random.normal(ks[0], (batch, C, H, W), dtype=jnp.float32)

    conv_w = jax.random.normal(ks[1], (C, C, KH, KW), dtype=jnp.float32) * 0.05
    gamma = 0.5 + jax.random.uniform(ks[2], (C,), dtype=jnp.float32)
    beta = jax.random.normal(ks[3], (C,), dtype=jnp.float32) * 0.1
    running_mean = jax.random.normal(ks[4], (C,), dtype=jnp.float32) * 0.1
    running_var = 0.5 + jax.random.uniform(ks[5], (C,), dtype=jnp.float32)
    fc_w = jax.random.normal(ks[6], (N_CLASSES, C), dtype=jnp.float32) * 0.05
    fc_b = jax.random.normal(ks[7], (N_CLASSES,), dtype=jnp.float32) * 0.1

    # One-time weight preparation (BN fold + layout + bf16 cast).
    w_mat, fcw, fcb = prepare_model2_params(
        conv_w, gamma, beta, running_mean, running_var, fc_w, fc_b)
    w_mat, fcw, fcb = jax.block_until_ready((w_mat, fcw, fcb))

    fwd = jax.jit(model2_forward)
    out = jax.block_until_ready(fwd(x, w_mat, fcw, fcb))

    ref = jax.block_until_ready(
        _reference(x, conv_w, gamma, beta, running_mean, running_var, fc_w, fc_b))
    # bf16 GEMM operands (with f32 accumulation) introduce ~0.5% quantization error in
    # the conv activations; compare against the pure-f32 reference with a matching
    # tolerance.
    np.testing.assert_allclose(np.asarray(out), np.asarray(ref), rtol=2e-2, atol=2e-2)

    print("KERNEL_OK")
</pallas_src>

<mosaic_0001>
module attributes {stable_mosaic.version = 11 : i64} {
  func.func @_model2_kernel(%arg0: i32, %arg1: memref<98x1536xbf16, #tpu.memory_space<vmem>>, %arg2: memref<1536x512xbf16, #tpu.memory_space<vmem>>, %arg3: memref<512x10xf32, #tpu.memory_space<vmem>>, %arg4: memref<1x10xf32, #tpu.memory_space<vmem>>, %arg5: memref<2x10xf32, #tpu.memory_space<vmem>>, %arg6: memref<98x512xf32, #tpu.memory_space<vmem>>) attributes {dimension_semantics = [#tpu.dimension_semantics<arbitrary>], iteration_bounds = array<i64: 3>, scalar_prefetch = 0 : i64, scratch_operands = 1 : i64, tpu.core_type = #tpu.core_type<tc>, window_params = [{transform_indices = @transform_0, window_bounds = array<i64: 98, 1536>}, {transform_indices = @transform_1, window_bounds = array<i64: 1536, 512>}, {pipeline_mode = #tpu.pipeline_mode<synchronous>, transform_indices = @transform_2, window_bounds = array<i64: 512, 10>}, {pipeline_mode = #tpu.pipeline_mode<synchronous>, transform_indices = @transform_3, window_bounds = array<i64: 1, 10>}, {pipeline_mode = #tpu.pipeline_mode<synchronous>, transform_indices = @transform_4, window_bounds = array<i64: 2, 10>}]} {
    %c0_i32 = arith.constant 0 : i32
    %0 = arith.cmpi eq, %arg0, %c0_i32 : i32
    %1 = arith.extui %0 : i1 to i32
    %c0_i32_0 = arith.constant 0 : i32
    %2 = arith.cmpi ne, %1, %c0_i32_0 : i32
    scf.if %2 {
      %cst_10 = arith.constant 0.000000e+00 : f32
      %14 = vector.broadcast %cst_10 : f32 to vector<98x512xf32>
      %c0_11 = arith.constant 0 : index
      %c0_12 = arith.constant 0 : index
      %15 = vector.load %arg6[%c0_11, %c0_12] : memref<98x512xf32, #tpu.memory_space<vmem>>, vector<98x512xf32>
      tpu.vector_store %arg6[%c0_11, %c0_12], %14 {strides = array<i32>} : memref<98x512xf32, #tpu.memory_space<vmem>>, vector<98x512xf32>,
    } else {
    }
    %c0 = arith.constant 0 : index
    %c0_1 = arith.constant 0 : index
    %3 = vector.load %arg1[%c0, %c0_1] : memref<98x1536xbf16, #tpu.memory_space<vmem>>, vector<98x1536xbf16>
    %cst = arith.constant 0.000000e+00 : bf16
    %4 = vector.broadcast %cst : bf16 to vector<98x1536xbf16>
    %5 = arith.maximumf %3, %4 : vector<98x1536xbf16>
    %c0_2 = arith.constant 0 : index
    %c0_3 = arith.constant 0 : index
    %6 = vector.load %arg6[%c0_2, %c0_3] : memref<98x512xf32, #tpu.memory_space<vmem>>, vector<98x512xf32>
    %c0_4 = arith.constant 0 : index
    %c0_5 = arith.constant 0 : index
    %7 = vector.load %arg2[%c0_4, %c0_5] : memref<1536x512xbf16, #tpu.memory_space<vmem>>, vector<1536x512xbf16>
    %cst_6 = arith.constant dense<0.000000e+00> : vector<98x512xf32>
    %8 = tpu.matmul %5, %7, %cst_6 {dimension_numbers = #tpu.dot_dimension_numbers<[1], [0], [0], [1], [0, 0, 1, 1], [], []>} : vector<98x1536xbf16>, vector<1536x512xbf16>, vector<98x512xf32> -> vector<98x512xf32>
    %9 = arith.addf %6, %8 : vector<98x512xf32>
    %c0_7 = arith.constant 0 : index
    %c0_8 = arith.constant 0 : index
    %10 = vector.load %arg6[%c0_7, %c0_8] : memref<98x512xf32, #tpu.memory_space<vmem>>, vector<98x512xf32>
    tpu.vector_store %arg6[%c0_7, %c0_8], %9 {strides = array<i32>} : memref<98x512xf32, #tpu.memory_space<vmem>>, vector<98x512xf32>,
    %c2_i32 = arith.constant 2 : i32
    %11 = arith.cmpi eq, %arg0, %c2_i32 : i32
    %12 = arith.extui %11 : i1 to i32
    %c0_i32_9 = arith.constant 0 : i32
    %13 = arith.cmpi ne, %12, %c0_i32_9 : i32
    scf.if %13 {
      %c0_10 = arith.constant 0 : index
      %c0_11 = arith.constant 0 : index
      %14 = vector.load %arg6[%c0_10, %c0_11] : memref<98x512xf32, #tpu.memory_space<vmem>>, vector<98x512xf32>
      %15 = vector.extract_strided_slice %14 {offsets = [0, 0], sizes = [49, 512], strides = [1, 1]} : vector<98x512xf32> to vector<49x512xf32>
      %cst_12 = arith.constant dense<0.000000e+00> : vector<512xf32>
      %16 = vector.multi_reduction <add>, %15, %cst_12 [0] : vector<49x512xf32> to vector<512xf32>
      %17 = vector.shape_cast %16 : vector<512xf32> to vector<1x512xf32>
      %cst_13 = arith.constant 4.900000e+01 : f32
      %18 = vector.broadcast %cst_13 : f32 to vector<1x512xf32>
      %19 = arith.divf %17, %18 : vector<1x512xf32>
      %20 = vector.extract_strided_slice %14 {offsets = [49, 0], sizes = [49, 512], strides = [1, 1]} : vector<98x512xf32> to vector<49x512xf32>
      %cst_14 = arith.constant dense<0.000000e+00> : vector<512xf32>
      %21 = vector.multi_reduction <add>, %20, %cst_14 [0] : vector<49x512xf32> to vector<512xf32>
      %22 = vector.shape_cast %21 : vector<512xf32> to vector<1x512xf32>
      %cst_15 = arith.constant 4.900000e+01 : f32
      %23 = vector.broadcast %cst_15 : f32 to vector<1x512xf32>
      %24 = arith.divf %22, %23 : vector<1x512xf32>
      %25 = tpu.concatenate %19, %24 in 0 : vector<1x512xf32>, vector<1x512xf32> -> vector<2x512xf32>
      %c0_16 = arith.constant 0 : index
      %c0_17 = arith.constant 0 : index
      %26 = vector.load %arg3[%c0_16, %c0_17] : memref<512x10xf32, #tpu.memory_space<vmem>>, vector<512x10xf32>
      %cst_18 = arith.constant dense<0.000000e+00> : vector<2x10xf32>
      %27 = tpu.matmul %25, %26, %cst_18 {dimension_numbers = #tpu.dot_dimension_numbers<[1], [0], [0], [1], [0, 0, 1, 1], [], []>} : vector<2x512xf32>, vector<512x10xf32>, vector<2x10xf32> -> vector<2x10xf32>
      %c0_19 = arith.constant 0 : index
      %c0_20 = arith.constant 0 : index
      %28 = vector.load %arg4[%c0_19, %c0_20] : memref<1x10xf32, #tpu.memory_space<vmem>>, vector<1x10xf32>
      %29 = vector.broadcast %28 : vector<1x10xf32> to vector<2x10xf32>
      %30 = arith.addf %27, %29 : vector<2x10xf32>
      %c0_21 = arith.constant 0 : index
      %c0_22 = arith.constant 0 : index
      %31 = vector.load %arg5[%c0_21, %c0_22] : memref<2x10xf32, #tpu.memory_space<vmem>>, vector<2x10xf32>
      tpu.vector_store %arg5[%c0_21, %c0_22], %30 {strides = array<i32>} : memref<2x10xf32, #tpu.memory_space<vmem>>, vector<2x10xf32>,
    } else {
    }
    return
  }
  func.func @transform_0(%arg0: i32) -> (i32, i32) {
    %c0_i32 = arith.constant 0 : i32
    %c0_i32_0 = arith.constant 0 : i32
    return %c0_i32, %arg0 : i32, i32
  }
  func.func @transform_1(%arg0: i32) -> (i32, i32) {
    %c0_i32 = arith.constant 0 : i32
    %c0_i32_0 = arith.constant 0 : i32
    return %arg0, %c0_i32 : i32, i32
  }
  func.func @transform_2(%arg0: i32) -> (i32, i32) {
    %c0_i32 = arith.constant 0 : i32
    %c0_i32_0 = arith.constant 0 : i32
    %c0_i32_1 = arith.constant 0 : i32
    return %c0_i32, %c0_i32_0 : i32, i32
  }
  func.func @transform_3(%arg0: i32) -> (i32, i32) {
    %c0_i32 = arith.constant 0 : i32
    %c0_i32_0 = arith.constant 0 : i32
    %c0_i32_1 = arith.constant 0 : i32
    return %c0_i32, %c0_i32_0 : i32, i32
  }
  func.func @transform_4(%arg0: i32) -> (i32, i32) {
    %c0_i32 = arith.constant 0 : i32
    %c0_i32_0 = arith.constant 0 : i32
    %c0_i32_1 = arith.constant 0 : i32
    return %c0_i32, %c0_i32_0 : i32, i32
  }
}

</mosaic_0001>

<bundles_post_ra>
// kernel: model2_forward.1
= control target key start
LH: loop header
LB: loop body
LE: loop exit
PB: predicated region body
PF: predicated region fallthrough
CT: control target
= control target key end

     0   :  { %9 = vsyncpa [#allocation5], 0  ;;  %s6476_s15 = smov 0   ;;  %s6478_s16 = smov 0   ;;  %s8264_s0 = inlined_call_operand.vmem [shape: bf16[98,4608], index: 0, kind: input, shape index: {}]   ;;  %s8265_s1 = inlined_call_operand.vmem [shape: bf16[4608,512], index: 1, kind: input, shape index: {}]   ;;  %s8266_s2 = inlined_call_operand.vmem [shape: f32[512,10], index: 2, kind: input, shape index: {}]   ;;  %s8267_s3 = inlined_call_operand.vmem [shape: f32[1,10], index: 3, kind: input, shape index: {}]   ;;  %s8268_s4 = inlined_call_operand.hbm [shape: f32[2,10], index: 4, kind: output, shape index: {}]  }
   0x1   :  { %s6480_s17 = smov 0  }
   0x2 LB: > { %s6492_s18 = sadd.s32 4294967295, %s6446_s17   ;;  %s6495_s19 = sadd.s32 1, %s6446_s17   ;;  %s6446_s17 = sphi %s6480_s17, %s8519_s17   ;;  %s6442_s16 = sphi %s6478_s16, %s8518_s16   ;;  %s6438_s15 = sphi %s6476_s15, %s8517_s15  }
   0x3   : > { %s19_s20 = ssub.s32 %s6446_s17, %s6495_s19  ;;  %s22_s21 = sadd.s32 1, %s6442_s16 }
   0x4   : > { %p20_p0 = scmp.eq.s32.totalorder %s19_s20, 0  ;;  %p29_p1 = scmp.ne.s32.totalorder %s6442_s16, %s6438_s15 }
   0x5   : > { %p30_p2 = scmp.eq.s32.totalorder %s6446_s17, 0  ;;  %p5233_p4 = scmp.ge.s32.totalorder %s6446_s17, 3 }
   0x6   : > { %s6504_s22 = scalar_select %p20_p0, %s6442_s16, %s22_s21  }
   0x7   : > { %p31_p3 = por %p30_p2, %p29_p1  ;;  %150 = sbr.rel (%p5233_p4) target bundleno = 56 (0x38), region = 24 }
   0xc   : > { %153 = sbr.rel (!%p31_p3) target bundleno = 56 (0x38), region = 28  ;;  %s155_s23 = sand.u32 (%p31_p3), 1, %s6442_s16  }
   0xd   : > { %s5713_s24 = smul.u32 (%p31_p3), 48, %s6446_s17 }
   0xe   : > { %s5785_s25 = smul.u32 (%p31_p3), 624, %s155_s23 }
   0xf   : > { %s6512_s28 = scalar_lea.vmem (%p31_p3), %s8264_s0, %s5713_s24 }
  0x10   : > { %v173_v0 = vld [vmem:[%s6512_s28] sm:$0xff] (%p31_p3)  ;;  %v175_v1 = vld [vmem:[%s6512_s28 + $0x8] sm:$0xff] (%p31_p3)  ;;  %v177_v2 = vld [vmem:[%s6512_s28 + $0x10] sm:$0xff] (%p31_p3)  ;;  %s6517_s29 = scalar_lea.vmem (%p31_p3), [#allocation3], %s5785_s25 }
  0x11   : > { %174 = vst [vmem:[%s6517_s29] sm:$0xff] %v173_v0  ;;  %176 = vst [vmem:[%s6517_s29 + $0x8] sm:$0xff] %v175_v1  ;;  %v179_v3 = vld [vmem:[%s6512_s28 + $0x18] sm:$0xff]  ;;  %v181_v4 = vld [vmem:[%s6512_s28 + $0x20] sm:$0xff] }
  0x12   : > { %178 = vst [vmem:[%s6517_s29 + $0x10] sm:$0xff] %v177_v2  ;;  %v183_v5 = vld [vmem:[%s6512_s28 + $0x28] sm:$0xff]  ;;  %180 = vst [vmem:[%s6517_s29 + $0x18] sm:$0xff] %v179_v3  ;;  %v185_v6 = vld [vmem:[%s6512_s28 + $0x90] sm:$0xff] }
  0x13   : > { %182 = vst [vmem:[%s6517_s29 + $0x20] sm:$0xff] %v181_v4  ;;  %184 = vst [vmem:[%s6517_s29 + $0x28] sm:$0xff] %v183_v5  ;;  %v187_v7 = vld [vmem:[%s6512_s28 + $0x98] sm:$0xff]  ;;  %v189_v8 = vld [vmem:[%s6512_s28 + $0xa0] sm:$0xff] }
  0x14   : > { %186 = vst [vmem:[%s6517_s29 + $0x30] sm:$0xff] %v185_v6  ;;  %188 = vst [vmem:[%s6517_s29 + $0x38] sm:$0xff] %v187_v7  ;;  %v191_v9 = vld [vmem:[%s6512_s28 + $0xa8] sm:$0xff]  ;;  %v193_v10 = vld [vmem:[%s6512_s28 + $0xb0] sm:$0xff] }
  0x15   : > { %190 = vst [vmem:[%s6517_s29 + $0x40] sm:$0xff] %v189_v8  ;;  %v195_v11 = vld [vmem:[%s6512_s28 + $0xb8] sm:$0xff]  ;;  %192 = vst [vmem:[%s6517_s29 + $0x48] sm:$0xff] %v191_v9  ;;  %v197_v12 = vld [vmem:[%s6512_s28 + $0x120] sm:$0xff] }
  0x16   : > { %194 = vst [vmem:[%s6517_s29 + $0x50] sm:$0xff] %v193_v10  ;;  %196 = vst [vmem:[%s6517_s29 + $0x58] sm:$0xff] %v195_v11  ;;  %v199_v13 = vld [vmem:[%s6512_s28 + $0x128] sm:$0xff]  ;;  %v201_v14 = vld [vmem:[%s6512_s28 + $0x130] sm:$0xff] }
  0x17   : > { %198 = vst [vmem:[%s6517_s29 + $0x60] sm:$0xff] %v197_v12  ;;  %200 = vst [vmem:[%s6517_s29 + $0x68] sm:$0xff] %v199_v13  ;;  %v203_v15 = vld [vmem:[%s6512_s28 + $0x138] sm:$0xff]  ;;  %v205_v16 = vld [vmem:[%s6512_s28 + $0x140] sm:$0xff] }
  0x18   : > { %202 = vst [vmem:[%s6517_s29 + $0x70] sm:$0xff] %v201_v14  ;;  %v207_v17 = vld [vmem:[%s6512_s28 + $0x148] sm:$0xff]  ;;  %204 = vst [vmem:[%s6517_s29 + $0x78] sm:$0xff] %v203_v15  ;;  %v209_v18 = vld [vmem:[%s6512_s28 + $0x1b0] sm:$0xff] }
  0x19   : > { %206 = vst [vmem:[%s6517_s29 + $0x80] sm:$0xff] %v205_v16  ;;  %208 = vst [vmem:[%s6517_s29 + $0x88] sm:$0xff] %v207_v17  ;;  %v211_v19 = vld [vmem:[%s6512_s28 + $0x1b8] sm:$0xff]  ;;  %v213_v20 = vld [vmem:[%s6512_s28 + $0x1c0] sm:$0xff] }
  0x1a   : > { %210 = vst [vmem:[%s6517_s29 + $0x90] sm:$0xff] %v209_v18  ;;  %212 = vst [vmem:[%s6517_s29 + $0x98] sm:$0xff] %v211_v19  ;;  %v215_v21 = vld [vmem:[%s6512_s28 + $0x1c8] sm:$0xff]  ;;  %v217_v22 = vld [vmem:[%s6512_s28 + $0x1d0] sm:$0xff] }
  0x1b   : > { %214 = vst [vmem:[%s6517_s29 + $0xa0] sm:$0xff] %v213_v20  ;;  %v219_v23 = vld [vmem:[%s6512_s28 + $0x1d8] sm:$0xff]  ;;  %216 = vst [vmem:[%s6517_s29 + $0xa8] sm:$0xff] %v215_v21  ;;  %v221_v24 = vld [vmem:[%s6512_s28 + $0x240] sm:$0xff] }
  0x1c   : > { %218 = vst [vmem:[%s6517_s29 + $0xb0] sm:$0xff] %v217_v22  ;;  %220 = vst [vmem:[%s6517_s29 + $0xb8] sm:$0xff] %v219_v23  ;;  %v223_v25 = vld [vmem:[%s6512_s28 + $0x248] sm:$0xff]  ;;  %v225_v26 = vld [vmem:[%s6512_s28 + $0x250] sm:$0xff] }
  0x1d   : > { %222 = vst [vmem:[%s6517_s29 + $0xc0] sm:$0xff] %v221_v24  ;;  %224 = vst [vmem:[%s6517_s29 + $0xc8] sm:$0xff] %v223_v25  ;;  %v227_v27 = vld [vmem:[%s6512_s28 + $0x258] sm:$0xff]  ;;  %v229_v28 = vld [vmem:[%s6512_s28 + $0x260] sm:$0xff] }
  0x1e   : > { %226 = vst [vmem:[%s6517_s29 + $0xd0] sm:$0xff] %v225_v26  ;;  %v231_v29 = vld [vmem:[%s6512_s28 + $0x268] sm:$0xff]  ;;  %228 = vst [vmem:[%s6517_s29 + $0xd8] sm:$0xff] %v227_v27  ;;  %v233_v30 = vld [vmem:[%s6512_s28 + $0x2d0] sm:$0xff] }
  0x1f   : > { %230 = vst [vmem:[%s6517_s29 + $0xe0] sm:$0xff] %v229_v28  ;;  %232 = vst [vmem:[%s6517_s29 + $0xe8] sm:$0xff] %v231_v29  ;;  %v235_v31 = vld [vmem:[%s6512_s28 + $0x2d8] sm:$0xff]  ;;  %v237_v32 = vld [vmem:[%s6512_s28 + $0x2e0] sm:$0xff] }
  0x20   : > { %234 = vst [vmem:[%s6517_s29 + $0xf0] sm:$0xff] %v233_v30  ;;  %236 = vst [vmem:[%s6517_s29 + $0xf8] sm:$0xff] %v235_v31  ;;  %v239_v33 = vld [vmem:[%s6512_s28 + $0x2e8] sm:$0xff]  ;;  %v241_v34 = vld [vmem:[%s6512_s28 + $0x2f0] sm:$0xff] }
  0x21   : > { %238 = vst [vmem:[%s6517_s29 + $0x100] sm:$0xff] %v237_v32  ;;  %v243_v35 = vld [vmem:[%s6512_s28 + $0x2f8] sm:$0xff]  ;;  %240 = vst [vmem:[%s6517_s29 + $0x108] sm:$0xff] %v239_v33  ;;  %v245_v36 = vld [vmem:[%s6512_s28 + $0x360] sm:$0xff] }
  0x22   : > { %242 = vst [vmem:[%s6517_s29 + $0x110] sm:$0xff] %v241_v34  ;;  %244 = vst [vmem:[%s6517_s29 + $0x118] sm:$0xff] %v243_v35  ;;  %v247_v37 = vld [vmem:[%s6512_s28 + $0x368] sm:$0xff]  ;;  %v249_v38 = vld [vmem:[%s6512_s28 + $0x370] sm:$0xff] }
  0x23   : > { %246 = vst [vmem:[%s6517_s29 + $0x120] sm:$0xff] %v245_v36  ;;  %248 = vst [vmem:[%s6517_s29 + $0x128] sm:$0xff] %v247_v37  ;;  %v251_v39 = vld [vmem:[%s6512_s28 + $0x378] sm:$0xff]  ;;  %v253_v40 = vld [vmem:[%s6512_s28 + $0x380] sm:$0xff] }
  0x24   : > { %250 = vst [vmem:[%s6517_s29 + $0x130] sm:$0xff] %v249_v38  ;;  %v255_v41 = vld [vmem:[%s6512_s28 + $0x388] sm:$0xff]  ;;  %252 = vst [vmem:[%s6517_s29 + $0x138] sm:$0xff] %v251_v39  ;;  %v257_v42 = vld [vmem:[%s6512_s28 + $0x3f0] sm:$0xff] }
  0x25   : > { %254 = vst [vmem:[%s6517_s29 + $0x140] sm:$0xff] %v253_v40  ;;  %256 = vst [vmem:[%s6517_s29 + $0x148] sm:$0xff] %v255_v41  ;;  %v259_v43 = vld [vmem:[%s6512_s28 + $0x3f8] sm:$0xff]  ;;  %v261_v44 = vld [vmem:[%s6512_s28 + $0x400] sm:$0xff] }
  0x26   : > { %258 = vst [vmem:[%s6517_s29 + $0x150] sm:$0xff] %v257_v42  ;;  %260 = vst [vmem:[%s6517_s29 + $0x158] sm:$0xff] %v259_v43  ;;  %v263_v45 = vld [vmem:[%s6512_s28 + $0x408] sm:$0xff]  ;;  %v265_v46 = vld [vmem:[%s6512_s28 + $0x410] sm:$0xff] }
  0x27   : > { %262 = vst [vmem:[%s6517_s29 + $0x160] sm:$0xff] %v261_v44  ;;  %v267_v47 = vld [vmem:[%s6512_s28 + $0x418] sm:$0xff]  ;;  %264 = vst [vmem:[%s6517_s29 + $0x168] sm:$0xff] %v263_v45  ;;  %v269_v48 = vld [vmem:[%s6512_s28 + $0x480] sm:$0xff] }
  0x28   : > { %266 = vst [vmem:[%s6517_s29 + $0x170] sm:$0xff] %v265_v46  ;;  %268 = vst [vmem:[%s6517_s29 + $0x178] sm:$0xff] %v267_v47  ;;  %v271_v49 = vld [vmem:[%s6512_s28 + $0x488] sm:$0xff]  ;;  %v273_v50 = vld [vmem:[%s6512_s28 + $0x490] sm:$0xff] }
  0x29   : > { %270 = vst [vmem:[%s6517_s29 + $0x180] sm:$0xff] %v269_v48  ;;  %272 = vst [vmem:[%s6517_s29 + $0x188] sm:$0xff] %v271_v49  ;;  %v275_v51 = vld [vmem:[%s6512_s28 + $0x498] sm:$0xff]  ;;  %v277_v52 = vld [vmem:[%s6512_s28 + $0x4a0] sm:$0xff] }
  0x2a   : > { %274 = vst [vmem:[%s6517_s29 + $0x190] sm:$0xff] %v273_v50  ;;  %v279_v53 = vld [vmem:[%s6512_s28 + $0x4a8] sm:$0xff]  ;;  %276 = vst [vmem:[%s6517_s29 + $0x198] sm:$0xff] %v275_v51  ;;  %v281_v54 = vld [vmem:[%s6512_s28 + $0x510] sm:$0xff] }
  0x2b   : > { %278 = vst [vmem:[%s6517_s29 + $0x1a0] sm:$0xff] %v277_v52  ;;  %280 = vst [vmem:[%s6517_s29 + $0x1a8] sm:$0xff] %v279_v53  ;;  %v283_v55 = vld [vmem:[%s6512_s28 + $0x518] sm:$0xff]  ;;  %v285_v56 = vld [vmem:[%s6512_s28 + $0x520] sm:$0xff] }
  0x2c   : > { %282 = vst [vmem:[%s6517_s29 + $0x1b0] sm:$0xff] %v281_v54  ;;  %284 = vst [vmem:[%s6517_s29 + $0x1b8] sm:$0xff] %v283_v55  ;;  %v287_v57 = vld [vmem:[%s6512_s28 + $0x528] sm:$0xff]  ;;  %v289_v58 = vld [vmem:[%s6512_s28 + $0x530] sm:$0xff] }
  0x2d   : > { %286 = vst [vmem:[%s6517_s29 + $0x1c0] sm:$0xff] %v285_v56  ;;  %v291_v59 = vld [vmem:[%s6512_s28 + $0x538] sm:$0xff]  ;;  %288 = vst [vmem:[%s6517_s29 + $0x1c8] sm:$0xff] %v287_v57  ;;  %v293_v60 = vld [vmem:[%s6512_s28 + $0x5a0] sm:$0xff] }
  0x2e   : > { %290 = vst [vmem:[%s6517_s29 + $0x1d0] sm:$0xff] %v289_v58  ;;  %292 = vst [vmem:[%s6517_s29 + $0x1d8] sm:$0xff] %v291_v59  ;;  %v295_v61 = vld [vmem:[%s6512_s28 + $0x5a8] sm:$0xff]  ;;  %v297_v62 = vld [vmem:[%s6512_s28 + $0x5b0] sm:$0xff] }
  0x2f   : > { %294 = vst [vmem:[%s6517_s29 + $0x1e0] sm:$0xff] %v293_v60  ;;  %296 = vst [vmem:[%s6517_s29 + $0x1e8] sm:$0xff] %v295_v61  ;;  %v299_v63 = vld [vmem:[%s6512_s28 + $0x5b8] sm:$0xff]  ;;  %v301_v0 = vld [vmem:[%s6512_s28 + $0x5c0] sm:$0xff] }
  0x30   : > { %298 = vst [vmem:[%s6517_s29 + $0x1f0] sm:$0xff] %v297_v62  ;;  %v303_v1 = vld [vmem:[%s6512_s28 + $0x5c8] sm:$0xff]  ;;  %300 = vst [vmem:[%s6517_s29 + $0x1f8] sm:$0xff] %v299_v63  ;;  %v305_v2 = vld [vmem:[%s6512_s28 + $0x630] sm:$0xff] }
  0x31   : > { %302 = vst [vmem:[%s6517_s29 + $0x200] sm:$0xff] %v301_v0  ;;  %304 = vst [vmem:[%s6517_s29 + $0x208] sm:$0xff] %v303_v1  ;;  %v307_v3 = vld [vmem:[%s6512_s28 + $0x638] sm:$0xff]  ;;  %v309_v4 = vld [vmem:[%s6512_s28 + $0x640] sm:$0xff] }
  0x32   : > { %306 = vst [vmem:[%s6517_s29 + $0x210] sm:$0xff] %v305_v2  ;;  %308 = vst [vmem:[%s6517_s29 + $0x218] sm:$0xff] %v307_v3  ;;  %v311_v5 = vld [vmem:[%s6512_s28 + $0x648] sm:$0xff]  ;;  %v313_v6 = vld [vmem:[%s6512_s28 + $0x650] sm:$0xff] }
  0x33   : > { %310 = vst [vmem:[%s6517_s29 + $0x220] sm:$0xff] %v309_v4  ;;  %v315_v7 = vld [vmem:[%s6512_s28 + $0x658] sm:$0xff]  ;;  %312 = vst [vmem:[%s6517_s29 + $0x228] sm:$0xff] %v311_v5  ;;  %v317_v8 = vld [vmem:[%s6512_s28 + $0x6c0] sm:$0xff] }
  0x34   : > { %314 = vst [vmem:[%s6517_s29 + $0x230] sm:$0xff] %v313_v6  ;;  %316 = vst [vmem:[%s6517_s29 + $0x238] sm:$0xff] %v315_v7  ;;  %v319_v9 = vld [vmem:[%s6512_s28 + $0x6c8] sm:$0xff]  ;;  %v321_v10 = vld [vmem:[%s6512_s28 + $0x6d0] sm:$0xff] }
  0x35   : > { %318 = vst [vmem:[%s6517_s29 + $0x240] sm:$0xff] %v317_v8  ;;  %320 = vst [vmem:[%s6517_s29 + $0x248] sm:$0xff] %v319_v9  ;;  %v323_v11 = vld [vmem:[%s6512_s28 + $0x6d8] sm:$0xff]  ;;  %v325_v12 = vld [vmem:[%s6512_s28 + $0x6e0] sm:$0xff] }
  0x36   : > { %322 = vst [vmem:[%s6517_s29 + $0x250] sm:$0xff] %v321_v10  ;;  %v327_v13 = vld [vmem:[%s6512_s28 + $0x6e8] sm:$0xff]  ;;  %324 = vst [vmem:[%s6517_s29 + $0x258] sm:$0xff] %v323_v11 }
  0x37   : > { %326 = vst [vmem:[%s6517_s29 + $0x260] sm:$0xff] %v325_v12  ;;  %328 = vst [vmem:[%s6517_s29 + $0x268] sm:$0xff] %v327_v13 }
  0x38 PF: > { %p5235_p5 = scmp.ge.s32.totalorder %s6446_s17, 1  ;;  %p343_p6 = scmp.lt.s32.totalorder %s6446_s17, 4 }
  0x3a   : > { %p344_p7 = pnand %p5235_p5, %p343_p6 }
  0x3c   : > { %347 = sbr.rel (%p344_p7) target bundleno = 1032 (0x408), region = 55 }
  0x41   : > { %s350_s30 = sand.u32 1, %s6438_s15   ;;  %s377_s5 = smul.u32 192, %s6492_s18 }
  0x42   : > { %s5786_s6 = smul.u32 624, %s350_s30  ;;  %p5238_p9 = scmp.ne.s32.totalorder %s6492_s18, 0 }
  0x43   : > { %p378_p8 = scmp.lt.s32.totalorder %s377_s5, 575 }
  0x44   : > { %s6681_s11 = scalar_lea.vmem [#allocation3], %s5786_s6  ;;  %388 = sbr.rel (%p5238_p9) target bundleno = 100 (0x64), region = 63 }
  0x45   : > { %s8521_s5 = smov (!%p378_p8, %s377_s5), 575 }
  0x46   : > { %s5714_s7 = sshll.u32 %s8521_s5, 4 }
  0x47   : > { %s6679_s10 = scalar_lea.vmem %s8265_s1, %s5714_s7 }
  0x49   : > { %v6448_v14 = vmov 0.0  }
  0x4a   : > { %389 = vst [vmem:[#allocation2 + $0xb0] sm:$0xff] %v6448_v14  ;;  %390 = vst [vmem:[#allocation2 + $0xd0] sm:$0xff] %v6448_v14 }
  0x4b   : > { %391 = vst [vmem:[#allocation2 + $0x10] sm:$0xff] %v6448_v14  ;;  %392 = vst [vmem:[#allocation2 + $0x48] sm:$0xff] %v6448_v14 }
  0x4c   : > { %393 = vst [vmem:[#allocation2 + $0x160] sm:$0xff] %v6448_v14  ;;  %394 = vst [vmem:[#allocation2 + $0x128] sm:$0xff] %v6448_v14 }
  0x4d   : > { %395 = vst [vmem:[#allocation2 + $0x40] sm:$0xff] %v6448_v14  ;;  %396 = vst [vmem:[#allocation2 + $0x178] sm:$0xff] %v6448_v14 }
  0x4e   : > { %397 = vst [vmem:[#allocation2 + $0x108] sm:$0xff] %v6448_v14  ;;  %398 = vst [vmem:[#allocation2 + $0x110] sm:$0xff] %v6448_v14 }
  0x4f   : > { %399 = vst [vmem:[#allocation2 + $0x90] sm:$0xff] %v6448_v14  ;;  %400 = vst [vmem:[#allocation2 + $0x118] sm:$0xff] %v6448_v14 }
  0x50   : > { %401 = vst [vmem:[#allocation2 + $0x148] sm:$0xff] %v6448_v14  ;;  %402 = vst [vmem:[#allocation2 + $0x100] sm:$0xff] %v6448_v14 }
  0x51   : > { %403 = vst [vmem:[#allocation2 + $0x58] sm:$0xff] %v6448_v14  ;;  %404 = vst [vmem:[#allocation2 + $0xd8] sm:$0xff] %v6448_v14 }
  0x52   : > { %405 = vst [vmem:[#allocation2 + $0x180] sm:$0xff] %v6448_v14  ;;  %406 = vst [vmem:[#allocation2 + $0x130] sm:$0xff] %v6448_v14 }
  0x53   : > { %407 = vst [vmem:[#allocation2 + $0x138] sm:$0xff] %v6448_v14  ;;  %408 = vst [vmem:[#allocation2 + $0x78] sm:$0xff] %v6448_v14 }
  0x54   : > { %409 = vst [vmem:[#allocation2 + $0xa0] sm:$0xff] %v6448_v14  ;;  %410 = vst [vmem:[#allocation2] sm:$0xff] %v6448_v14 }
  0x55   : > { %411 = vst [vmem:[#allocation2 + $0x20] sm:$0xff] %v6448_v14  ;;  %412 = vst [vmem:[#allocation2 + $0xe0] sm:$0xff] %v6448_v14 }
  0x56   : > { %413 = vst [vmem:[#allocation2 + $0xf0] sm:$0xff] %v6448_v14  ;;  %414 = vst [vmem:[#allocation2 + $0x188] sm:$0xff] %v6448_v14 }
  0x57   : > { %415 = vst [vmem:[#allocation2 + $0xa8] sm:$0xff] %v6448_v14  ;;  %416 = vst [vmem:[#allocation2 + $0x88] sm:$0xff] %v6448_v14 }
  0x58   : > { %417 = vst [vmem:[#allocation2 + $0xb8] sm:$0xff] %v6448_v14  ;;  %418 = vst [vmem:[#allocation2 + $0x170] sm:$0xff] %v6448_v14 }
  0x59   : > { %419 = vst [vmem:[#allocation2 + $0xc0] sm:$0xff] %v6448_v14  ;;  %420 = vst [vmem:[#allocation2 + $0x140] sm:$0xff] %v6448_v14 }
  0x5a   : > { %421 = vst [vmem:[#allocation2 + $0x50] sm:$0xff] %v6448_v14  ;;  %422 = vst [vmem:[#allocation2 + $0x168] sm:$0xff] %v6448_v14 }
  0x5b   : > { %423 = vst [vmem:[#allocation2 + $0x190] sm:$0xff] %v6448_v14  ;;  %424 = vst [vmem:[#allocation2 + $0x38] sm:$0xff] %v6448_v14 }
  0x5c   : > { %425 = vst [vmem:[#allocation2 + $0x60] sm:$0xff] %v6448_v14  ;;  %426 = vst [vmem:[#allocation2 + $0x18] sm:$0xff] %v6448_v14 }
  0x5d   : > { %427 = vst [vmem:[#allocation2 + $0x158] sm:$0xff] %v6448_v14  ;;  %428 = vst [vmem:[#allocation2 + $0x120] sm:$0xff] %v6448_v14 }
  0x5e   : > { %429 = vst [vmem:[#allocation2 + $0x198] sm:$0xff] %v6448_v14  ;;  %430 = vst [vmem:[#allocation2 + $0x68] sm:$0xff] %v6448_v14 }
  0x5f   : > { %431 = vst [vmem:[#allocation2 + $0x30] sm:$0xff] %v6448_v14  ;;  %432 = vst [vmem:[#allocation2 + $0xc8] sm:$0xff] %v6448_v14 }
  0x60   : > { %433 = vst [vmem:[#allocation2 + $0xf8] sm:$0xff] %v6448_v14  ;;  %434 = vst [vmem:[#allocation2 + $0x28] sm:$0xff] %v6448_v14 }
  0x61   : > { %435 = vst [vmem:[#allocation2 + $0x8] sm:$0xff] %v6448_v14  ;;  %436 = vst [vmem:[#allocation2 + $0x80] sm:$0xff] %v6448_v14 }
  0x62   : > { %437 = vst [vmem:[#allocation2 + $0x98] sm:$0x3] %v6448_v14  ;;  %438 = vst [vmem:[#allocation2 + $0x150] sm:$0x3] %v6448_v14 }
  0x63   : > { %439 = vst [vmem:[#allocation2 + $0xe8] sm:$0x3] %v6448_v14  ;;  %440 = vst [vmem:[#allocation2 + $0x70] sm:$0x3] %v6448_v14 }
  0x64 PF: > { %v5820_v15 = vld [vmem:[%s6679_s10 + $0xe4] ss:$16 sps:$4 sm:$0xff]   ;;  %v5824_v17 = vld [vmem:[%s6679_s10 + $0xe0] ss:$16 sps:$4 sm:$0xff]   ;;  %v8278_v1 = vmov 0   ;;  %v442_v3 = vld [vmem:[%s6681_s11 + $0x8] sm:$0xff] }
  0x65   : > { %v5822_v16 = vld [vmem:[%s6679_s10 + $0x2e4] ss:$16 sps:$4 sm:$0xff]   ;;  %3355 = vmatprep.subr.bf16.mxu0 %v5820_v15  ;;  %v5825_v18 = vld [vmem:[%s6679_s10 + $0x2e0] ss:$16 sps:$4 sm:$0xff]   ;;  %v448_v4 = vld [vmem:[%s6681_s11 + $0x38] sm:$0xff]  ;;  %v520_v7 = vmax.bf16 %v8278_v1, %v442_v3  ;;  %p5707_p10 = scmp.ne.s32.totalorder %s6492_s18, 2 }
  0x66   : > { %3456 = vmatprep.subr.bf16.mxu1 %v5822_v16  ;;  %v5826_v19 = vld [vmem:[%s6679_s10 + $0xc4] ss:$16 sps:$4 sm:$0xff]   ;;  %3356 = vmatpush1.bf16.msra.mxu0 %v5824_v17  ;;  %v5830_v21 = vld [vmem:[%s6679_s10 + $0xc0] ss:$16 sps:$4 sm:$0xff]   ;;  %v526_v8 = vmax.bf16 %v8278_v1, %v448_v4 }
  0x67   : > { %3457 = vmatpush1.bf16.msra.mxu1 %v5825_v18  ;;  %v5828_v20 = vld [vmem:[%s6679_s10 + $0x2c4] ss:$16 sps:$4 sm:$0xff]   ;;  %3357 = vmatprep.subr.bf16.mxu0 %v5826_v19  ;;  %v5831_v22 = vld [vmem:[%s6679_s10 + $0x2c0] ss:$16 sps:$4 sm:$0xff]  }
  0x68   : > { %3458 = vmatprep.subr.bf16.mxu1 %v5828_v20  ;;  %v5832_v23 = vld [vmem:[%s6679_s10 + $0xa4] ss:$16 sps:$4 sm:$0xff]   ;;  %v5836_v25 = vld [vmem:[%s6679_s10 + $0xa0] ss:$16 sps:$4 sm:$0xff]   ;;  %v6744_v11 = vcombine.high %v520_v7, %v526_v8 }
  0x69   : > { %v5834_v24 = vld [vmem:[%s6679_s10 + $0x2a4] ss:$16 sps:$4 sm:$0xff]   ;;  %v5837_v26 = vld [vmem:[%s6679_s10 + $0x2a0] ss:$16 sps:$4 sm:$0xff]  }
  0x6a   : > { %3358 = vmatpush1.bf16.msra.mxu0 %v5830_v21  ;;  %v5838_v27 = vld [vmem:[%s6679_s10 + $0x84] ss:$16 sps:$4 sm:$0xff]   ;;  %v5842_v29 = vld [vmem:[%s6679_s10 + $0x80] ss:$16 sps:$4 sm:$0xff]   ;;  %3488 = vmatprep.mubr.bf16.mxu1 %v6744_v11 }
  0x6b   : > { %3459 = vmatpush1.bf16.msra.mxu1 %v5831_v22  ;;  %3359 = vmatprep.subr.bf16.mxu0 %v5832_v23  ;;  %v5840_v28 = vld [vmem:[%s6679_s10 + $0x284] ss:$16 sps:$4 sm:$0xff]   ;;  %v5843_v30 = vld [vmem:[%s6679_s10 + $0x280] ss:$16 sps:$4 sm:$0xff]  }
  0x6c   : > { %3460 = vmatprep.subr.bf16.mxu1 %v5834_v24  ;;  %v5844_v31 = vld [vmem:[%s6679_s10 + $0x64] ss:$16 sps:$4 sm:$0xff]   ;;  %v5848_v33 = vld [vmem:[%s6679_s10 + $0x60] ss:$16 sps:$4 sm:$0xff]  }
  0x6d   : > { %v5846_v32 = vld [vmem:[%s6679_s10 + $0x264] ss:$16 sps:$4 sm:$0xff]   ;;  %v5849_v34 = vld [vmem:[%s6679_s10 + $0x260] ss:$16 sps:$4 sm:$0xff]  }
  0x6e   : > { %3360 = vmatpush1.bf16.msra.mxu0 %v5836_v25  ;;  %v5850_v35 = vld [vmem:[%s6679_s10 + $0x44] ss:$16 sps:$4 sm:$0xff]   ;;  %v5854_v37 = vld [vmem:[%s6679_s10 + $0x40] ss:$16 sps:$4 sm:$0xff]  }
  0x6f   : > { %3461 = vmatpush1.bf16.msra.mxu1 %v5837_v26  ;;  %3361 = vmatprep.subr.bf16.mxu0 %v5838_v27  ;;  %v5852_v36 = vld [vmem:[%s6679_s10 + $0x244] ss:$16 sps:$4 sm:$0xff]   ;;  %v5855_v38 = vld [vmem:[%s6679_s10 + $0x240] ss:$16 sps:$4 sm:$0xff]  }
  0x70   : > { %3462 = vmatprep.subr.bf16.mxu1 %v5840_v28  ;;  %v5856_v39 = vld [vmem:[%s6679_s10 + $0x24] ss:$16 sps:$4 sm:$0xff]   ;;  %v5860_v41 = vld [vmem:[%s6679_s10 + $0x20] ss:$16 sps:$4 sm:$0xff]   ;;  %v454_v28 = vld [vmem:[%s6681_s11 + $0x68] sm:$0xff] }
  0x71   : > { %v5858_v40 = vld [vmem:[%s6679_s10 + $0x224] ss:$16 sps:$4 sm:$0xff]   ;;  %v5861_v42 = vld [vmem:[%s6679_s10 + $0x220] ss:$16 sps:$4 sm:$0xff]  }
  0x72   : > { %3362 = vmatpush1.bf16.msra.mxu0 %v5842_v29  ;;  %v5862_v43 = vld [vmem:[%s6679_s10 + $0x4] ss:$16 sps:$4 sm:$0xff]   ;;  %v5866_v45 = vld [vmem:[%s6679_s10] ss:$16 sps:$4 sm:$0xff]   ;;  %v460_v29 = vld [vmem:[%s6681_s11 + $0x98] sm:$0xff] }
  0x73   : > { %3463 = vmatpush1.bf16.msra.mxu1 %v5843_v30  ;;  %3363 = vmatprep.subr.bf16.mxu0 %v5844_v31  ;;  %v5864_v44 = vld [vmem:[%s6679_s10 + $0x204] ss:$16 sps:$4 sm:$0xff]   ;;  %v5867_v46 = vld [vmem:[%s6679_s10 + $0x200] ss:$16 sps:$4 sm:$0xff]  }
  0x74   : > { %3464 = vmatprep.subr.bf16.mxu1 %v5846_v32  ;;  %v5868_v47 = vld [vmem:[%s6679_s10 + $0x1e4] ss:$16 sps:$4 sm:$0xff]   ;;  %v5872_v49 = vld [vmem:[%s6679_s10 + $0x1e0] ss:$16 sps:$4 sm:$0xff]  }
  0x75   : > { %v5870_v48 = vld [vmem:[%s6679_s10 + $0x3e4] ss:$16 sps:$4 sm:$0xff]   ;;  %v5873_v50 = vld [vmem:[%s6679_s10 + $0x3e0] ss:$16 sps:$4 sm:$0xff]  }
  0x76   : > { %3364 = vmatpush1.bf16.msra.mxu0 %v5848_v33  ;;  %v5874_v51 = vld [vmem:[%s6679_s10 + $0x1c4] ss:$16 sps:$4 sm:$0xff]   ;;  %v5878_v53 = vld [vmem:[%s6679_s10 + $0x1c0] ss:$16 sps:$4 sm:$0xff]  }
  0x77   : > { %3465 = vmatpush1.bf16.msra.mxu1 %v5849_v34  ;;  %3365 = vmatprep.subr.bf16.mxu0 %v5850_v35  ;;  %v5876_v52 = vld [vmem:[%s6679_s10 + $0x3c4] ss:$16 sps:$4 sm:$0xff]   ;;  %v5879_v54 = vld [vmem:[%s6679_s10 + $0x3c0] ss:$16 sps:$4 sm:$0xff]   ;;  %v532_v34 = vmax.bf16 %v8278_v1, %v454_v28  ;;  %v538_v35 = vmax.bf16 %v8278_v1, %v460_v29 }
  0x78   : > { %3466 = vmatprep.subr.bf16.mxu1 %v5852_v36  ;;  %v5880_v55 = vld [vmem:[%s6679_s10 + $0x1a4] ss:$16 sps:$4 sm:$0xff]   ;;  %v5884_v57 = vld [vmem:[%s6679_s10 + $0x1a0] ss:$16 sps:$4 sm:$0xff]  }
  0x79   : > { %v5882_v56 = vld [vmem:[%s6679_s10 + $0x3a4] ss:$16 sps:$4 sm:$0xff]   ;;  %v5885_v58 = vld [vmem:[%s6679_s10 + $0x3a0] ss:$16 sps:$4 sm:$0xff]  }
  0x7a   : > { %3366 = vmatpush1.bf16.msra.mxu0 %v5854_v37  ;;  %v5886_v59 = vld [vmem:[%s6679_s10 + $0x184] ss:$16 sps:$4 sm:$0xff]   ;;  %v5890_v61 = vld [vmem:[%s6679_s10 + $0x180] ss:$16 sps:$4 sm:$0xff]   ;;  %v6774_v37 = vcombine.low %v520_v7, %v526_v8 }
  0x7b   : > { %3467 = vmatpush1.bf16.msra.mxu1 %v5855_v38  ;;  %3367 = vmatprep.subr.bf16.mxu0 %v5856_v39  ;;  %v5888_v60 = vld [vmem:[%s6679_s10 + $0x384] ss:$16 sps:$4 sm:$0xff]   ;;  %v5891_v62 = vld [vmem:[%s6679_s10 + $0x380] ss:$16 sps:$4 sm:$0xff]  }
  0x7c   : > { %3468 = vmatprep.subr.bf16.mxu1 %v5858_v40  ;;  %v441_v63 = vld [vmem:[%s6681_s11] sm:$0xff]  ;;  %v447_v0 = vld [vmem:[%s6681_s11 + $0x30] sm:$0xff] }
  0x7d   : > { %v519_v2 = vmax.bf16 %v8278_v1, %v441_v63  ;;  %v5892_v5 = vld [vmem:[%s6679_s10 + $0x164] ss:$16 sps:$4 sm:$0xff]   ;;  %v525_v6 = vmax.bf16 %v8278_v1, %v447_v0  ;;  %v5896_v12 = vld [vmem:[%s6679_s10 + $0x160] ss:$16 sps:$4 sm:$0xff]  }
  0x7e   : > { %3368 = vmatpush1.bf16.msra.mxu0 %v5860_v41  ;;  %v5894_v9 = vld [vmem:[%s6679_s10 + $0x364] ss:$16 sps:$4 sm:$0xff]   ;;  %v5897_v13 = vld [vmem:[%s6679_s10 + $0x360] ss:$16 sps:$4 sm:$0xff]  }
  0x7f   : > { %3469 = vmatpush1.bf16.msra.mxu1 %v5861_v42  ;;  %3369 = vmatprep.subr.bf16.mxu0 %v5862_v43  ;;  %v6742_v10 = vcombine.high %v519_v2, %v525_v6  ;;  %v5898_v14 = vld [vmem:[%s6679_s10 + $0x144] ss:$16 sps:$4 sm:$0xff]   ;;  %v5902_v16 = vld [vmem:[%s6679_s10 + $0x140] ss:$16 sps:$4 sm:$0xff]   ;;  %v6772_v36 = vcombine.low %v519_v2, %v525_v6  ;;  %v484_v6 = vld [vmem:[%s6681_s11 + $0x158] sm:$0xff] }
  0x80   : > { %3470 = vmatprep.subr.bf16.mxu1 %v5864_v44  ;;  %v5900_v15 = vld [vmem:[%s6679_s10 + $0x344] ss:$16 sps:$4 sm:$0xff]   ;;  %v5903_v17 = vld [vmem:[%s6679_s10 + $0x340] ss:$16 sps:$4 sm:$0xff]  }
  0x81   : > { %3387 = vmatprep.mubr.bf16.mxu0 %v6742_v10  ;;  %v5904_v18 = vld [vmem:[%s6679_s10 + $0x124] ss:$16 sps:$4 sm:$0xff]   ;;  %v5908_v20 = vld [vmem:[%s6679_s10 + $0x120] ss:$16 sps:$4 sm:$0xff]  }
  0x82   : > { %3370 = vmatpush1.bf16.msra.mxu0 %v5866_v45  ;;  %v5906_v19 = vld [vmem:[%s6679_s10 + $0x324] ss:$16 sps:$4 sm:$0xff]   ;;  %v5909_v21 = vld [vmem:[%s6679_s10 + $0x320] ss:$16 sps:$4 sm:$0xff]   ;;  %v6784_v45 = vcombine.high %v532_v34, %v538_v35 }
  0x83   : > { %3471 = vmatpush1.bf16.msra.mxu1 %v5867_v46  ;;  %3371 = vmatprep.subr.bf16.mxu0 %v5868_v47  ;;  %v5910_v22 = vld [vmem:[%s6679_s10 + $0x104] ss:$16 sps:$4 sm:$0xff]   ;;  %v5914_v24 = vld [vmem:[%s6679_s10 + $0x100] ss:$16 sps:$4 sm:$0xff]  }
  0x84   : > { %3472 = vmatprep.subr.bf16.mxu1 %v5870_v48  ;;  %v5912_v23 = vld [vmem:[%s6679_s10 + $0x304] ss:$16 sps:$4 sm:$0xff]   ;;  %v5915_v25 = vld [vmem:[%s6679_s10 + $0x300] ss:$16 sps:$4 sm:$0xff]   ;;  %v466_v48 = vld [vmem:[%s6681_s11 + $0xc8] sm:$0xff] }
  0x85   : > { %v453_v26 = vld [vmem:[%s6681_s11 + $0x60] sm:$0xff]  ;;  %v459_v27 = vld [vmem:[%s6681_s11 + $0x90] sm:$0xff] }
  0x86   : > { %3372 = vmatpush2.bf16.msra.mxu0 %v5872_v49  ;;  %v5918_v30 = vld [vmem:[%s6679_s10 + $0x4e4] ss:$16 sps:$4 sm:$0xff]   ;;  %v531_v32 = vmax.bf16 %v8278_v1, %v453_v26  ;;  %v537_v33 = vmax.bf16 %v8278_v1, %v459_v27  ;;  %v5916_v38 = vld [vmem:[%s6679_s10 + $0x4e0] ss:$16 sps:$4 sm:$0xff]   ;;  %v472_v49 = vld [vmem:[%s6681_s11 + $0xf8] sm:$0xff] }
  0x87   : > { %3473 = vmatpush2.bf16.msra.mxu1 %v5873_v50  ;;  %3373 = vmatprep.subr.bf16.mxu0 %v5874_v51  ;;  %v5921_v31 = vld [vmem:[%s6679_s10 + $0x6e4] ss:$16 sps:$4 sm:$0xff]   ;;  %v5919_v39 = vld [vmem:[%s6679_s10 + $0x6e0] ss:$16 sps:$4 sm:$0xff]   ;;  %v490_v26 = vld [vmem:[%s6681_s11 + $0x188] sm:$0xff] }
  0x88   : > { %3474 = vmatprep.subr.bf16.mxu1 %v5876_v52  ;;  %v5924_v40 = vld [vmem:[%s6679_s10 + $0x4c4] ss:$16 sps:$4 sm:$0xff]   ;;  %v5922_v42 = vld [vmem:[%s6679_s10 + $0x4c0] ss:$16 sps:$4 sm:$0xff]   ;;  %v6782_v44 = vcombine.high %v531_v32, %v537_v33  ;;  %v496_v27 = vld [vmem:[%s6681_s11 + $0x1b8] sm:$0xff] }
  0x89   : > { %v5927_v41 = vld [vmem:[%s6679_s10 + $0x6c4] ss:$16 sps:$4 sm:$0xff]   ;;  %v5925_v43 = vld [vmem:[%s6679_s10 + $0x6c0] ss:$16 sps:$4 sm:$0xff]  }
  0x8a   : > { %3374 = vmatpush2.bf16.msra.mxu0 %v5878_v53  ;;  %v465_v46 = vld [vmem:[%s6681_s11 + $0xc0] sm:$0xff]  ;;  %v471_v47 = vld [vmem:[%s6681_s11 + $0xf0] sm:$0xff] }
  0x8b   : > { %3475 = vmatpush2.bf16.msra.mxu1 %v5879_v54  ;;  %3375 = vmatprep.subr.bf16.mxu0 %v5880_v55  ;;  %v5930_v50 = vld [vmem:[%s6679_s10 + $0x4a4] ss:$16 sps:$4 sm:$0xff]   ;;  %v543_v52 = vmax.bf16 %v8278_v1, %v465_v46  ;;  %v549_v53 = vmax.bf16 %v8278_v1, %v471_v47  ;;  %v544_v54 = vmax.bf16 %v8278_v1, %v466_v48  ;;  %v5937_v63 = vld [vmem:[%s6679_s10 + $0x680] ss:$16 sps:$4 sm:$0xff]  }
  0x8c   : > { %3476 = vmatprep.subr.bf16.mxu1 %v5882_v56  ;;  %v5933_v51 = vld [vmem:[%s6679_s10 + $0x6a4] ss:$16 sps:$4 sm:$0xff]   ;;  %v550_v55 = vmax.bf16 %v8278_v1, %v472_v49  ;;  %v6800_v56 = vcombine.low %v531_v32, %v537_v33  ;;  %v5949_v28 = vld [vmem:[%s6679_s10 + $0x640] ss:$16 sps:$4 sm:$0xff]   ;;  %v502_v49 = vld [vmem:[%s6681_s11 + $0x1e8] sm:$0xff] }
  0x8d   : > { %v6810_v0 = vcombine.high %v543_v52, %v549_v53  ;;  %v477_v3 = vld [vmem:[%s6681_s11 + $0x120] sm:$0xff]  ;;  %v483_v4 = vld [vmem:[%s6681_s11 + $0x150] sm:$0xff] }
  0x8e   : > { %3376 = vmatpush2.bf16.msra.mxu0 %v5884_v57  ;;  %v6802_v57 = vcombine.low %v532_v34, %v538_v35  ;;  %v6812_v2 = vcombine.high %v544_v54, %v550_v55  ;;  %v5942_v7 = vld [vmem:[%s6679_s10 + $0x464] ss:$16 sps:$4 sm:$0xff]   ;;  %v5952_v32 = vld [vmem:[%s6679_s10 + $0x420] ss:$16 sps:$4 sm:$0xff]   ;;  %v568_v34 = vmax.bf16 %v8278_v1, %v490_v26  ;;  %v574_v35 = vmax.bf16 %v8278_v1, %v496_v27 }
  0x8f   : > { %3477 = vmatpush2.bf16.msra.mxu1 %v5885_v58  ;;  %3377 = vmatprep.subr.bf16.mxu0 %v5886_v59  ;;  %v5928_v58 = vld [vmem:[%s6679_s10 + $0x4a0] ss:$16 sps:$4 sm:$0xff]   ;;  %v5945_v8 = vld [vmem:[%s6679_s10 + $0x664] ss:$16 sps:$4 sm:$0xff]  }
  0x90   : > { %3478 = vmatprep.subr.bf16.mxu1 %v5888_v60  ;;  %v5931_v59 = vld [vmem:[%s6679_s10 + $0x6a0] ss:$16 sps:$4 sm:$0xff]   ;;  %v5936_v60 = vld [vmem:[%s6679_s10 + $0x484] ss:$16 sps:$4 sm:$0xff]   ;;  %v6868_v48 = vcombine.high %v568_v34, %v574_v35 }
  0x91   : > { %v5954_v29 = vld [vmem:[%s6679_s10 + $0x424] ss:$16 sps:$4 sm:$0xff]  }
  0x92   : > { %3378 = vmatpush2.bf16.msra.mxu0 %v5890_v61  ;;  %v5939_v61 = vld [vmem:[%s6679_s10 + $0x684] ss:$16 sps:$4 sm:$0xff]  }
  0x93   : > { %3479 = vmatpush2.bf16.msra.mxu1 %v5891_v62  ;;  %3379 = vmatprep.subr.bf16.mxu0 %v5892_v5  ;;  %v5934_v62 = vld [vmem:[%s6679_s10 + $0x480] ss:$16 sps:$4 sm:$0xff]   ;;  %v478_v5 = vld [vmem:[%s6681_s11 + $0x128] sm:$0xff]  ;;  %v5984_v26 = vld [vmem:[%s6679_s10 + $0x584] ss:$16 sps:$4 sm:$0xff]  }
  0x94   : > { %3480 = vmatprep.subr.bf16.mxu1 %v5894_v9  ;;  %v555_v9 = vmax.bf16 %v8278_v1, %v477_v3  ;;  %v507_v46 = vld [vmem:[%s6681_s11 + $0x210] sm:$0xff] }
  0x95   : > { %v5967_v3 = vld [vmem:[%s6679_s10 + $0x7e0] ss:$16 sps:$4 sm:$0xff]   ;;  %v5987_v27 = vld [vmem:[%s6679_s10 + $0x784] ss:$16 sps:$4 sm:$0xff]  }
  0x96   : > { %3380 = vmatpush2.bf16.msra.mxu0 %v5896_v12  ;;  %v561_v12 = vmax.bf16 %v8278_v1, %v483_v4  ;;  %v5972_v4 = vld [vmem:[%s6679_s10 + $0x5c4] ss:$16 sps:$4 sm:$0xff]  }
  0x97   : > { %3481 = vmatpush2.bf16.msra.mxu1 %v5897_v13  ;;  %3381 = vmatprep.subr.bf16.mxu0 %v5898_v14  ;;  %v556_v13 = vmax.bf16 %v8278_v1, %v478_v5  ;;  %v562_v14 = vmax.bf16 %v8278_v1, %v484_v6  ;;  %v5975_v5 = vld [vmem:[%s6679_s10 + $0x7c4] ss:$16 sps:$4 sm:$0xff]  }
  0x98   : > { %3482 = vmatprep.subr.bf16.mxu1 %v5900_v15  ;;  %v5940_v15 = vld [vmem:[%s6679_s10 + $0x460] ss:$16 sps:$4 sm:$0xff]  }
  0x9a   : > { %3382 = vmatpush2.bf16.msra.mxu0 %v5902_v16  ;;  %v5943_v16 = vld [vmem:[%s6679_s10 + $0x660] ss:$16 sps:$4 sm:$0xff]  }
  0x9b   : > { %3483 = vmatpush2.bf16.msra.mxu1 %v5903_v17  ;;  %3383 = vmatprep.subr.bf16.mxu0 %v5904_v18  ;;  %v6830_v17 = vcombine.low %v543_v52, %v549_v53  ;;  %v6832_v18 = vcombine.low %v544_v54, %v550_v55  ;;  %v5961_v52 = vld [vmem:[%s6679_s10 + $0x600] ss:$16 sps:$4 sm:$0xff]   ;;  %v5966_v53 = vld [vmem:[%s6679_s10 + $0x5e4] ss:$16 sps:$4 sm:$0xff]  }
  0x9c   : > { %3484 = vmatprep.subr.bf16.mxu1 %v5906_v19  ;;  %v5948_v19 = vld [vmem:[%s6679_s10 + $0x444] ss:$16 sps:$4 sm:$0xff]  }
  0x9d   : > { %v5969_v54 = vld [vmem:[%s6679_s10 + $0x7e4] ss:$16 sps:$4 sm:$0xff]  }
  0x9e   : > { %3384 = vmatpush2.bf16.msra.mxu0 %v5908_v20  ;;  %v5951_v20 = vld [vmem:[%s6679_s10 + $0x644] ss:$16 sps:$4 sm:$0xff]  }
  0x9f   : > { %3485 = vmatpush2.bf16.msra.mxu1 %v5909_v21  ;;  %3385 = vmatprep.subr.bf16.mxu0 %v5910_v22  ;;  %v5946_v21 = vld [vmem:[%s6679_s10 + $0x440] ss:$16 sps:$4 sm:$0xff]   ;;  %v6837_v22 = vcombine.high %v555_v9, %v561_v12 }
  0xa0   : > { %3486 = vmatprep.subr.bf16.mxu1 %v5912_v23  ;;  %v6839_v23 = vcombine.high %v556_v13, %v562_v14 }
  0xa2   : > { %3386 = vmatpush2.bf16.msra.mxu0 %v5914_v24  ;;  %v489_v24 = vld [vmem:[%s6681_s11 + $0x180] sm:$0xff] }
  0xa3   : > { %3487 = vmatpush2.bf16.msra.mxu1 %v5915_v25  ;;  %3557 = vmatprep.subr.bf16.mxu0 %v5918_v30  ;;  %v495_v25 = vld [vmem:[%s6681_s11 + $0x1b0] sm:$0xff] }
  0xa4   : > { %3658 = vmatprep.subr.bf16.mxu1 %v5921_v31  ;;  %v5957_v30 = vld [vmem:[%s6679_s10 + $0x624] ss:$16 sps:$4 sm:$0xff]   ;;  %v567_v31 = vmax.bf16 %v8278_v1, %v489_v24  ;;  %v573_v33 = vmax.bf16 %v8278_v1, %v495_v25  ;;  %v5976_v24 = vld [vmem:[%s6679_s10 + $0x5a0] ss:$16 sps:$4 sm:$0xff]  }
  0xa5   : > { %3388 = vmatmul.mubr.bf16.vlgmr.msra.gmra.mxu0 %v6772_v36  ;;  %v5979_v25 = vld [vmem:[%s6679_s10 + $0x7a0] ss:$16 sps:$4 sm:$0xff]  }
  0xa6   : > { %3489 = vmatmul.mubr.bf16.vlgmr.msra.gmra.mxu1 %v6774_v37  ;;  %3558 = vmatpush1.bf16.msra.mxu0 %v5916_v38  ;;  %v5955_v38 = vld [vmem:[%s6679_s10 + $0x620] ss:$16 sps:$4 sm:$0xff]   ;;  %v6866_v47 = vcombine.high %v567_v31, %v573_v33 }
  0xa7   : > { %3659 = vmatpush1.bf16.msra.mxu1 %v5919_v39  ;;  %3559 = vmatprep.subr.bf16.mxu0 %v5924_v40  ;;  %v6858_v39 = vcombine.low %v555_v9, %v561_v12  ;;  %v6860_v40 = vcombine.low %v556_v13, %v562_v14  ;;  %v514_v9 = vld [vmem:[%s6681_s11 + $0x248] sm:$0x11]  ;;  %v5970_v12 = vld [vmem:[%s6679_s10 + $0x5c0] ss:$16 sps:$4 sm:$0xff]   ;;  %v5978_v14 = vld [vmem:[%s6679_s10 + $0x5a4] ss:$16 sps:$4 sm:$0xff]  }
  0xa8   : > { %3660 = vmatprep.subr.bf16.mxu1 %v5927_v41  ;;  %3397 = vmatprep.mubr.bf16.mxu0 %v6782_v44  ;;  %v5960_v41 = vld [vmem:[%s6679_s10 + $0x404] ss:$16 sps:$4 sm:$0xff]   ;;  %v5973_v13 = vld [vmem:[%s6679_s10 + $0x7c0] ss:$16 sps:$4 sm:$0xff]  }
  0xa9   : > { %3498 = vmatprep.mubr.bf16.mxu1 %v6784_v45 }
  0xaa   : > { %3560 = vmatpush1.bf16.msra.mxu0 %v5922_v42  ;;  %v5963_v42 = vld [vmem:[%s6679_s10 + $0x604] ss:$16 sps:$4 sm:$0xff]  }
  0xab   : > { %3661 = vmatpush1.bf16.msra.mxu1 %v5925_v43  ;;  %3561 = vmatprep.subr.bf16.mxu0 %v5930_v50  ;;  %v501_v43 = vld [vmem:[%s6681_s11 + $0x1e0] sm:$0xff]  ;;  %v508_v50 = vld [vmem:[%s6681_s11 + $0x218] sm:$0xff] }
  0xac   : > { %3662 = vmatprep.subr.bf16.mxu1 %v5933_v51  ;;  %v5958_v51 = vld [vmem:[%s6679_s10 + $0x400] ss:$16 sps:$4 sm:$0xff]   ;;  %v579_v55 = vmax.bf16 %v8278_v1, %v501_v43 }
  0xad   : > { %3398 = vmatmul.mubr.bf16.gmra.mxu0 %v6800_v56 }
  0xae   : > { %3499 = vmatmul.mubr.bf16.gmra.mxu1 %v6802_v57  ;;  %3562 = vmatpush1.bf16.msra.mxu0 %v5928_v58  ;;  %v585_v58 = vmax.bf16 %v8278_v1, %v507_v46 }
  0xaf   : > { %3663 = vmatpush1.bf16.msra.mxu1 %v5931_v59  ;;  %3563 = vmatprep.subr.bf16.mxu0 %v5936_v60  ;;  %v580_v59 = vmax.bf16 %v8278_v1, %v502_v49  ;;  %v586_v60 = vmax.bf16 %v8278_v1, %v508_v50 }
  0xb0   : > { %3664 = vmatprep.subr.bf16.mxu1 %v5939_v61  ;;  %3407 = vmatprep.mubr.bf16.mxu0 %v6810_v0  ;;  %v6884_v61 = vcombine.low %v567_v31, %v573_v33  ;;  %v6892_v6 = vcombine.high %v579_v55, %v585_v58  ;;  %v449_v33 = vld [vmem:[%s6681_s11 + $0x40] sm:$0xff] }
  0xb1   : > { %3508 = vmatprep.mubr.bf16.mxu1 %v6812_v2  ;;  %v527_v43 = vmax.bf16 %v8278_v1, %v449_v33 }
  0xb2   : > { %3564 = vmatpush1.bf16.msra.mxu0 %v5934_v62  ;;  %v6886_v62 = vcombine.low %v568_v34, %v574_v35  ;;  %v444_v34 = vld [vmem:[%s6681_s11 + $0x18] sm:$0xff]  ;;  %v450_v35 = vld [vmem:[%s6681_s11 + $0x48] sm:$0xff] }
  0xb3   : > { %3665 = vmatpush1.bf16.msra.mxu1 %v5937_v63  ;;  %3565 = vmatprep.subr.bf16.mxu0 %v5942_v7  ;;  %v5964_v63 = vld [vmem:[%s6679_s10 + $0x5e0] ss:$16 sps:$4 sm:$0xff]   ;;  %v6894_v7 = vcombine.high %v580_v59, %v586_v60  ;;  %v522_v46 = vmax.bf16 %v8278_v1, %v444_v34  ;;  %v528_v49 = vmax.bf16 %v8278_v1, %v450_v35 }
  0xb4   : > { %3666 = vmatprep.subr.bf16.mxu1 %v5945_v8  ;;  %v513_v8 = vld [vmem:[%s6681_s11 + $0x240] sm:$0x11] }
  0xb5   : > { %3408 = vmatmul.mubr.bf16.gmra.mxu0 %v6830_v17  ;;  %v6974_v34 = vcombine.low %v522_v46, %v528_v49  ;;  %v6012_v35 = vld [vmem:[%s6679_s10 + $0x8e0] ss:$16 sps:$4 sm:$0xff]  }
  0xb6   : > { %3509 = vmatmul.mubr.bf16.gmra.mxu1 %v6832_v18  ;;  %3566 = vmatpush1.bf16.msra.mxu0 %v5940_v15  ;;  %v5981_v15 = vld [vmem:[%s6679_s10 + $0x7a4] ss:$16 sps:$4 sm:$0xff]  }
  0xb7   : > { %3667 = vmatpush1.bf16.msra.mxu1 %v5943_v16  ;;  %3567 = vmatprep.subr.bf16.mxu0 %v5948_v19  ;;  %v591_v16 = vmax.bf16 %v8278_v1, %v513_v8  ;;  %v592_v19 = vmax.bf16 %v8278_v1, %v514_v9  ;;  %v6003_v8 = vld [vmem:[%s6679_s10 + $0x720] ss:$16 sps:$4 sm:$0xff]   ;;  %v6008_v9 = vld [vmem:[%s6679_s10 + $0x504] ss:$16 sps:$4 sm:$0xff]  }
  0xb8   : > { %3668 = vmatprep.subr.bf16.mxu1 %v5951_v20  ;;  %3417 = vmatprep.mubr.bf16.mxu0 %v6837_v22  ;;  %v6908_v20 = vcombine.low %v579_v55, %v585_v58  ;;  %v5999_v55 = vld [vmem:[%s6679_s10 + $0x744] ss:$16 sps:$4 sm:$0xff]  }
  0xb9   : > { %3518 = vmatprep.mubr.bf16.mxu1 %v6839_v23  ;;  %v6920_v31 = vcombine.high %v592_v19, %v592_v19  ;;  %v6936_v50 = vcombine.low %v591_v16, %v591_v16 }
  0xba   : > { %3568 = vmatpush1.bf16.msra.mxu0 %v5946_v21  ;;  %v6910_v21 = vcombine.low %v580_v59, %v586_v60  ;;  %v6946_v59 = vcombine.high %v522_v46, %v528_v49  ;;  %v5994_v60 = vld [vmem:[%s6679_s10 + $0x540] ss:$16 sps:$4 sm:$0xff]   ;;  %v468_v46 = vld [vmem:[%s6681_s11 + $0xd8] sm:$0xff]  ;;  %v474_v49 = vld [vmem:[%s6681_s11 + $0x108] sm:$0xff] }
  0xbb   : > { %3669 = vmatpush1.bf16.msra.mxu1 %v5949_v28  ;;  %3569 = vmatprep.subr.bf16.mxu0 %v5954_v29  ;;  %v5982_v28 = vld [vmem:[%s6679_s10 + $0x580] ss:$16 sps:$4 sm:$0xff]  }
  0xbc   : > { %3670 = vmatprep.subr.bf16.mxu1 %v5957_v30  ;;  %v5985_v29 = vld [vmem:[%s6679_s10 + $0x780] ss:$16 sps:$4 sm:$0xff]   ;;  %v6918_v30 = vcombine.high %v591_v16, %v591_v16  ;;  %v462_v16 = vld [vmem:[%s6681_s11 + $0xa8] sm:$0xff] }
  0xbd   : > { %3418 = vmatmul.mubr.bf16.gmra.mxu0 %v6858_v39 }
  0xbe   : > { %3519 = vmatmul.mubr.bf16.gmra.mxu1 %v6860_v40  ;;  %3570 = vmatpush1.bf16.msra.mxu0 %v5952_v32  ;;  %v443_v32 = vld [vmem:[%s6681_s11 + $0x10] sm:$0xff] }
  0xbf   : > { %3671 = vmatpush1.bf16.msra.mxu1 %v5955_v38  ;;  %3571 = vmatprep.subr.bf16.mxu0 %v5960_v41  ;;  %v5990_v38 = vld [vmem:[%s6679_s10 + $0x564] ss:$16 sps:$4 sm:$0xff]  }
  0xc0   : > { %3672 = vmatprep.subr.bf16.mxu1 %v5963_v42  ;;  %3427 = vmatprep.mubr.bf16.mxu0 %v6866_v47  ;;  %v5993_v41 = vld [vmem:[%s6679_s10 + $0x764] ss:$16 sps:$4 sm:$0xff]   ;;  %v521_v42 = vmax.bf16 %v8278_v1, %v443_v32  ;;  %v540_v32 = vmax.bf16 %v8278_v1, %v462_v16 }
  0xc1   : > { %3528 = vmatprep.mubr.bf16.mxu1 %v6868_v48  ;;  %v6032_v16 = vld [vmem:[%s6679_s10 + $0x884] ss:$16 sps:$4 sm:$0xff]  }
  0xc2   : > { %3572 = vmatpush1.bf16.msra.mxu0 %v5958_v51  ;;  %v6938_v51 = vcombine.low %v592_v19, %v592_v19  ;;  %v6944_v58 = vcombine.high %v521_v42, %v527_v43  ;;  %v6006_v19 = vld [vmem:[%s6679_s10 + $0x500] ss:$16 sps:$4 sm:$0xff]   ;;  %v6972_v33 = vcombine.low %v521_v42, %v527_v43 }
  0xc3   : > { %3673 = vmatpush1.bf16.msra.mxu1 %v5961_v52  ;;  %3573 = vmatprep.subr.bf16.mxu0 %v5966_v53  ;;  %v5988_v52 = vld [vmem:[%s6679_s10 + $0x560] ss:$16 sps:$4 sm:$0xff]  }
  0xc4   : > { %3674 = vmatprep.subr.bf16.mxu1 %v5969_v54  ;;  %v5991_v53 = vld [vmem:[%s6679_s10 + $0x760] ss:$16 sps:$4 sm:$0xff]   ;;  %v5996_v54 = vld [vmem:[%s6679_s10 + $0x544] ss:$16 sps:$4 sm:$0xff]  }
  0xc5   : > { %3428 = vmatmul.mubr.bf16.gmra.mxu0 %v6884_v61  ;;  %v467_v42 = vld [vmem:[%s6681_s11 + $0xd0] sm:$0xff]  ;;  %v473_v43 = vld [vmem:[%s6681_s11 + $0x100] sm:$0xff] }
  0xc6   : > { %3529 = vmatmul.mubr.bf16.gmra.mxu1 %v6886_v62  ;;  %3574 = vmatpush2.bf16.msra.mxu0 %v5964_v63  ;;  %v5997_v63 = vld [vmem:[%s6679_s10 + $0x740] ss:$16 sps:$4 sm:$0xff]  }
  0xc7   : > { %3675 = vmatpush2.bf16.msra.mxu1 %v5967_v3  ;;  %3575 = vmatprep.subr.bf16.mxu0 %v5972_v4  ;;  %v6002_v3 = vld [vmem:[%s6679_s10 + $0x524] ss:$16 sps:$4 sm:$0xff]  }
  0xc8   : > { %3676 = vmatprep.subr.bf16.mxu1 %v5975_v5  ;;  %3437 = vmatprep.mubr.bf16.mxu0 %v6892_v6  ;;  %v6005_v4 = vld [vmem:[%s6679_s10 + $0x724] ss:$16 sps:$4 sm:$0xff]   ;;  %v6000_v5 = vld [vmem:[%s6679_s10 + $0x520] ss:$16 sps:$4 sm:$0xff]  }
  0xc9   : > { %3538 = vmatprep.mubr.bf16.mxu1 %v6894_v7 }
  0xca   : > { %3576 = vmatpush2.bf16.msra.mxu0 %v5970_v12  ;;  %v6011_v12 = vld [vmem:[%s6679_s10 + $0x704] ss:$16 sps:$4 sm:$0xff]  }
  0xcb   : > { %3677 = vmatpush2.bf16.msra.mxu1 %v5973_v13  ;;  %3577 = vmatprep.subr.bf16.mxu0 %v5978_v14  ;;  %v455_v13 = vld [vmem:[%s6681_s11 + $0x70] sm:$0xff]  ;;  %v461_v14 = vld [vmem:[%s6681_s11 + $0xa0] sm:$0xff] }
  0xcc   : > { %3678 = vmatprep.subr.bf16.mxu1 %v5981_v15  ;;  %v456_v15 = vld [vmem:[%s6681_s11 + $0x78] sm:$0xff] }
  0xcd   : > { %3438 = vmatmul.mubr.bf16.gmra.mxu0 %v6908_v20 }
  0xce   : > { %3539 = vmatmul.mubr.bf16.gmra.mxu1 %v6910_v21  ;;  %3578 = vmatpush2.bf16.msra.mxu0 %v5976_v24  ;;  %v6009_v24 = vld [vmem:[%s6679_s10 + $0x700] ss:$16 sps:$4 sm:$0xff]  }
  0xcf   : > { %3679 = vmatpush2.bf16.msra.mxu1 %v5979_v25  ;;  %3579 = vmatprep.subr.bf16.mxu0 %v5984_v26  ;;  %v6014_v25 = vld [vmem:[%s6679_s10 + $0x8e4] ss:$16 sps:$4 sm:$0xff]  }
  0xd0   : > { %3680 = vmatprep.subr.bf16.mxu1 %v5987_v27  ;;  %3447 = vmatprep.mubr.bf16.mxu0 %v6918_v30  ;;  %v6017_v26 = vld [vmem:[%s6679_s10 + $0xae4] ss:$16 sps:$4 sm:$0xff]   ;;  %v533_v27 = vmax.bf16 %v8278_v1, %v455_v13  ;;  %v6024_v13 = vld [vmem:[%s6679_s10 + $0x8a0] ss:$16 sps:$4 sm:$0xff]  }
  0xd1   : > { %3548 = vmatprep.mubr.bf16.mxu1 %v6920_v31 }
  0xd2   : > { %3580 = vmatpush2.bf16.msra.mxu0 %v5982_v28  ;;  %v539_v28 = vmax.bf16 %v8278_v1, %v461_v14 }
  0xd3   : > { %3681 = vmatpush2.bf16.msra.mxu1 %v5985_v29  ;;  %3581 = vmatprep.subr.bf16.mxu0 %v5990_v38  ;;  %v534_v29 = vmax.bf16 %v8278_v1, %v456_v15  ;;  %v6015_v38 = vld [vmem:[%s6679_s10 + $0xae0] ss:$16 sps:$4 sm:$0xff]  }
  0xd4   : > { %3682 = vmatprep.subr.bf16.mxu1 %v5993_v41  ;;  %v6020_v41 = vld [vmem:[%s6679_s10 + $0x8c4] ss:$16 sps:$4 sm:$0xff]   ;;  %v6027_v15 = vld [vmem:[%s6679_s10 + $0xaa0] ss:$16 sps:$4 sm:$0xff]  }
  0xd5   : > { %3448 = vmatmul.mubr.bf16.gmra.mxu0 %v6936_v50  ;;  %v7003_v14 = vcombine.low %v534_v29, %v540_v32 }
  0xd6   : > { %3549 = vmatmul.mubr.bf16.gmra.mxu1 %v6938_v51  ;;  %3582 = vmatpush2.bf16.msra.mxu0 %v5988_v52  ;;  %v6023_v52 = vld [vmem:[%s6679_s10 + $0xac4] ss:$16 sps:$4 sm:$0xff]  }
  0xd7   : > { %3683 = vmatpush2.bf16.msra.mxu1 %v5991_v53  ;;  %3583 = vmatprep.subr.bf16.mxu0 %v5996_v54  ;;  %v6980_v53 = vcombine.high %v533_v27, %v539_v28  ;;  %v6982_v54 = vcombine.high %v534_v29, %v540_v32  ;;  %v485_v29 = vld [vmem:[%s6681_s11 + $0x160] sm:$0xff]  ;;  %v480_v32 = vld [vmem:[%s6681_s11 + $0x138] sm:$0xff] }
  0xd8   : > { %3684 = vmatprep.subr.bf16.mxu1 %v5999_v55  ;;  %3589 = vmatprep.mubr.bf16.mxu0 %v6944_v58  ;;  %v6018_v55 = vld [vmem:[%s6679_s10 + $0x8c0] ss:$16 sps:$4 sm:$0xff]  }
  0xd9   : > { %3690 = vmatprep.mubr.bf16.mxu1 %v6946_v59 }
  0xda   : > { %3584 = vmatpush2.bf16.msra.mxu0 %v5994_v60  ;;  %v6021_v60 = vld [vmem:[%s6679_s10 + $0xac0] ss:$16 sps:$4 sm:$0xff]  }
  0xdb   : > { %3685 = vmatpush2.bf16.msra.mxu1 %v5997_v63  ;;  %3585 = vmatprep.subr.bf16.mxu0 %v6002_v3  ;;  %v6026_v63 = vld [vmem:[%s6679_s10 + $0x8a4] ss:$16 sps:$4 sm:$0xff]  }
  0xdc   : > { %3686 = vmatprep.subr.bf16.mxu1 %v6005_v4  ;;  %v6029_v3 = vld [vmem:[%s6679_s10 + $0xaa4] ss:$16 sps:$4 sm:$0xff]   ;;  %v545_v4 = vmax.bf16 %v8278_v1, %v467_v42  ;;  %v563_v42 = vmax.bf16 %v8278_v1, %v485_v29 }
  0xde   : > { %3586 = vmatpush2.bf16.msra.mxu0 %v6000_v5  ;;  %v551_v5 = vmax.bf16 %v8278_v1, %v473_v43  ;;  %v558_v43 = vmax.bf16 %v8278_v1, %v480_v32 }
  0xdf   : > { %3687 = vmatpush2.bf16.msra.mxu1 %v6003_v8  ;;  %3587 = vmatprep.subr.bf16.mxu0 %v6008_v9  ;;  %v546_v8 = vmax.bf16 %v8278_v1, %v468_v46  ;;  %v552_v9 = vmax.bf16 %v8278_v1, %v474_v49 }
  0xe0   : > { %3688 = vmatprep.subr.bf16.mxu1 %v6011_v12  ;;  %v7000_v12 = vcombine.low %v533_v27, %v539_v28  ;;  %v479_v28 = vld [vmem:[%s6681_s11 + $0x130] sm:$0xff]  ;;  %v7028_v49 = vcombine.low %v545_v4, %v551_v5 }
  0xe1   : > { %v7012_v27 = vcombine.high %v546_v8, %v552_v9 }
  0xe2   : > { %3588 = vmatpush2.bf16.msra.mxu0 %v6006_v19  ;;  %v6035_v19 = vld [vmem:[%s6679_s10 + $0xa84] ss:$16 sps:$4 sm:$0xff]  }
  0xe3   : > { %3689 = vmatpush2.bf16.msra.mxu1 %v6009_v24  ;;  %3759 = vmatprep.subr.bf16.mxu0 %v6014_v25  ;;  %v6030_v24 = vld [vmem:[%s6679_s10 + $0x880] ss:$16 sps:$4 sm:$0xff]  }
  0xe4   : > { %3860 = vmatprep.subr.bf16.mxu1 %v6017_v26  ;;  %v6033_v25 = vld [vmem:[%s6679_s10 + $0xa80] ss:$16 sps:$4 sm:$0xff]   ;;  %v7010_v26 = vcombine.high %v545_v4, %v551_v5 }
  0xe5   : > { %3590 = vmatmul.mubr.bf16.vlgmr.msra.gmra.mxu0 %v6972_v33  ;;  %v491_v5 = vld [vmem:[%s6681_s11 + $0x190] sm:$0xff] }
  0xe6   : > { %3691 = vmatmul.mubr.bf16.vlgmr.msra.gmra.mxu1 %v6974_v34  ;;  %3760 = vmatpush1.bf16.msra.mxu0 %v6012_v35  ;;  %v486_v35 = vld [vmem:[%s6681_s11 + $0x168] sm:$0xff]  ;;  %v569_v29 = vmax.bf16 %v8278_v1, %v491_v5  ;;  %v6059_v5 = vld [vmem:[%s6679_s10 + $0xa04] ss:$16 sps:$4 sm:$0xff]  }
  0xe7   : > { %3861 = vmatpush1.bf16.msra.mxu1 %v6015_v38  ;;  %3761 = vmatprep.subr.bf16.mxu0 %v6020_v41  ;;  %v6038_v38 = vld [vmem:[%s6679_s10 + $0x864] ss:$16 sps:$4 sm:$0xff]   ;;  %v564_v46 = vmax.bf16 %v8278_v1, %v486_v35 }
  0xe8   : > { %3862 = vmatprep.subr.bf16.mxu1 %v6023_v52  ;;  %3599 = vmatprep.mubr.bf16.mxu0 %v6980_v53  ;;  %v6041_v41 = vld [vmem:[%s6679_s10 + $0xa64] ss:$16 sps:$4 sm:$0xff]   ;;  %v557_v52 = vmax.bf16 %v8278_v1, %v479_v28 }
  0xe9   : > { %3700 = vmatprep.mubr.bf16.mxu1 %v6982_v54  ;;  %v7040_v4 = vcombine.high %v558_v43, %v564_v46  ;;  %v6053_v28 = vld [vmem:[%s6679_s10 + $0xa24] ss:$16 sps:$4 sm:$0xff]  }
  0xea   : > { %3762 = vmatpush1.bf16.msra.mxu0 %v6018_v55  ;;  %v6036_v55 = vld [vmem:[%s6679_s10 + $0x860] ss:$16 sps:$4 sm:$0xff]  }
  0xeb   : > { %3863 = vmatpush1.bf16.msra.mxu1 %v6021_v60  ;;  %3763 = vmatprep.subr.bf16.mxu0 %v6026_v63  ;;  %v7031_v60 = vcombine.low %v546_v8, %v552_v9  ;;  %v6039_v63 = vld [vmem:[%s6679_s10 + $0xa60] ss:$16 sps:$4 sm:$0xff]   ;;  %8312 = vst [vmem:[#allocation7_spill] sm:$0xff] %v7040_v4  ;;  %v492_v9 = vld [vmem:[%s6681_s11 + $0x198] sm:$0xff] }
  0xec   : > { %3864 = vmatprep.subr.bf16.mxu1 %v6029_v3  ;;  %v6044_v3 = vld [vmem:[%s6679_s10 + $0x844] ss:$16 sps:$4 sm:$0xff]   ;;  %v570_v35 = vmax.bf16 %v8278_v1, %v492_v9  ;;  %v6057_v9 = vld [vmem:[%s6679_s10 + $0xa00] ss:$16 sps:$4 sm:$0xff]  }
  0xed   : > { %3600 = vmatmul.mubr.bf16.gmra.mxu0 %v7000_v12  ;;  %v497_v8 = vld [vmem:[%s6681_s11 + $0x1c0] sm:$0xff] }
  0xee   : > { %3701 = vmatmul.mubr.bf16.gmra.mxu1 %v7003_v14  ;;  %3764 = vmatpush1.bf16.msra.mxu0 %v6024_v13  ;;  %v6047_v13 = vld [vmem:[%s6679_s10 + $0xa44] ss:$16 sps:$4 sm:$0xff]   ;;  %v575_v32 = vmax.bf16 %v8278_v1, %v497_v8  ;;  %v6054_v8 = vld [vmem:[%s6679_s10 + $0x800] ss:$16 sps:$4 sm:$0xff]  }
  0xef   : > { %3865 = vmatpush1.bf16.msra.mxu1 %v6027_v15  ;;  %3765 = vmatprep.subr.bf16.mxu0 %v6032_v16  ;;  %v6042_v15 = vld [vmem:[%s6679_s10 + $0x840] ss:$16 sps:$4 sm:$0xff]  }
  0xf0   : > { %3866 = vmatprep.subr.bf16.mxu1 %v6035_v19  ;;  %3609 = vmatprep.mubr.bf16.mxu0 %v7010_v26  ;;  %v6045_v16 = vld [vmem:[%s6679_s10 + $0xa40] ss:$16 sps:$4 sm:$0xff]   ;;  %v7038_v19 = vcombine.high %v557_v52, %v563_v42 }
  0xf1   : > { %3710 = vmatprep.mubr.bf16.mxu1 %v7012_v27 }
  0xf2   : > { %3766 = vmatpush1.bf16.msra.mxu0 %v6030_v24  ;;  %v498_v24 = vld [vmem:[%s6681_s11 + $0x1c8] sm:$0xff] }
  0xf3   : > { %3867 = vmatpush1.bf16.msra.mxu1 %v6033_v25  ;;  %3767 = vmatprep.subr.bf16.mxu0 %v6038_v38  ;;  %v6050_v25 = vld [vmem:[%s6679_s10 + $0x824] ss:$16 sps:$4 sm:$0xff]   ;;  %v576_v38 = vmax.bf16 %v8278_v1, %v498_v24  ;;  %v7066_v24 = vcombine.high %v569_v29, %v575_v32 }
  0xf4   : > { %3868 = vmatprep.subr.bf16.mxu1 %v6041_v41  ;;  %v7056_v41 = vcombine.low %v557_v52, %v563_v42  ;;  %v503_v42 = vld [vmem:[%s6681_s11 + $0x1f0] sm:$0xff] }
  0xf5   : > { %3610 = vmatmul.mubr.bf16.gmra.mxu0 %v7028_v49  ;;  %8315 = vst [vmem:[#allocation10_spill] sm:$0xff] %v7066_v24  ;;  %v7068_v52 = vcombine.high %v570_v35, %v576_v38 }
  0xf6   : > { %3711 = vmatmul.mubr.bf16.gmra.mxu1 %v7031_v60  ;;  %3768 = vmatpush1.bf16.msra.mxu0 %v6036_v55  ;;  %8313 = vst [vmem:[#allocation8_spill] sm:$0xff] %v7056_v41  ;;  %v7058_v55 = vcombine.low %v558_v43, %v564_v46  ;;  %v509_v43 = vld [vmem:[%s6681_s11 + $0x220] sm:$0xff]  ;;  %v504_v46 = vld [vmem:[%s6681_s11 + $0x1f8] sm:$0xff] }
  0xf7   : > { %3869 = vmatpush1.bf16.msra.mxu1 %v6039_v63  ;;  %3769 = vmatprep.subr.bf16.mxu0 %v6044_v3  ;;  %v6048_v63 = vld [vmem:[%s6679_s10 + $0x820] ss:$16 sps:$4 sm:$0xff]   ;;  %8316 = vst [vmem:[#allocation11_spill] sm:$0xff] %v7068_v52 }
  0xf8   : > { %3870 = vmatprep.subr.bf16.mxu1 %v6047_v13  ;;  %3619 = vmatprep.mubr.bf16.mxu0 %v7038_v19  ;;  %8314 = vst [vmem:[#allocation9_spill] sm:$0xff] %v7058_v55  ;;  %v6051_v3 = vld [vmem:[%s6679_s10 + $0xa20] ss:$16 sps:$4 sm:$0xff]   ;;  %v6056_v13 = vld [vmem:[%s6679_s10 + $0x804] ss:$16 sps:$4 sm:$0xff]  }
  0xf9   : > { %3720 = vmatprep.mubr.bf16.mxu1 %v7040_v4  ;;  %v6119_v4 = vld [vmem:[%s6679_s10 + $0x2cc] ss:$16 sps:$4 sm:$0xff]  }
  0xfa   : > { %3770 = vmatpush1.bf16.msra.mxu0 %v6042_v15  ;;  %v510_v15 = vld [vmem:[%s6681_s11 + $0x228] sm:$0xff] }
  0xfb   : > { %3871 = vmatpush1.bf16.msra.mxu1 %v6045_v16  ;;  %3771 = vmatprep.subr.bf16.mxu0 %v6050_v25  ;;  %v6062_v16 = vld [vmem:[%s6679_s10 + $0x9e4] ss:$16 sps:$4 sm:$0xff]  }
  0xfc   : > { %3872 = vmatprep.subr.bf16.mxu1 %v6053_v28  ;;  %v6065_v25 = vld [vmem:[%s6679_s10 + $0xbe4] ss:$16 sps:$4 sm:$0xff]   ;;  %v581_v28 = vmax.bf16 %v8278_v1, %v503_v42  ;;  %v6063_v42 = vld [vmem:[%s6679_s10 + $0xbe0] ss:$16 sps:$4 sm:$0xff]  }
  0xfd   : > { %3620 = vmatmul.mubr.bf16.gmra.mxu0 %v7056_v41  ;;  %v7084_v41 = vcombine.low %v569_v29, %v575_v32  ;;  %v515_v29 = vld [vmem:[%s6681_s11 + $0x250] sm:$0x11]  ;;  %v516_v32 = vld [vmem:[%s6681_s11 + $0x258] sm:$0x11] }
  0xfe   : > { %3721 = vmatmul.mubr.bf16.gmra.mxu1 %v7058_v55  ;;  %3772 = vmatpush1.bf16.msra.mxu0 %v6048_v63  ;;  %v587_v55 = vmax.bf16 %v8278_v1, %v509_v43  ;;  %v582_v63 = vmax.bf16 %v8278_v1, %v504_v46  ;;  %v6068_v43 = vld [vmem:[%s6679_s10 + $0x9c4] ss:$16 sps:$4 sm:$0xff]   ;;  %v6066_v46 = vld [vmem:[%s6679_s10 + $0x9c0] ss:$16 sps:$4 sm:$0xff]  }
  0xff   : > { %3873 = vmatpush1.bf16.msra.mxu1 %v6051_v3  ;;  %3773 = vmatprep.subr.bf16.mxu0 %v6056_v13  ;;  %v588_v3 = vmax.bf16 %v8278_v1, %v510_v15  ;;  %8317 = vst [vmem:[#allocation12_spill] sm:$0xff] %v7084_v41  ;;  %v7086_v13 = vcombine.low %v570_v35, %v576_v38  ;;  %v6069_v35 = vld [vmem:[%s6679_s10 + $0xbc0] ss:$16 sps:$4 sm:$0xff]   ;;  %v6074_v38 = vld [vmem:[%s6679_s10 + $0x9a4] ss:$16 sps:$4 sm:$0xff]  }
 0x100   : > { %3874 = vmatprep.subr.bf16.mxu1 %v6059_v5  ;;  %3629 = vmatprep.mubr.bf16.mxu0 %v7066_v24  ;;  %v6060_v5 = vld [vmem:[%s6679_s10 + $0x9e0] ss:$16 sps:$4 sm:$0xff]   ;;  %v7093_v24 = vcombine.high %v581_v28, %v587_v55 }
 0x101   : > { %3730 = vmatprep.mubr.bf16.mxu1 %v7068_v52  ;;  %8318 = vst [vmem:[#allocation13_spill] sm:$0xff] %v7086_v13  ;;  %v6071_v52 = vld [vmem:[%s6679_s10 + $0xbc4] ss:$16 sps:$4 sm:$0xff]   ;;  %v7095_v15 = vcombine.high %v582_v63, %v588_v3 }
 0x102   : > { %3774 = vmatpush1.bf16.msra.mxu0 %v6054_v8  ;;  %8319 = vst [vmem:[#allocation14_spill] sm:$0xff] %v7093_v24  ;;  %v6077_v8 = vld [vmem:[%s6679_s10 + $0xba4] ss:$16 sps:$4 sm:$0xff]  }
 0x103   : > { %3875 = vmatpush1.bf16.msra.mxu1 %v6057_v9  ;;  %3775 = vmatprep.subr.bf16.mxu0 %v6062_v16  ;;  %8320 = vst [vmem:[#allocation15_spill] sm:$0xff] %v7095_v15  ;;  %v593_v9 = vmax.bf16 %v8278_v1, %v515_v29  ;;  %v594_v16 = vmax.bf16 %v8278_v1, %v516_v32  ;;  %v6078_v32 = vld [vmem:[%s6679_s10 + $0x980] ss:$16 sps:$4 sm:$0xff]  }
 0x104   : > { %3876 = vmatprep.subr.bf16.mxu1 %v6065_v25  ;;  %v7108_v25 = vcombine.low %v581_v28, %v587_v55  ;;  %v445_v28 = vld [vmem:[%s6681_s11 + $0x20] sm:$0xff] }
 0x105   : > { %3630 = vmatmul.mubr.bf16.gmra.mxu0 %v7084_v41  ;;  %v7116_v29 = vcombine.high %v593_v9, %v593_v9  ;;  %v7118_v55 = vcombine.high %v594_v16, %v594_v16 }
 0x106   : > { %3731 = vmatmul.mubr.bf16.gmra.mxu1 %v7086_v13  ;;  %3776 = vmatpush2.bf16.msra.mxu0 %v6060_v5  ;;  %8321 = vst [vmem:[#allocation16_spill] sm:$0xff] %v7108_v25  ;;  %v7110_v5 = vcombine.low %v582_v63, %v588_v3  ;;  %v451_v63 = vld [vmem:[%s6681_s11 + $0x50] sm:$0xff]  ;;  %v446_v3 = vld [vmem:[%s6681_s11 + $0x28] sm:$0xff]  ;;  %v7140_v13 = vcombine.low %v594_v16, %v594_v16 }
 0x107   : > { %3877 = vmatpush2.bf16.msra.mxu1 %v6063_v42  ;;  %3777 = vmatprep.subr.bf16.mxu0 %v6068_v43  ;;  %v6075_v42 = vld [vmem:[%s6679_s10 + $0xba0] ss:$16 sps:$4 sm:$0xff]   ;;  %v6080_v43 = vld [vmem:[%s6679_s10 + $0x984] ss:$16 sps:$4 sm:$0xff]   ;;  %8323 = vst [vmem:[#allocation18_spill] sm:$0xff] %v7116_v29  ;;  %8324 = vst [vmem:[#allocation19_spill] sm:$0xff] %v7118_v55 }
 0x108   : > { %3878 = vmatprep.subr.bf16.mxu1 %v6071_v52  ;;  %3639 = vmatprep.mubr.bf16.mxu0 %v7093_v24  ;;  %8322 = vst [vmem:[#allocation17_spill] sm:$0xff] %v7110_v5  ;;  %v6072_v52 = vld [vmem:[%s6679_s10 + $0x9a0] ss:$16 sps:$4 sm:$0xff]   ;;  %v523_v24 = vmax.bf16 %v8278_v1, %v445_v28  ;;  %8326 = vst [vmem:[#allocation21_spill] sm:$0xff] %v7140_v13  ;;  %v6092_v28 = vld [vmem:[%s6679_s10 + $0x944] ss:$16 sps:$4 sm:$0xff]  }
 0x109   : > { %3740 = vmatprep.mubr.bf16.mxu1 %v7095_v15  ;;  %v6083_v15 = vld [vmem:[%s6679_s10 + $0xb84] ss:$16 sps:$4 sm:$0xff]   ;;  %v6090_v16 = vld [vmem:[%s6679_s10 + $0x940] ss:$16 sps:$4 sm:$0xff]  }
 0x10a   : > { %3778 = vmatpush2.bf16.msra.mxu0 %v6066_v46  ;;  %v452_v46 = vld [vmem:[%s6681_s11 + $0x58] sm:$0xff] }
 0x10b   : > { %3879 = vmatpush2.bf16.msra.mxu1 %v6069_v35  ;;  %3779 = vmatprep.subr.bf16.mxu0 %v6074_v38  ;;  %v6081_v35 = vld [vmem:[%s6679_s10 + $0xb80] ss:$16 sps:$4 sm:$0xff]   ;;  %v6086_v38 = vld [vmem:[%s6679_s10 + $0x964] ss:$16 sps:$4 sm:$0xff]  }
 0x10c   : > { %3880 = vmatprep.subr.bf16.mxu1 %v6077_v8  ;;  %v6089_v8 = vld [vmem:[%s6679_s10 + $0xb64] ss:$16 sps:$4 sm:$0xff]  }
 0x10d   : > { %3640 = vmatmul.mubr.bf16.gmra.mxu0 %v7108_v25  ;;  %v7136_v25 = vcombine.low %v593_v9, %v593_v9 }
 0x10e   : > { %3741 = vmatmul.mubr.bf16.gmra.mxu1 %v7110_v5  ;;  %3780 = vmatpush2.bf16.msra.mxu0 %v6072_v52  ;;  %v529_v5 = vmax.bf16 %v8278_v1, %v451_v63  ;;  %v524_v52 = vmax.bf16 %v8278_v1, %v446_v3  ;;  %v6095_v63 = vld [vmem:[%s6679_s10 + $0xb44] ss:$16 sps:$4 sm:$0xff]  }
 0x10f   : > { %3881 = vmatpush2.bf16.msra.mxu1 %v6075_v42  ;;  %3781 = vmatprep.subr.bf16.mxu0 %v6080_v43  ;;  %v530_v42 = vmax.bf16 %v8278_v1, %v452_v46  ;;  %8325 = vst [vmem:[#allocation20_spill] sm:$0xff] %v7136_v25  ;;  %v6084_v43 = vld [vmem:[%s6679_s10 + $0x960] ss:$16 sps:$4 sm:$0xff]   ;;  %v458_v1 = vld [vmem:[%s6681_s11 + $0x88] sm:$0xff] }
 0x110   : > { %3882 = vmatprep.subr.bf16.mxu1 %v6083_v15  ;;  %3649 = vmatprep.mubr.bf16.mxu0 %v7116_v29  ;;  %v6087_v15 = vld [vmem:[%s6679_s10 + $0xb60] ss:$16 sps:$4 sm:$0xff]   ;;  %v7144_v3 = vcombine.high %v523_v24, %v529_v5 }
 0x111   : > { %3750 = vmatprep.mubr.bf16.mxu1 %v7118_v55  ;;  %v7146_v9 = vcombine.high %v524_v52, %v530_v42  ;;  %v6093_v46 = vld [vmem:[%s6679_s10 + $0xb40] ss:$16 sps:$4 sm:$0xff]   ;;  %v7175_v41 = vcombine.low %v524_v52, %v530_v42  ;;  %v6114_v52 = vld [vmem:[%s6679_s10 + $0xc8] ss:$16 sps:$4 sm:$0xff]  }
 0x112   : > { %3782 = vmatpush2.bf16.msra.mxu0 %v6078_v32  ;;  %8327 = vst [vmem:[#allocation22_spill] sm:$0xff] %v7144_v3  ;;  %v6098_v32 = vld [vmem:[%s6679_s10 + $0x924] ss:$16 sps:$4 sm:$0xff]   ;;  %v6117_v42 = vld [vmem:[%s6679_s10 + $0x2c8] ss:$16 sps:$4 sm:$0xff]  }
 0x113   : > { %3883 = vmatpush2.bf16.msra.mxu1 %v6081_v35  ;;  %3783 = vmatprep.subr.bf16.mxu0 %v6086_v38  ;;  %8328 = vst [vmem:[#allocation23_spill] sm:$0xff] %v7146_v9  ;;  %v6101_v35 = vld [vmem:[%s6679_s10 + $0xb24] ss:$16 sps:$4 sm:$0xff]   ;;  %v6096_v38 = vld [vmem:[%s6679_s10 + $0x920] ss:$16 sps:$4 sm:$0xff]   ;;  %8331 = vst [vmem:[#allocation25_spill] sm:$0xff] %v7175_v41 }
 0x114   : > { %3884 = vmatprep.subr.bf16.mxu1 %v6089_v8  ;;  %v6099_v8 = vld [vmem:[%s6679_s10 + $0xb20] ss:$16 sps:$4 sm:$0xff]  }
 0x115   : > { %3650 = vmatmul.mubr.bf16.gmra.mxu0 %v7136_v25 }
 0x116   : > { %3751 = vmatmul.mubr.bf16.gmra.mxu1 %v7140_v13  ;;  %3784 = vmatpush2.bf16.msra.mxu0 %v6084_v43  ;;  %v6104_v43 = vld [vmem:[%s6679_s10 + $0x904] ss:$16 sps:$4 sm:$0xff]   ;;  %v464_v13 = vld [vmem:[%s6681_s11 + $0xb8] sm:$0xff] }
 0x117   : > { %3885 = vmatpush2.bf16.msra.mxu1 %v6087_v15  ;;  %3785 = vmatprep.subr.bf16.mxu0 %v6092_v28  ;;  %v6107_v15 = vld [vmem:[%s6679_s10 + $0xb04] ss:$16 sps:$4 sm:$0xff]  }
 0x118   : > { %3886 = vmatprep.subr.bf16.mxu1 %v6095_v63  ;;  %3791 = vmatprep.mubr.bf16.mxu0 %v7144_v3  ;;  %v457_v28 = vld [vmem:[%s6681_s11 + $0x80] sm:$0xff]  ;;  %v463_v63 = vld [vmem:[%s6681_s11 + $0xb0] sm:$0xff] }
 0x119   : > { %3892 = vmatprep.mubr.bf16.mxu1 %v7146_v9  ;;  %v6102_v9 = vld [vmem:[%s6679_s10 + $0x900] ss:$16 sps:$4 sm:$0xff]  }
 0x11a   : > { %3786 = vmatpush2.bf16.msra.mxu0 %v6090_v16  ;;  %v6105_v3 = vld [vmem:[%s6679_s10 + $0xb00] ss:$16 sps:$4 sm:$0xff]   ;;  %v6110_v16 = vld [vmem:[%s6679_s10 + $0xec] ss:$16 sps:$4 sm:$0xff]  }
 0x11b   : > { %3887 = vmatpush2.bf16.msra.mxu1 %v6093_v46  ;;  %3787 = vmatprep.subr.bf16.mxu0 %v6098_v32  ;;  %v6113_v46 = vld [vmem:[%s6679_s10 + $0x2ec] ss:$16 sps:$4 sm:$0xff]   ;;  %v6108_v32 = vld [vmem:[%s6679_s10 + $0xe8] ss:$16 sps:$4 sm:$0xff]  }
 0x11c   : > { %3888 = vmatprep.subr.bf16.mxu1 %v6101_v35  ;;  %v8329_v35 = vmov 0  }
 0x11d   : > { %v535_v25 = vmax.bf16 %v8329_v35, %v457_v28  ;;  %v541_v55 = vmax.bf16 %v8329_v35, %v463_v63  ;;  %v536_v29 = vmax.bf16 %v8329_v35, %v458_v1  ;;  %v469_v28 = vld [vmem:[%s6681_s11 + $0xe0] sm:$0xff]  ;;  %v475_v1 = vld [vmem:[%s6681_s11 + $0x110] sm:$0xff] }
 0x11e   : > { %3788 = vmatpush2.bf16.msra.mxu0 %v6096_v38  ;;  %v542_v38 = vmax.bf16 %v8329_v35, %v464_v13  ;;  %v470_v13 = vld [vmem:[%s6681_s11 + $0xe8] sm:$0xff] }
 0x11f   : > { %3889 = vmatpush2.bf16.msra.mxu1 %v6099_v8  ;;  %3789 = vmatprep.subr.bf16.mxu0 %v6104_v43  ;;  %v7173_v8 = vcombine.low %v523_v24, %v529_v5  ;;  %v6111_v43 = vld [vmem:[%s6679_s10 + $0x2e8] ss:$16 sps:$4 sm:$0xff]   ;;  %v7182_v63 = vcombine.high %v535_v25, %v541_v55 }
 0x120   : > { %3890 = vmatprep.subr.bf16.mxu1 %v6107_v15  ;;  %v6116_v15 = vld [vmem:[%s6679_s10 + $0xcc] ss:$16 sps:$4 sm:$0xff]   ;;  %v7184_v24 = vcombine.high %v536_v29, %v542_v38 }
 0x121   : > { %8330 = vst [vmem:[#allocation24_spill] sm:$0xff] %v7173_v8  ;;  %8332 = vst [vmem:[#allocation26_spill] sm:$0xff] %v7182_v63  ;;  %v476_v5 = vld [vmem:[%s6681_s11 + $0x118] sm:$0xff] }
 0x122   : > { %3790 = vmatpush2.bf16.msra.mxu0 %v6102_v9  ;;  %8333 = vst [vmem:[#allocation27_spill] sm:$0xff] %v7184_v24  ;;  %v6125_v9 = vld [vmem:[%s6679_s10 + $0x2ac] ss:$16 sps:$4 sm:$0xff]  }
 0x123   : > { %3891 = vmatpush2.bf16.msra.mxu1 %v6105_v3  ;;  %3961 = vmatprep.subr.bf16.mxu0 %v6110_v16  ;;  %v6122_v3 = vld [vmem:[%s6679_s10 + $0xac] ss:$16 sps:$4 sm:$0xff]   ;;  %v547_v16 = vmax.bf16 %v8329_v35, %v469_v28 }
 0x124   : > { %4062 = vmatprep.subr.bf16.mxu1 %v6113_v46  ;;  %v6120_v46 = vld [vmem:[%s6679_s10 + $0xa8] ss:$16 sps:$4 sm:$0xff]   ;;  %v6128_v28 = vld [vmem:[%s6679_s10 + $0x8c] ss:$16 sps:$4 sm:$0xff]  }
 0x125   : > { %3792 = vmatmul.mubr.bf16.vlgmr.msra.gmra.mxu0 %v7173_v8  ;;  %v7204_v8 = vcombine.low %v536_v29, %v542_v38  ;;  %v488_v29 = vld [vmem:[%s6681_s11 + $0x178] sm:$0xff] }
 0x126   : > { %3893 = vmatmul.mubr.bf16.vlgmr.msra.gmra.mxu1 %v7175_v41  ;;  %3962 = vmatpush1.bf16.msra.mxu0 %v6108_v32  ;;  %v553_v32 = vmax.bf16 %v8329_v35, %v475_v1  ;;  %v6123_v41 = vld [vmem:[%s6679_s10 + $0x2a8] ss:$16 sps:$4 sm:$0xff]   ;;  %v481_v1 = vld [vmem:[%s6681_s11 + $0x140] sm:$0xff] }
 0x127   : > { %4063 = vmatpush1.bf16.msra.mxu1 %v6111_v43  ;;  %3963 = vmatprep.subr.bf16.mxu0 %v6116_v15  ;;  %v548_v43 = vmax.bf16 %v8329_v35, %v470_v13  ;;  %v554_v15 = vmax.bf16 %v8329_v35, %v476_v5  ;;  %8335 = vst [vmem:[#allocation29_spill] sm:$0xff] %v7204_v8  ;;  %v487_v13 = vld [vmem:[%s6681_s11 + $0x170] sm:$0xff]  ;;  %v6126_v38 = vld [vmem:[%s6679_s10 + $0x88] ss:$16 sps:$4 sm:$0xff]  }
 0x128   : > { %4064 = vmatprep.subr.bf16.mxu1 %v6119_v4  ;;  %3801 = vmatprep.mubr.bf16.mxu0 %v7182_v63  ;;  %v7201_v4 = vcombine.low %v535_v25, %v541_v55  ;;  %v6131_v63 = vld [vmem:[%s6679_s10 + $0x28c] ss:$16 sps:$4 sm:$0xff]   ;;  %v6129_v5 = vld [vmem:[%s6679_s10 + $0x288] ss:$16 sps:$4 sm:$0xff]  }
 0x129   : > { %3902 = vmatprep.mubr.bf16.mxu1 %v7184_v24  ;;  %v7210_v24 = vcombine.high %v547_v16, %v553_v32  ;;  %v7212_v25 = vcombine.high %v548_v43, %v554_v15  ;;  %v482_v55 = vld [vmem:[%s6681_s11 + $0x148] sm:$0xff] }
 0x12a   : > { %8334 = vst [vmem:[#allocation28_spill] sm:$0xff] %v7201_v4  ;;  %3964 = vmatpush1.bf16.msra.mxu0 %v6114_v52  ;;  %v6134_v52 = vld [vmem:[%s6679_s10 + $0x6c] ss:$16 sps:$4 sm:$0xff]  }
 0x12b   : > { %4065 = vmatpush1.bf16.msra.mxu1 %v6117_v42  ;;  %3965 = vmatprep.subr.bf16.mxu0 %v6122_v3  ;;  %8336 = vst [vmem:[#allocation30_spill] sm:$0xff] %v7210_v24  ;;  %8337 = vst [vmem:[#allocation31_spill] sm:$0xff] %v7212_v25  ;;  %v6137_v42 = vld [vmem:[%s6679_s10 + $0x26c] ss:$16 sps:$4 sm:$0xff]   ;;  %v559_v3 = vmax.bf16 %v8329_v35, %v481_v1 }
 0x12c   : > { %4066 = vmatprep.subr.bf16.mxu1 %v6125_v9  ;;  %v6132_v9 = vld [vmem:[%s6679_s10 + $0x68] ss:$16 sps:$4 sm:$0xff]   ;;  %v6140_v1 = vld [vmem:[%s6679_s10 + $0x4c] ss:$16 sps:$4 sm:$0xff]  }
 0x12d   : > { %3802 = vmatmul.mubr.bf16.gmra.mxu0 %v7201_v4  ;;  %v7232_v4 = vcombine.low %v548_v43, %v554_v15  ;;  %v500_v43 = vld [vmem:[%s6681_s11 + $0x1d8] sm:$0xff] }
 0x12e   : > { %3903 = vmatmul.mubr.bf16.gmra.mxu1 %v7204_v8  ;;  %3966 = vmatpush1.bf16.msra.mxu0 %v6120_v46  ;;  %v565_v46 = vmax.bf16 %v8329_v35, %v487_v13  ;;  %v6135_v8 = vld [vmem:[%s6679_s10 + $0x268] ss:$16 sps:$4 sm:$0xff]   ;;  %v493_v13 = vld [vmem:[%s6681_s11 + $0x1a0] sm:$0xff] }
 0x12f   : > { %4067 = vmatpush1.bf16.msra.mxu1 %v6123_v41  ;;  %3967 = vmatprep.subr.bf16.mxu0 %v6128_v28  ;;  %v560_v41 = vmax.bf16 %v8329_v35, %v482_v55  ;;  %v566_v28 = vmax.bf16 %v8329_v35, %v488_v29  ;;  %8339 = vst [vmem:[#allocation33_spill] sm:$0xff] %v7232_v4  ;;  %v499_v55 = vld [vmem:[%s6681_s11 + $0x1d0] sm:$0xff]  ;;  %v6138_v15 = vld [vmem:[%s6679_s10 + $0x48] ss:$16 sps:$4 sm:$0xff]  }
 0x130   : > { %4068 = vmatprep.subr.bf16.mxu1 %v6131_v63  ;;  %3811 = vmatprep.mubr.bf16.mxu0 %v7210_v24  ;;  %v7229_v63 = vcombine.low %v547_v16, %v553_v32  ;;  %v6143_v24 = vld [vmem:[%s6679_s10 + $0x24c] ss:$16 sps:$4 sm:$0xff]   ;;  %v6141_v29 = vld [vmem:[%s6679_s10 + $0x248] ss:$16 sps:$4 sm:$0xff]  }
 0x131   : > { %3912 = vmatprep.mubr.bf16.mxu1 %v7212_v25  ;;  %v7238_v25 = vcombine.high %v559_v3, %v565_v46  ;;  %v7240_v16 = vcombine.high %v560_v41, %v566_v28  ;;  %v494_v32 = vld [vmem:[%s6681_s11 + $0x1a8] sm:$0xff] }
 0x132   : > { %8338 = vst [vmem:[#allocation32_spill] sm:$0xff] %v7229_v63  ;;  %3968 = vmatpush1.bf16.msra.mxu0 %v6126_v38  ;;  %v6146_v38 = vld [vmem:[%s6679_s10 + $0x2c] ss:$16 sps:$4 sm:$0xff]  }
 0x133   : > { %4069 = vmatpush1.bf16.msra.mxu1 %v6129_v5  ;;  %3969 = vmatprep.subr.bf16.mxu0 %v6134_v52  ;;  %8340 = vst [vmem:[#allocation34_spill] sm:$0xff] %v7238_v25  ;;  %8341 = vst [vmem:[#allocation35_spill] sm:$0xff] %v7240_v16  ;;  %v6149_v5 = vld [vmem:[%s6679_s10 + $0x22c] ss:$16 sps:$4 sm:$0xff]   ;;  %v571_v52 = vmax.bf16 %v8329_v35, %v493_v13 }
 0x134   : > { %4070 = vmatprep.subr.bf16.mxu1 %v6137_v42  ;;  %v6144_v42 = vld [vmem:[%s6679_s10 + $0x28] ss:$16 sps:$4 sm:$0xff]   ;;  %v6152_v13 = vld [vmem:[%s6679_s10 + $0xc] ss:$16 sps:$4 sm:$0xff]  }
 0x135   : > { %3812 = vmatmul.mubr.bf16.gmra.mxu0 %v7229_v63  ;;  %v7260_v63 = vcombine.low %v560_v41, %v566_v28  ;;  %v512_v41 = vld [vmem:[%s6681_s11 + $0x238] sm:$0xff] }
 0x136   : > { %3913 = vmatmul.mubr.bf16.gmra.mxu1 %v7232_v4  ;;  %3970 = vmatpush1.bf16.msra.mxu0 %v6132_v9  ;;  %v577_v9 = vmax.bf16 %v8329_v35, %v499_v55  ;;  %v6147_v4 = vld [vmem:[%s6679_s10 + $0x228] ss:$16 sps:$4 sm:$0xff]   ;;  %v505_v55 = vld [vmem:[%s6681_s11 + $0x200] sm:$0xff] }
 0x137   : > { %4071 = vmatpush1.bf16.msra.mxu1 %v6135_v8  ;;  %3971 = vmatprep.subr.bf16.mxu0 %v6140_v1  ;;  %v572_v8 = vmax.bf16 %v8329_v35, %v494_v32  ;;  %v578_v1 = vmax.bf16 %v8329_v35, %v500_v43  ;;  %v511_v32 = vld [vmem:[%s6681_s11 + $0x230] sm:$0xff]  ;;  %v6150_v28 = vld [vmem:[%s6679_s10 + $0x8] ss:$16 sps:$4 sm:$0xff]  }
 0x138   : > { %4072 = vmatprep.subr.bf16.mxu1 %v6143_v24  ;;  %3821 = vmatprep.mubr.bf16.mxu0 %v7238_v25  ;;  %v7257_v24 = vcombine.low %v559_v3, %v565_v46  ;;  %v6155_v25 = vld [vmem:[%s6679_s10 + $0x20c] ss:$16 sps:$4 sm:$0xff]   ;;  %v6153_v43 = vld [vmem:[%s6679_s10 + $0x208] ss:$16 sps:$4 sm:$0xff]  }
 0x139   : > { %3922 = vmatprep.mubr.bf16.mxu1 %v7240_v16  ;;  %v7266_v16 = vcombine.high %v571_v52, %v577_v9  ;;  %v7268_v3 = vcombine.high %v572_v8, %v578_v1  ;;  %v506_v46 = vld [vmem:[%s6681_s11 + $0x208] sm:$0xff] }
 0x13a   : > { %3972 = vmatpush1.bf16.msra.mxu0 %v6138_v15  ;;  %v6158_v15 = vld [vmem:[%s6679_s10 + $0x1ec] ss:$16 sps:$4 sm:$0xff]  }
 0x13b   : > { %4073 = vmatpush1.bf16.msra.mxu1 %v6141_v29  ;;  %3973 = vmatprep.subr.bf16.mxu0 %v6146_v38  ;;  %8342 = vst [vmem:[#allocation36_spill] sm:$0xff] %v7266_v16  ;;  %8343 = vst [vmem:[#allocation37_spill] sm:$0xff] %v7268_v3  ;;  %v6161_v29 = vld [vmem:[%s6679_s10 + $0x3ec] ss:$16 sps:$4 sm:$0xff]   ;;  %v583_v38 = vmax.bf16 %v8329_v35, %v505_v55  ;;  %v6156_v55 = vld [vmem:[%s6679_s10 + $0x1e8] ss:$16 sps:$4 sm:$0xff]  }
 0x13c   : > { %4074 = vmatprep.subr.bf16.mxu1 %v6149_v5  ;;  %v589_v5 = vmax.bf16 %v8329_v35, %v511_v32  ;;  %v6164_v32 = vld [vmem:[%s6679_s10 + $0x1cc] ss:$16 sps:$4 sm:$0xff]  }
 0x13d   : > { %3822 = vmatmul.mubr.bf16.gmra.mxu0 %v7257_v24 }
 0x13e   : > { %3923 = vmatmul.mubr.bf16.gmra.mxu1 %v7260_v63  ;;  %3974 = vmatpush1.bf16.msra.mxu0 %v6144_v42  ;;  %v590_v42 = vmax.bf16 %v8329_v35, %v512_v41 }
 0x13f   : > { %4075 = vmatpush1.bf16.msra.mxu1 %v6147_v4  ;;  %3975 = vmatprep.subr.bf16.mxu0 %v6152_v13  ;;  %v584_v4 = vmax.bf16 %v8329_v35, %v506_v46  ;;  %v7284_v13 = vcombine.low %v571_v52, %v577_v9  ;;  %v7292_v46 = vcombine.high %v583_v38, %v589_v5  ;;  %v517_v52 = vld [vmem:[%s6681_s11 + $0x260] sm:$0x11]  ;;  %v518_v9 = vld [vmem:[%s6681_s11 + $0x268] sm:$0x11] }
 0x140   : > { %4076 = vmatprep.subr.bf16.mxu1 %v6155_v25  ;;  %3831 = vmatprep.mubr.bf16.mxu0 %v7266_v16  ;;  %v7286_v25 = vcombine.low %v572_v8, %v578_v1  ;;  %v6159_v16 = vld [vmem:[%s6679_s10 + $0x3e8] ss:$16 sps:$4 sm:$0xff]  }
 0x141   : > { %3932 = vmatprep.mubr.bf16.mxu1 %v7268_v3  ;;  %8344 = vst [vmem:[#allocation38_spill] sm:$0xff] %v7284_v13  ;;  %v6167_v3 = vld [vmem:[%s6679_s10 + $0x3cc] ss:$16 sps:$4 sm:$0xff]   ;;  %8346 = vst [vmem:[#allocation40_spill] sm:$0xff] %v7292_v46  ;;  %v7294_v41 = vcombine.high %v584_v4, %v590_v42  ;;  %v6162_v8 = vld [vmem:[%s6679_s10 + $0x1c8] ss:$16 sps:$4 sm:$0xff]  }
 0x142   : > { %8345 = vst [vmem:[#allocation39_spill] sm:$0xff] %v7286_v25  ;;  %3976 = vmatpush1.bf16.msra.mxu0 %v6150_v28  ;;  %v6165_v1 = vld [vmem:[%s6679_s10 + $0x3c8] ss:$16 sps:$4 sm:$0xff]   ;;  %v6170_v28 = vld [vmem:[%s6679_s10 + $0x1ac] ss:$16 sps:$4 sm:$0xff]  }
 0x143   : > { %4077 = vmatpush1.bf16.msra.mxu1 %v6153_v43  ;;  %3977 = vmatprep.subr.bf16.mxu0 %v6158_v15  ;;  %8347 = vst [vmem:[#allocation41_spill] sm:$0xff] %v7294_v41  ;;  %v6173_v43 = vld [vmem:[%s6679_s10 + $0x3ac] ss:$16 sps:$4 sm:$0xff]   ;;  %v595_v15 = vmax.bf16 %v8329_v35, %v517_v52 }
 0x144   : > { %4078 = vmatprep.subr.bf16.mxu1 %v6161_v29  ;;  %v596_v29 = vmax.bf16 %v8329_v35, %v518_v9  ;;  %v6174_v35 = vld [vmem:[%s6679_s10 + $0x188] ss:$16 sps:$4 sm:$0xff]  }
 0x145   : > { %3832 = vmatmul.mubr.bf16.gmra.mxu0 %v7284_v13  ;;  %v8371_v13 = vld [vmem:[#allocation12_spill] sm:$0xff] }
 0x146   : > { %3933 = vmatmul.mubr.bf16.gmra.mxu1 %v7286_v25  ;;  %3978 = vmatpush2.bf16.msra.mxu0 %v6156_v55  ;;  %v7308_v55 = vcombine.low %v583_v38, %v589_v5  ;;  %v7316_v25 = vcombine.high %v595_v15, %v595_v15  ;;  %v7318_v52 = vcombine.high %v596_v29, %v596_v29  ;;  %v6177_v38 = vld [vmem:[%s6679_s10 + $0x388] ss:$16 sps:$4 sm:$0xff]   ;;  %v6182_v5 = vld [vmem:[%s6679_s10 + $0x16c] ss:$16 sps:$4 sm:$0xff]  }
 0x147   : > { %4079 = vmatpush2.bf16.msra.mxu1 %v6159_v16  ;;  %3979 = vmatprep.subr.bf16.mxu0 %v6164_v32  ;;  %v7310_v16 = vcombine.low %v584_v4, %v590_v42  ;;  %v6171_v32 = vld [vmem:[%s6679_s10 + $0x3a8] ss:$16 sps:$4 sm:$0xff]   ;;  %v6185_v4 = vld [vmem:[%s6679_s10 + $0x36c] ss:$16 sps:$4 sm:$0xff]   ;;  %v7328_v42 = vcombine.low %v595_v15, %v595_v15  ;;  %v7330_v9 = vcombine.low %v596_v29, %v596_v29 }
 0x148   : > { %4080 = vmatprep.subr.bf16.mxu1 %v6167_v3  ;;  %3841 = vmatprep.mubr.bf16.mxu0 %v7292_v46  ;;  %8348 = vst [vmem:[#allocation42_spill] sm:$0xff] %v7308_v55  ;;  %v6168_v3 = vld [vmem:[%s6679_s10 + $0x1a8] ss:$16 sps:$4 sm:$0xff]   ;;  %v6176_v46 = vld [vmem:[%s6679_s10 + $0x18c] ss:$16 sps:$4 sm:$0xff]   ;;  %8350 = vst [vmem:[#allocation44_spill] sm:$0xff] %v7316_v25 }
 0x149   : > { %3942 = vmatprep.mubr.bf16.mxu1 %v7294_v41  ;;  %8349 = vst [vmem:[#allocation43_spill] sm:$0xff] %v7310_v16  ;;  %v6179_v41 = vld [vmem:[%s6679_s10 + $0x38c] ss:$16 sps:$4 sm:$0xff]   ;;  %8351 = vst [vmem:[#allocation45_spill] sm:$0xff] %v7318_v52 }
 0x14a   : > { %3980 = vmatpush2.bf16.msra.mxu0 %v6162_v8  ;;  %8352 = vst [vmem:[#allocation46_spill] sm:$0xff] %v7328_v42  ;;  %8353 = vst [vmem:[#allocation47_spill] sm:$0xff] %v7330_v9  ;;  %v6180_v8 = vld [vmem:[%s6679_s10 + $0x168] ss:$16 sps:$4 sm:$0xff]   ;;  %v6194_v15 = vld [vmem:[%s6679_s10 + $0x12c] ss:$16 sps:$4 sm:$0xff]  }
 0x14b   : > { %4081 = vmatpush2.bf16.msra.mxu1 %v6165_v1  ;;  %3981 = vmatprep.subr.bf16.mxu0 %v6170_v28  ;;  %v6183_v1 = vld [vmem:[%s6679_s10 + $0x368] ss:$16 sps:$4 sm:$0xff]   ;;  %v6197_v29 = vld [vmem:[%s6679_s10 + $0x32c] ss:$16 sps:$4 sm:$0xff]  }
 0x14c   : > { %4082 = vmatprep.subr.bf16.mxu1 %v6173_v43  ;;  %v6186_v28 = vld [vmem:[%s6679_s10 + $0x148] ss:$16 sps:$4 sm:$0xff]  }
 0x14d   : > { %3842 = vmatmul.mubr.bf16.gmra.mxu0 %v7308_v55  ;;  %v6189_v43 = vld [vmem:[%s6679_s10 + $0x348] ss:$16 sps:$4 sm:$0xff]   ;;  %v6350_v55 = vld [vmem:[%s6679_s10 + $0x9ec] ss:$16 sps:$4 sm:$0xff]  }
 0x14e   : > { %3943 = vmatmul.mubr.bf16.gmra.mxu1 %v7310_v16  ;;  %3982 = vmatpush2.bf16.msra.mxu0 %v6168_v3  ;;  %v6192_v3 = vld [vmem:[%s6679_s10 + $0x128] ss:$16 sps:$4 sm:$0xff]  }
 0x14f   : > { %4083 = vmatpush2.bf16.msra.mxu1 %v6171_v32  ;;  %3983 = vmatprep.subr.bf16.mxu0 %v6176_v46  ;;  %v6188_v46 = vld [vmem:[%s6679_s10 + $0x14c] ss:$16 sps:$4 sm:$0xff]   ;;  %v6195_v32 = vld [vmem:[%s6679_s10 + $0x328] ss:$16 sps:$4 sm:$0xff]  }
 0x150   : > { %4084 = vmatprep.subr.bf16.mxu1 %v6179_v41  ;;  %3851 = vmatprep.mubr.bf16.mxu0 %v7316_v25  ;;  %v6191_v41 = vld [vmem:[%s6679_s10 + $0x34c] ss:$16 sps:$4 sm:$0xff]   ;;  %v6342_v25 = vld [vmem:[%s6679_s10 + $0x808] ss:$16 sps:$4 sm:$0xff]  }
 0x151   : > { %3952 = vmatprep.mubr.bf16.mxu1 %v7318_v52  ;;  %v8365_v52 = vld [vmem:[#allocation8_spill] sm:$0xff] }
 0x152   : > { %3984 = vmatpush2.bf16.msra.mxu0 %v6174_v35  ;;  %v6200_v35 = vld [vmem:[%s6679_s10 + $0x10c] ss:$16 sps:$4 sm:$0xff]   ;;  %v6345_v16 = vld [vmem:[%s6679_s10 + $0xa08] ss:$16 sps:$4 sm:$0xff]  }
 0x153   : > { %4085 = vmatpush2.bf16.msra.mxu1 %v6177_v38  ;;  %3985 = vmatprep.subr.bf16.mxu0 %v6182_v5  ;;  %v6203_v38 = vld [vmem:[%s6679_s10 + $0x30c] ss:$16 sps:$4 sm:$0xff]   ;;  %v6198_v5 = vld [vmem:[%s6679_s10 + $0x108] ss:$16 sps:$4 sm:$0xff]  }
 0x154   : > { %4086 = vmatprep.subr.bf16.mxu1 %v6185_v4  ;;  %v6209_v4 = vld [vmem:[%s6679_s10 + $0x6ec] ss:$16 sps:$4 sm:$0xff]  }
 0x155   : > { %3852 = vmatmul.mubr.bf16.gmra.mxu0 %v7328_v42  ;;  %v8364_v42 = vld [vmem:[#allocation7_spill] sm:$0xff] }
 0x156   : > { %3953 = vmatmul.mubr.bf16.gmra.mxu1 %v7330_v9  ;;  %3986 = vmatpush2.bf16.msra.mxu0 %v6180_v8  ;;  %v6204_v8 = vld [vmem:[%s6679_s10 + $0x4e8] ss:$16 sps:$4 sm:$0xff]   ;;  %v6338_v9 = vld [vmem:[%s6679_s10 + $0x82c] ss:$16 sps:$4 sm:$0xff]  }
 0x157   : > { %4087 = vmatpush2.bf16.msra.mxu1 %v6183_v1  ;;  %3987 = vmatprep.subr.bf16.mxu0 %v6188_v46  ;;  %v6207_v1 = vld [vmem:[%s6679_s10 + $0x6e8] ss:$16 sps:$4 sm:$0xff]   ;;  %v6212_v46 = vld [vmem:[%s6679_s10 + $0x4cc] ss:$16 sps:$4 sm:$0xff]  }
 0x158   : > { %4088 = vmatprep.subr.bf16.mxu1 %v6191_v41  ;;  %3993 = vmatprep.mubr.bf16.mxu0 %v6742_v10  ;;  %v6201_v10 = vld [vmem:[%s6679_s10 + $0x308] ss:$16 sps:$4 sm:$0xff]   ;;  %v6215_v41 = vld [vmem:[%s6679_s10 + $0x6cc] ss:$16 sps:$4 sm:$0xff]  }
 0x159   : > { %4094 = vmatprep.mubr.bf16.mxu1 %v6744_v11  ;;  %v6206_v11 = vld [vmem:[%s6679_s10 + $0x4ec] ss:$16 sps:$4 sm:$0xff]  }
 0x15a   : > { %3988 = vmatpush2.bf16.msra.mxu0 %v6186_v28 }
 0x15b   : > { %4089 = vmatpush2.bf16.msra.mxu1 %v6189_v43  ;;  %3989 = vmatprep.subr.bf16.mxu0 %v6194_v15 }
 0x15c   : > { %4090 = vmatprep.subr.bf16.mxu1 %v6197_v29  ;;  %v6210_v29 = vld [vmem:[%s6679_s10 + $0x4c8] ss:$16 sps:$4 sm:$0xff]  }
 0x15e   : > { %3990 = vmatpush2.bf16.msra.mxu0 %v6192_v3  ;;  %v6213_v3 = vld [vmem:[%s6679_s10 + $0x6c8] ss:$16 sps:$4 sm:$0xff]  }
 0x15f   : > { %4091 = vmatpush2.bf16.msra.mxu1 %v6195_v32  ;;  %3991 = vmatprep.subr.bf16.mxu0 %v6200_v35 }
 0x160   : > { %4092 = vmatprep.subr.bf16.mxu1 %v6203_v38  ;;  %v6218_v38 = vld [vmem:[%s6679_s10 + $0x4ac] ss:$16 sps:$4 sm:$0xff]  }
 0x162   : > { %3992 = vmatpush2.bf16.msra.mxu0 %v6198_v5  ;;  %v6221_v5 = vld [vmem:[%s6679_s10 + $0x6ac] ss:$16 sps:$4 sm:$0xff]  }
 0x163   : > { %4093 = vmatpush2.bf16.msra.mxu1 %v6201_v10  ;;  %4163 = vmatprep.subr.bf16.mxu0 %v6206_v11 }
 0x164   : > { %4264 = vmatprep.subr.bf16.mxu1 %v6209_v4  ;;  %v6216_v4 = vld [vmem:[%s6679_s10 + $0x4a8] ss:$16 sps:$4 sm:$0xff]  }
 0x165   : > { %v3389_v28 = vpop.f32.mrf.mxu0  ;;  %3994 = vmatmul.mubr.bf16.vlgmr.msra.gmra.mxu0 %v6772_v36 }
 0x166   : > { %v3490_v43 = vpop.f32.mrf.mxu1  ;;  %4095 = vmatmul.mubr.bf16.vlgmr.msra.gmra.mxu1 %v6774_v37  ;;  %4164 = vmatpush1.bf16.msra.mxu0 %v6204_v8  ;;  %v6219_v8 = vld [vmem:[%s6679_s10 + $0x6a8] ss:$16 sps:$4 sm:$0xff]  }
 0x167   : > { %v7358_v15 = vadd.f32 %v3490_v43, %v3389_v28  ;;  %4265 = vmatpush1.bf16.msra.mxu1 %v6207_v1  ;;  %v3391_v32 = vpop.f32.mrf.mxu0  ;;  %4165 = vmatprep.subr.bf16.mxu0 %v6212_v46  ;;  %v6227_v28 = vld [vmem:[%s6679_s10 + $0x68c] ss:$16 sps:$4 sm:$0xff]  }
 0x168   : > { %v3492_v35 = vpop.f32.mrf.mxu1  ;;  %4266 = vmatprep.subr.bf16.mxu1 %v6215_v41  ;;  %4003 = vmatprep.mubr.bf16.mxu0 %v6782_v44  ;;  %v6224_v41 = vld [vmem:[%s6679_s10 + $0x48c] ss:$16 sps:$4 sm:$0xff]  }
 0x169   : > { %v7364_v10 = vadd.f32 %v3492_v35, %v3391_v32  ;;  %4104 = vmatprep.mubr.bf16.mxu1 %v6784_v45  ;;  %v3393_v36 = vpop.f32.mrf.mxu0  ;;  %v6225_v32 = vld [vmem:[%s6679_s10 + $0x688] ss:$16 sps:$4 sm:$0xff]  }
 0x16a   : > { %v3494_v37 = vpop.f32.mrf.mxu1  ;;  %4166 = vmatpush1.bf16.msra.mxu0 %v6210_v29 }
 0x16b   : > { %v7368_v11 = vadd.f32 %v3494_v37, %v3393_v36  ;;  %4267 = vmatpush1.bf16.msra.mxu1 %v6213_v3  ;;  %v3395_v1 = vpop.f32.mrf.mxu0  ;;  %4167 = vmatprep.subr.bf16.mxu0 %v6218_v38  ;;  %v6222_v3 = vld [vmem:[%s6679_s10 + $0x488] ss:$16 sps:$4 sm:$0xff]   ;;  %v6233_v36 = vld [vmem:[%s6679_s10 + $0x66c] ss:$16 sps:$4 sm:$0xff]  }
 0x16c   : > { %v3496_v46 = vpop.f32.mrf.mxu1  ;;  %4268 = vmatprep.subr.bf16.mxu1 %v6221_v5  ;;  %v6230_v5 = vld [vmem:[%s6679_s10 + $0x46c] ss:$16 sps:$4 sm:$0xff]  }
 0x16d   : > { %v7374_v44 = vadd.f32 %v3496_v46, %v3395_v1  ;;  %v3399_v45 = vpop.f32.mrf.mxu0  ;;  %4004 = vmatmul.mubr.bf16.gmra.mxu0 %v6800_v56  ;;  %v6231_v1 = vld [vmem:[%s6679_s10 + $0x668] ss:$16 sps:$4 sm:$0xff]  }
 0x16e   : > { %v3500_v43 = vpop.f32.mrf.mxu1  ;;  %4105 = vmatmul.mubr.bf16.gmra.mxu1 %v6802_v57  ;;  %4168 = vmatpush1.bf16.msra.mxu0 %v6216_v4 }
 0x16f   : > { %4269 = vmatpush1.bf16.msra.mxu1 %v6219_v8  ;;  %v7378_v29 = vadd.f32 %v3500_v43, %v3399_v45  ;;  %4169 = vmatprep.subr.bf16.mxu0 %v6224_v41  ;;  %v3401_v35 = vpop.f32.mrf.mxu0  ;;  %v6228_v8 = vld [vmem:[%s6679_s10 + $0x468] ss:$16 sps:$4 sm:$0xff]   ;;  %v6239_v45 = vld [vmem:[%s6679_s10 + $0x64c] ss:$16 sps:$4 sm:$0xff]  }
 0x170   : > { %4270 = vmatprep.subr.bf16.mxu1 %v6227_v28  ;;  %v3502_v38 = vpop.f32.mrf.mxu1  ;;  %4013 = vmatprep.mubr.bf16.mxu0 %v6810_v0  ;;  %v6236_v28 = vld [vmem:[%s6679_s10 + $0x44c] ss:$16 sps:$4 sm:$0xff]  }
 0x171   : > { %v7384_v37 = vadd.f32 %v3502_v38, %v3401_v35  ;;  %4114 = vmatprep.mubr.bf16.mxu1 %v6812_v2  ;;  %v3403_v56 = vpop.f32.mrf.mxu0  ;;  %v6237_v35 = vld [vmem:[%s6679_s10 + $0x648] ss:$16 sps:$4 sm:$0xff]  }
 0x172   : > { %v3504_v57 = vpop.f32.mrf.mxu1  ;;  %4170 = vmatpush1.bf16.msra.mxu0 %v6222_v3 }
 0x173   : > { %4271 = vmatpush1.bf16.msra.mxu1 %v6225_v32  ;;  %v7388_v4 = vadd.f32 %v3504_v57, %v3403_v56  ;;  %4171 = vmatprep.subr.bf16.mxu0 %v6230_v5  ;;  %v3405_v46 = vpop.f32.mrf.mxu0  ;;  %v6234_v32 = vld [vmem:[%s6679_s10 + $0x448] ss:$16 sps:$4 sm:$0xff]   ;;  %v6245_v56 = vld [vmem:[%s6679_s10 + $0x62c] ss:$16 sps:$4 sm:$0xff]  }
 0x174   : > { %4272 = vmatprep.subr.bf16.mxu1 %v6233_v36  ;;  %v3506_v41 = vpop.f32.mrf.mxu1  ;;  %v6242_v36 = vld [vmem:[%s6679_s10 + $0x42c] ss:$16 sps:$4 sm:$0xff]  }
 0x175   : > { %v7394_v0 = vadd.f32 %v3506_v41, %v3405_v46  ;;  %v3409_v2 = vpop.f32.mrf.mxu0  ;;  %4014 = vmatmul.mubr.bf16.gmra.mxu0 %v6830_v17  ;;  %v6243_v46 = vld [vmem:[%s6679_s10 + $0x628] ss:$16 sps:$4 sm:$0xff]  }
 0x176   : > { %v3510_v43 = vpop.f32.mrf.mxu1  ;;  %4115 = vmatmul.mubr.bf16.gmra.mxu1 %v6832_v18  ;;  %4172 = vmatpush1.bf16.msra.mxu0 %v6228_v8 }
 0x177   : > { %4273 = vmatpush1.bf16.msra.mxu1 %v6231_v1  ;;  %v7398_v3 = vadd.f32 %v3510_v43, %v3409_v2  ;;  %4173 = vmatprep.subr.bf16.mxu0 %v6236_v28  ;;  %v3411_v38 = vpop.f32.mrf.mxu0  ;;  %v6240_v1 = vld [vmem:[%s6679_s10 + $0x428] ss:$16 sps:$4 sm:$0xff]   ;;  %v6251_v2 = vld [vmem:[%s6679_s10 + $0x60c] ss:$16 sps:$4 sm:$0xff]  }
 0x178   : > { %4274 = vmatprep.subr.bf16.mxu1 %v6239_v45  ;;  %v3512_v5 = vpop.f32.mrf.mxu1  ;;  %4023 = vmatprep.mubr.bf16.mxu0 %v6837_v22  ;;  %v6248_v45 = vld [vmem:[%s6679_s10 + $0x40c] ss:$16 sps:$4 sm:$0xff]  }
 0x179   : > { %v7404_v57 = vadd.f32 %v3512_v5, %v3411_v38  ;;  %4124 = vmatprep.mubr.bf16.mxu1 %v6839_v23  ;;  %v3413_v17 = vpop.f32.mrf.mxu0  ;;  %v6249_v38 = vld [vmem:[%s6679_s10 + $0x608] ss:$16 sps:$4 sm:$0xff]  }
 0x17a   : > { %v3514_v18 = vpop.f32.mrf.mxu1  ;;  %4174 = vmatpush1.bf16.msra.mxu0 %v6234_v32 }
 0x17b   : > { %4275 = vmatpush1.bf16.msra.mxu1 %v6237_v35  ;;  %v7408_v8 = vadd.f32 %v3514_v18, %v3413_v17  ;;  %4175 = vmatprep.subr.bf16.mxu0 %v6242_v36  ;;  %v3415_v41 = vpop.f32.mrf.mxu0  ;;  %v6246_v35 = vld [vmem:[%s6679_s10 + $0x408] ss:$16 sps:$4 sm:$0xff]   ;;  %v6257_v17 = vld [vmem:[%s6679_s10 + $0x7ec] ss:$16 sps:$4 sm:$0xff]  }
 0x17c   : > { %4276 = vmatprep.subr.bf16.mxu1 %v6245_v56  ;;  %v3516_v28 = vpop.f32.mrf.mxu1  ;;  %v6254_v56 = vld [vmem:[%s6679_s10 + $0x5ec] ss:$16 sps:$4 sm:$0xff]  }
 0x17d   : > { %v7414_v22 = vadd.f32 %v3516_v28, %v3415_v41  ;;  %v3419_v23 = vpop.f32.mrf.mxu0  ;;  %4024 = vmatmul.mubr.bf16.gmra.mxu0 %v6858_v39  ;;  %v6255_v41 = vld [vmem:[%s6679_s10 + $0x7e8] ss:$16 sps:$4 sm:$0xff]  }
 0x17e   : > { %v3520_v43 = vpop.f32.mrf.mxu1  ;;  %4125 = vmatmul.mubr.bf16.gmra.mxu1 %v6860_v40  ;;  %4176 = vmatpush1.bf16.msra.mxu0 %v6240_v1 }
 0x17f   : > { %4277 = vmatpush1.bf16.msra.mxu1 %v6243_v46  ;;  %v7418_v32 = vadd.f32 %v3520_v43, %v3419_v23  ;;  %4177 = vmatprep.subr.bf16.mxu0 %v6248_v45  ;;  %v3421_v5 = vpop.f32.mrf.mxu0  ;;  %v6252_v46 = vld [vmem:[%s6679_s10 + $0x5e8] ss:$16 sps:$4 sm:$0xff]   ;;  %v6263_v23 = vld [vmem:[%s6679_s10 + $0x7cc] ss:$16 sps:$4 sm:$0xff]  }
 0x180   : > { %4278 = vmatprep.subr.bf16.mxu1 %v6251_v2  ;;  %v3522_v36 = vpop.f32.mrf.mxu1  ;;  %4033 = vmatprep.mubr.bf16.mxu0 %v6866_v47  ;;  %v6260_v2 = vld [vmem:[%s6679_s10 + $0x5cc] ss:$16 sps:$4 sm:$0xff]  }
 0x181   : > { %v7424_v18 = vadd.f32 %v3522_v36, %v3421_v5  ;;  %4134 = vmatprep.mubr.bf16.mxu1 %v6868_v48  ;;  %v3423_v39 = vpop.f32.mrf.mxu0  ;;  %v6261_v5 = vld [vmem:[%s6679_s10 + $0x7c8] ss:$16 sps:$4 sm:$0xff]  }
 0x182   : > { %v3524_v40 = vpop.f32.mrf.mxu1  ;;  %4178 = vmatpush1.bf16.msra.mxu0 %v6246_v35 }
 0x183   : > { %4279 = vmatpush1.bf16.msra.mxu1 %v6249_v38  ;;  %v7428_v1 = vadd.f32 %v3524_v40, %v3423_v39  ;;  %4179 = vmatprep.subr.bf16.mxu0 %v6254_v56  ;;  %v3425_v28 = vpop.f32.mrf.mxu0  ;;  %v6258_v38 = vld [vmem:[%s6679_s10 + $0x5c8] ss:$16 sps:$4 sm:$0xff]   ;;  %v6269_v39 = vld [vmem:[%s6679_s10 + $0x7ac] ss:$16 sps:$4 sm:$0xff]  }
 0x184   : > { %4280 = vmatprep.subr.bf16.mxu1 %v6257_v17  ;;  %v3526_v45 = vpop.f32.mrf.mxu1  ;;  %v6266_v17 = vld [vmem:[%s6679_s10 + $0x5ac] ss:$16 sps:$4 sm:$0xff]  }
 0x185   : > { %v7434_v47 = vadd.f32 %v3526_v45, %v3425_v28  ;;  %v3429_v48 = vpop.f32.mrf.mxu0  ;;  %4034 = vmatmul.mubr.bf16.gmra.mxu0 %v6884_v61  ;;  %v6267_v28 = vld [vmem:[%s6679_s10 + $0x7a8] ss:$16 sps:$4 sm:$0xff]  }
 0x186   : > { %v3530_v43 = vpop.f32.mrf.mxu1  ;;  %4135 = vmatmul.mubr.bf16.gmra.mxu1 %v6886_v62  ;;  %4180 = vmatpush2.bf16.msra.mxu0 %v6252_v46 }
 0x187   : > { %4281 = vmatpush2.bf16.msra.mxu1 %v6255_v41  ;;  %v7438_v35 = vadd.f32 %v3530_v43, %v3429_v48  ;;  %4181 = vmatprep.subr.bf16.mxu0 %v6260_v2  ;;  %v3431_v36 = vpop.f32.mrf.mxu0  ;;  %v6264_v41 = vld [vmem:[%s6679_s10 + $0x5a8] ss:$16 sps:$4 sm:$0xff]   ;;  %v6275_v48 = vld [vmem:[%s6679_s10 + $0x78c] ss:$16 sps:$4 sm:$0xff]  }
 0x188   : > { %4282 = vmatprep.subr.bf16.mxu1 %v6263_v23  ;;  %v3532_v56 = vpop.f32.mrf.mxu1  ;;  %4043 = vmatprep.mubr.bf16.mxu0 %v6892_v6  ;;  %v6272_v23 = vld [vmem:[%s6679_s10 + $0x58c] ss:$16 sps:$4 sm:$0xff]  }
 0x189   : > { %8354 = vst [vmem:[#allocation48_spill] sm:$0xff] %v7438_v35  ;;  %v7444_v40 = vadd.f32 %v3532_v56, %v3431_v36  ;;  %4144 = vmatprep.mubr.bf16.mxu1 %v6894_v7  ;;  %v3433_v61 = vpop.f32.mrf.mxu0  ;;  %v6273_v36 = vld [vmem:[%s6679_s10 + $0x788] ss:$16 sps:$4 sm:$0xff]  }
 0x18a   : > { %v3534_v62 = vpop.f32.mrf.mxu1  ;;  %4182 = vmatpush2.bf16.msra.mxu0 %v6258_v38  ;;  %v6390_v35 = vld [vmem:[%s6679_s10 + $0x908] ss:$16 sps:$4 sm:$0xff]  }
 0x18b   : > { %8355 = vst [vmem:[#allocation49_spill] sm:$0xff] %v7444_v40  ;;  %4283 = vmatpush2.bf16.msra.mxu1 %v6261_v5  ;;  %v7448_v46 = vadd.f32 %v3534_v62, %v3433_v61  ;;  %4183 = vmatprep.subr.bf16.mxu0 %v6266_v17  ;;  %v3435_v45 = vpop.f32.mrf.mxu0  ;;  %v6270_v5 = vld [vmem:[%s6679_s10 + $0x588] ss:$16 sps:$4 sm:$0xff]   ;;  %v6281_v61 = vld [vmem:[%s6679_s10 + $0x76c] ss:$16 sps:$4 sm:$0xff]  }
 0x18c   : > { %4284 = vmatprep.subr.bf16.mxu1 %v6269_v39  ;;  %v3536_v2 = vpop.f32.mrf.mxu1  ;;  %v6278_v39 = vld [vmem:[%s6679_s10 + $0x56c] ss:$16 sps:$4 sm:$0xff]  }
 0x18d   : > { %8356 = vst [vmem:[#allocation50_spill] sm:$0xff] %v7448_v46  ;;  %v7454_v6 = vadd.f32 %v3536_v2, %v3435_v45  ;;  %v3439_v7 = vpop.f32.mrf.mxu0  ;;  %4044 = vmatmul.mubr.bf16.gmra.mxu0 %v6908_v20  ;;  %v6279_v45 = vld [vmem:[%s6679_s10 + $0x768] ss:$16 sps:$4 sm:$0xff]  }
 0x18e   : > { %v3540_v43 = vpop.f32.mrf.mxu1  ;;  %4145 = vmatmul.mubr.bf16.gmra.mxu1 %v6910_v21  ;;  %4184 = vmatpush2.bf16.msra.mxu0 %v6264_v41  ;;  %v6357_v46 = vld [vmem:[%s6679_s10 + $0xbc8] ss:$16 sps:$4 sm:$0xff]  }
 0x18f   : > { %8357 = vst [vmem:[#allocation51_spill] sm:$0xff] %v7454_v6  ;;  %4285 = vmatpush2.bf16.msra.mxu1 %v6267_v28  ;;  %v7458_v38 = vadd.f32 %v3540_v43, %v3439_v7  ;;  %4185 = vmatprep.subr.bf16.mxu0 %v6272_v23  ;;  %v3441_v56 = vpop.f32.mrf.mxu0  ;;  %v6276_v28 = vld [vmem:[%s6679_s10 + $0x568] ss:$16 sps:$4 sm:$0xff]   ;;  %v6287_v7 = vld [vmem:[%s6679_s10 + $0x74c] ss:$16 sps:$4 sm:$0xff]  }
 0x190   : > { %4286 = vmatprep.subr.bf16.mxu1 %v6275_v48  ;;  %v3542_v17 = vpop.f32.mrf.mxu1  ;;  %4053 = vmatprep.mubr.bf16.mxu0 %v6918_v30  ;;  %v6284_v48 = vld [vmem:[%s6679_s10 + $0x54c] ss:$16 sps:$4 sm:$0xff]   ;;  %v6354_v6 = vld [vmem:[%s6679_s10 + $0x9c8] ss:$16 sps:$4 sm:$0xff]  }
 0x191   : > { %8358 = vst [vmem:[#allocation52_spill] sm:$0xff] %v7458_v38  ;;  %v7464_v62 = vadd.f32 %v3542_v17, %v3441_v56  ;;  %4154 = vmatprep.mubr.bf16.mxu1 %v6920_v31  ;;  %v3443_v20 = vpop.f32.mrf.mxu0  ;;  %v8376_v40 = vld [vmem:[#allocation14_spill] sm:$0xff] }
 0x192   : > { %v3544_v21 = vpop.f32.mrf.mxu1  ;;  %4186 = vmatpush2.bf16.msra.mxu0 %v6270_v5  ;;  %v6282_v5 = vld [vmem:[%s6679_s10 + $0x548] ss:$16 sps:$4 sm:$0xff]  }
 0x193   : > { %8359 = vst [vmem:[#allocation53_spill] sm:$0xff] %v7464_v62  ;;  %4287 = vmatpush2.bf16.msra.mxu1 %v6273_v36  ;;  %v7468_v41 = vadd.f32 %v3544_v21, %v3443_v20  ;;  %4187 = vmatprep.subr.bf16.mxu0 %v6278_v39  ;;  %v3445_v2 = vpop.f32.mrf.mxu0  ;;  %v6285_v36 = vld [vmem:[%s6679_s10 + $0x748] ss:$16 sps:$4 sm:$0xff]   ;;  %v6293_v20 = vld [vmem:[%s6679_s10 + $0x72c] ss:$16 sps:$4 sm:$0xff]  }
 0x194   : > { %4288 = vmatprep.subr.bf16.mxu1 %v6281_v61  ;;  %v3546_v23 = vpop.f32.mrf.mxu1  ;;  %v6290_v61 = vld [vmem:[%s6679_s10 + $0x52c] ss:$16 sps:$4 sm:$0xff]   ;;  %v6351_v62 = vld [vmem:[%s6679_s10 + $0xbe8] ss:$16 sps:$4 sm:$0xff]  }
 0x195   : > { %8360 = vst [vmem:[#allocation54_spill] sm:$0xff] %v7468_v41  ;;  %v7474_v30 = vadd.f32 %v3546_v23, %v3445_v2  ;;  %v3449_v31 = vpop.f32.mrf.mxu0  ;;  %4054 = vmatmul.mubr.bf16.gmra.mxu0 %v6936_v50  ;;  %v8368_v41 = vld [vmem:[#allocation11_spill] sm:$0xff] }
 0x196   : > { %v3550_v43 = vpop.f32.mrf.mxu1  ;;  %4155 = vmatmul.mubr.bf16.gmra.mxu1 %v6938_v51  ;;  %4188 = vmatpush2.bf16.msra.mxu0 %v6276_v28  ;;  %v6288_v28 = vld [vmem:[%s6679_s10 + $0x528] ss:$16 sps:$4 sm:$0xff]  }
 0x197   : > { %8361 = vst [vmem:[#allocation55_spill] sm:$0xff] %v7474_v30  ;;  %4289 = vmatpush2.bf16.msra.mxu1 %v6279_v45  ;;  %v7480_v56 = vadd.f32 %v3550_v43, %v3449_v31  ;;  %4189 = vmatprep.subr.bf16.mxu0 %v6284_v48  ;;  %v3451_v17 = vpop.f32.mrf.mxu0  ;;  %v6291_v45 = vld [vmem:[%s6679_s10 + $0x728] ss:$16 sps:$4 sm:$0xff]   ;;  %v6296_v48 = vld [vmem:[%s6679_s10 + $0x50c] ss:$16 sps:$4 sm:$0xff]  }
 0x198   : > { %4290 = vmatprep.subr.bf16.mxu1 %v6287_v7  ;;  %v3552_v39 = vpop.f32.mrf.mxu1  ;;  %4195 = vmatprep.mubr.bf16.mxu0 %v6944_v58  ;;  %v6299_v58 = vld [vmem:[%s6679_s10 + $0x70c] ss:$16 sps:$4 sm:$0xff]   ;;  %v6297_v7 = vld [vmem:[%s6679_s10 + $0x708] ss:$16 sps:$4 sm:$0xff]  }
 0x199   : > { %8362 = vst [vmem:[#allocation56_spill] sm:$0xff] %v7480_v56  ;;  %v7484_v50 = vadd.f32 %v3552_v39, %v3451_v17  ;;  %4296 = vmatprep.mubr.bf16.mxu1 %v6946_v59  ;;  %v3453_v51 = vpop.f32.mrf.mxu0  ;;  %v6294_v59 = vld [vmem:[%s6679_s10 + $0x508] ss:$16 sps:$4 sm:$0xff]   ;;  %v6302_v31 = vld [vmem:[%s6679_s10 + $0x8ec] ss:$16 sps:$4 sm:$0xff]  }
 0x19a   : > { %v3554_v21 = vpop.f32.mrf.mxu1  ;;  %4190 = vmatpush2.bf16.msra.mxu0 %v6282_v5  ;;  %v6305_v43 = vld [vmem:[%s6679_s10 + $0xaec] ss:$16 sps:$4 sm:$0xff]   ;;  %v6300_v5 = vld [vmem:[%s6679_s10 + $0x8e8] ss:$16 sps:$4 sm:$0xff]  }
 0x19b   : > { %8363 = vst [vmem:[#allocation57_spill] sm:$0xff] %v7484_v50  ;;  %4291 = vmatpush2.bf16.msra.mxu1 %v6285_v36  ;;  %4191 = vmatprep.subr.bf16.mxu0 %v6290_v61  ;;  %v3454_v2 = vpop.f32.mrf.mxu0  ;;  %v6303_v36 = vld [vmem:[%s6679_s10 + $0xae8] ss:$16 sps:$4 sm:$0xff]   ;;  %v6308_v17 = vld [vmem:[%s6679_s10 + $0x8cc] ss:$16 sps:$4 sm:$0xff]  }
 0x19c   : > { %4292 = vmatprep.subr.bf16.mxu1 %v6293_v20  ;;  %v3555_v23 = vpop.f32.mrf.mxu1  ;;  %v6311_v39 = vld [vmem:[%s6679_s10 + $0xacc] ss:$16 sps:$4 sm:$0xff]   ;;  %v6306_v51 = vld [vmem:[%s6679_s10 + $0x8c8] ss:$16 sps:$4 sm:$0xff]  }
 0x19d   : > { %v6309_v21 = vld [vmem:[%s6679_s10 + $0xac8] ss:$16 sps:$4 sm:$0xff]   ;;  %v6314_v2 = vld [vmem:[%s6679_s10 + $0x8ac] ss:$16 sps:$4 sm:$0xff]  }
 0x19e   : > { %4192 = vmatpush2.bf16.msra.mxu0 %v6288_v28  ;;  %v6317_v23 = vld [vmem:[%s6679_s10 + $0xaac] ss:$16 sps:$4 sm:$0xff]   ;;  %v6339_v50 = vld [vmem:[%s6679_s10 + $0xa28] ss:$16 sps:$4 sm:$0xff]  }
 0x19f   : > { %4293 = vmatpush2.bf16.msra.mxu1 %v6291_v45  ;;  %4193 = vmatprep.subr.bf16.mxu0 %v6296_v48  ;;  %v6312_v48 = vld [vmem:[%s6679_s10 + $0x8a8] ss:$16 sps:$4 sm:$0xff]  }
 0x1a0   : > { %4294 = vmatprep.subr.bf16.mxu1 %v6299_v58  ;;  %v6315_v58 = vld [vmem:[%s6679_s10 + $0xaa8] ss:$16 sps:$4 sm:$0xff]  }
 0x1a1   : > { %v8367_v30 = vld [vmem:[#allocation10_spill] sm:$0xff] }
 0x1a2   : > { %4194 = vmatpush2.bf16.msra.mxu0 %v6294_v59 }
 0x1a3   : > { %4295 = vmatpush2.bf16.msra.mxu1 %v6297_v7  ;;  %4365 = vmatprep.subr.bf16.mxu0 %v6302_v31 }
 0x1a4   : > { %4466 = vmatprep.subr.bf16.mxu1 %v6305_v43 }
 0x1a5   : > { %v7500_v61 = vpop.f32.mrf.mxu0  ;;  %4196 = vmatmul.mubr.bf16.vlgmr.msra.gmra.mxu0 %v6972_v33 }
 0x1a6   : > { %v7502_v20 = vpop.f32.mrf.mxu1  ;;  %4297 = vmatmul.mubr.bf16.vlgmr.msra.gmra.mxu1 %v6974_v34  ;;  %4366 = vmatpush1.bf16.msra.mxu0 %v6300_v5  ;;  %v6318_v5 = vld [vmem:[%s6679_s10 + $0x888] ss:$16 sps:$4 sm:$0xff]  }
 0x1a7   : > { %4467 = vmatpush1.bf16.msra.mxu1 %v6303_v36  ;;  %v7508_v28 = vpop.f32.mrf.mxu0  ;;  %4367 = vmatprep.subr.bf16.mxu0 %v6308_v17  ;;  %v6321_v36 = vld [vmem:[%s6679_s10 + $0xa88] ss:$16 sps:$4 sm:$0xff]  }
 0x1a8   : > { %v7510_v45 = vpop.f32.mrf.mxu1  ;;  %4468 = vmatprep.subr.bf16.mxu1 %v6311_v39  ;;  %4205 = vmatprep.mubr.bf16.mxu0 %v6980_v53  ;;  %v6320_v53 = vld [vmem:[%s6679_s10 + $0x88c] ss:$16 sps:$4 sm:$0xff]  }
 0x1a9   : > { %4306 = vmatprep.mubr.bf16.mxu1 %v6982_v54  ;;  %v7516_v33 = vpop.f32.mrf.mxu0  ;;  %v6323_v54 = vld [vmem:[%s6679_s10 + $0xa8c] ss:$16 sps:$4 sm:$0xff]  }
 0x1aa   : > { %v7518_v34 = vpop.f32.mrf.mxu1  ;;  %4368 = vmatpush1.bf16.msra.mxu0 %v6306_v51  ;;  %v6326_v51 = vld [vmem:[%s6679_s10 + $0x86c] ss:$16 sps:$4 sm:$0xff]  }
 0x1ab   : > { %4469 = vmatpush1.bf16.msra.mxu1 %v6309_v21  ;;  %v7522_v59 = vpop.f32.mrf.mxu0  ;;  %4369 = vmatprep.subr.bf16.mxu0 %v6314_v2  ;;  %v6324_v2 = vld [vmem:[%s6679_s10 + $0x868] ss:$16 sps:$4 sm:$0xff]  }
 0x1ac   : > { %v7524_v7 = vpop.f32.mrf.mxu1  ;;  %4470 = vmatprep.subr.bf16.mxu1 %v6317_v23  ;;  %v6327_v23 = vld [vmem:[%s6679_s10 + $0xa68] ss:$16 sps:$4 sm:$0xff]  }
 0x1ad   : > { %v7528_v31 = vpop.f32.mrf.mxu0  ;;  %4206 = vmatmul.mubr.bf16.gmra.mxu0 %v7000_v12  ;;  %v6329_v12 = vld [vmem:[%s6679_s10 + $0xa6c] ss:$16 sps:$4 sm:$0xff]  }
 0x1ae   : > { %v7531_v43 = vpop.f32.mrf.mxu1  ;;  %4307 = vmatmul.mubr.bf16.gmra.mxu1 %v7003_v14  ;;  %4370 = vmatpush1.bf16.msra.mxu0 %v6312_v48 }
 0x1af   : > { %4471 = vmatpush1.bf16.msra.mxu1 %v6315_v58  ;;  %v7536_v17 = vpop.f32.mrf.mxu0  ;;  %4371 = vmatprep.subr.bf16.mxu0 %v6320_v53 }
 0x1b0   : > { %v7538_v39 = vpop.f32.mrf.mxu1  ;;  %4472 = vmatprep.subr.bf16.mxu1 %v6323_v54  ;;  %4215 = vmatprep.mubr.bf16.mxu0 %v7010_v26  ;;  %v6332_v26 = vld [vmem:[%s6679_s10 + $0x84c] ss:$16 sps:$4 sm:$0xff]  }
 0x1b1   : > { %4316 = vmatprep.mubr.bf16.mxu1 %v7012_v27  ;;  %v7544_v14 = vpop.f32.mrf.mxu0  ;;  %v6335_v27 = vld [vmem:[%s6679_s10 + $0xa4c] ss:$16 sps:$4 sm:$0xff]  }
 0x1b2   : > { %v7546_v21 = vpop.f32.mrf.mxu1  ;;  %4372 = vmatpush1.bf16.msra.mxu0 %v6318_v5  ;;  %v6330_v5 = vld [vmem:[%s6679_s10 + $0x848] ss:$16 sps:$4 sm:$0xff]  }
 0x1b3   : > { %4473 = vmatpush1.bf16.msra.mxu1 %v6321_v36  ;;  %v7550_v48 = vpop.f32.mrf.mxu0  ;;  %4373 = vmatprep.subr.bf16.mxu0 %v6326_v51  ;;  %v6333_v36 = vld [vmem:[%s6679_s10 + $0xa48] ss:$16 sps:$4 sm:$0xff]  }
 0x1b4   : > { %v7552_v58 = vpop.f32.mrf.mxu1  ;;  %4474 = vmatprep.subr.bf16.mxu1 %v6329_v12 }
 0x1b5   : > { %v7556_v53 = vpop.f32.mrf.mxu0  ;;  %4216 = vmatmul.mubr.bf16.gmra.mxu0 %v7028_v49  ;;  %v6341_v49 = vld [vmem:[%s6679_s10 + $0xa2c] ss:$16 sps:$4 sm:$0xff]  }
 0x1b6   : > { %v7559_v54 = vpop.f32.mrf.mxu1  ;;  %4317 = vmatmul.mubr.bf16.gmra.mxu1 %v7031_v60  ;;  %4374 = vmatpush1.bf16.msra.mxu0 %v6324_v2 }
 0x1b7   : > { %4475 = vmatpush1.bf16.msra.mxu1 %v6327_v23  ;;  %v7564_v51 = vpop.f32.mrf.mxu0  ;;  %4375 = vmatprep.subr.bf16.mxu0 %v6332_v26  ;;  %v6336_v23 = vld [vmem:[%s6679_s10 + $0x828] ss:$16 sps:$4 sm:$0xff]  }
 0x1b8   : > { %v7566_v12 = vpop.f32.mrf.mxu1  ;;  %4476 = vmatprep.subr.bf16.mxu1 %v6335_v27  ;;  %4225 = vmatprep.mubr.bf16.mxu0 %v7038_v19  ;;  %v6344_v19 = vld [vmem:[%s6679_s10 + $0x80c] ss:$16 sps:$4 sm:$0xff]  }
 0x1b9   : > { %4326 = vmatprep.mubr.bf16.mxu1 %v8364_v42  ;;  %v7572_v60 = vpop.f32.mrf.mxu0  ;;  %v6347_v42 = vld [vmem:[%s6679_s10 + $0xa0c] ss:$16 sps:$4 sm:$0xff]  }
 0x1ba   : > { %v7574_v2 = vpop.f32.mrf.mxu1  ;;  %4376 = vmatpush1.bf16.msra.mxu0 %v6330_v5 }
 0x1bb   : > { %4477 = vmatpush1.bf16.msra.mxu1 %v6333_v36  ;;  %v7578_v26 = vpop.f32.mrf.mxu0  ;;  %4377 = vmatprep.subr.bf16.mxu0 %v6338_v9  ;;  %v8366_v36 = vld [vmem:[#allocation9_spill] sm:$0xff] }
 0x1bc   : > { %v7580_v27 = vpop.f32.mrf.mxu1  ;;  %4478 = vmatprep.subr.bf16.mxu1 %v6341_v49 }
 0x1bd   : > { %v7584_v56 = vpop.f32.mrf.mxu0  ;;  %4226 = vmatmul.mubr.bf16.gmra.mxu0 %v8365_v52  ;;  %v6353_v52 = vld [vmem:[%s6679_s10 + $0xbec] ss:$16 sps:$4 sm:$0xff]  }
 0x1be   : > { %v7587_v5 = vpop.f32.mrf.mxu1  ;;  %4327 = vmatmul.mubr.bf16.gmra.mxu1 %v8366_v36  ;;  %4378 = vmatpush1.bf16.msra.mxu0 %v6336_v23  ;;  %v6348_v36 = vld [vmem:[%s6679_s10 + $0x9e8] ss:$16 sps:$4 sm:$0xff]  }
 0x1bf   : > { %4479 = vmatpush1.bf16.msra.mxu1 %v6339_v50  ;;  %v7592_v9 = vpop.f32.mrf.mxu0  ;;  %4379 = vmatprep.subr.bf16.mxu0 %v6344_v19 }
 0x1c0   : > { %v7594_v49 = vpop.f32.mrf.mxu1  ;;  %4480 = vmatprep.subr.bf16.mxu1 %v6347_v42  ;;  %4235 = vmatprep.mubr.bf16.mxu0 %v8367_v30  ;;  %v6356_v30 = vld [vmem:[%s6679_s10 + $0x9cc] ss:$16 sps:$4 sm:$0xff]  }
 0x1c1   : > { %4336 = vmatprep.mubr.bf16.mxu1 %v8368_v41  ;;  %v7600_v23 = vpop.f32.mrf.mxu0  ;;  %v6359_v41 = vld [vmem:[%s6679_s10 + $0xbcc] ss:$16 sps:$4 sm:$0xff]  }
 0x1c2   : > { %v7602_v50 = vpop.f32.mrf.mxu1  ;;  %4380 = vmatpush1.bf16.msra.mxu0 %v6342_v25 }
 0x1c3   : > { %4481 = vmatpush1.bf16.msra.mxu1 %v6345_v16  ;;  %v7606_v19 = vpop.f32.mrf.mxu0  ;;  %4381 = vmatprep.subr.bf16.mxu0 %v6350_v55  ;;  %v8373_v16 = vld [vmem:[#allocation13_spill] sm:$0xff] }
 0x1c4   : > { %v7608_v42 = vpop.f32.mrf.mxu1  ;;  %4482 = vmatprep.subr.bf16.mxu1 %v6353_v52 }
 0x1c5   : > { %8369 = vst [vmem:[#allocation7_spill] sm:$0xff] %v7608_v42  ;;  %v7612_v38 = vpop.f32.mrf.mxu0  ;;  %4236 = vmatmul.mubr.bf16.gmra.mxu0 %v8371_v13  ;;  %v6362_v42 = vld [vmem:[%s6679_s10 + $0x9ac] ss:$16 sps:$4 sm:$0xff]  }
 0x1c6   : > { %8370 = vst [vmem:[#allocation8_spill] sm:$0xff] %v7612_v38  ;;  %v7615_v25 = vpop.f32.mrf.mxu1  ;;  %4337 = vmatmul.mubr.bf16.gmra.mxu1 %v8373_v16  ;;  %4382 = vmatpush2.bf16.msra.mxu0 %v6348_v36  ;;  %v6365_v13 = vld [vmem:[%s6679_s10 + $0xbac] ss:$16 sps:$4 sm:$0xff]   ;;  %v6360_v16 = vld [vmem:[%s6679_s10 + $0x9a8] ss:$16 sps:$4 sm:$0xff]  }
 0x1c7   : > { %8372 = vst [vmem:[#allocation9_spill] sm:$0xff] %v7615_v25  ;;  %4483 = vmatpush2.bf16.msra.mxu1 %v6351_v62  ;;  %v7620_v55 = vpop.f32.mrf.mxu0  ;;  %4383 = vmatprep.subr.bf16.mxu0 %v6356_v30  ;;  %v8377_v25 = vld [vmem:[#allocation15_spill] sm:$0xff]  ;;  %v6395_v38 = vld [vmem:[%s6679_s10 + $0xb0c] ss:$16 sps:$4 sm:$0xff]  }
 0x1c8   : > { %8374 = vst [vmem:[#allocation10_spill] sm:$0xff] %v7620_v55  ;;  %v7622_v52 = vpop.f32.mrf.mxu1  ;;  %4484 = vmatprep.subr.bf16.mxu1 %v6359_v41  ;;  %4245 = vmatprep.mubr.bf16.mxu0 %v8376_v40  ;;  %v6368_v40 = vld [vmem:[%s6679_s10 + $0x98c] ss:$16 sps:$4 sm:$0xff]  }
 0x1c9   : > { %8375 = vst [vmem:[#allocation11_spill] sm:$0xff] %v7622_v52  ;;  %4346 = vmatprep.mubr.bf16.mxu1 %v8377_v25  ;;  %v7628_v36 = vpop.f32.mrf.mxu0  ;;  %v6363_v52 = vld [vmem:[%s6679_s10 + $0xba8] ss:$16 sps:$4 sm:$0xff]   ;;  %v6371_v25 = vld [vmem:[%s6679_s10 + $0xb8c] ss:$16 sps:$4 sm:$0xff]  }
 0x1ca   : > { %8378 = vst [vmem:[#allocation12_spill] sm:$0xff] %v7628_v36  ;;  %v7630_v62 = vpop.f32.mrf.mxu1  ;;  %4384 = vmatpush2.bf16.msra.mxu0 %v6354_v6  ;;  %v8383_v36 = vld [vmem:[#allocation16_spill] sm:$0xff] }
 0x1cb   : > { %8379 = vst [vmem:[#allocation13_spill] sm:$0xff] %v7630_v62  ;;  %4485 = vmatpush2.bf16.msra.mxu1 %v6357_v46  ;;  %v7634_v30 = vpop.f32.mrf.mxu0  ;;  %4385 = vmatprep.subr.bf16.mxu0 %v6362_v42  ;;  %v8385_v46 = vld [vmem:[#allocation17_spill] sm:$0xff] }
 0x1cc   : > { %8380 = vst [vmem:[#allocation14_spill] sm:$0xff] %v7634_v30  ;;  %v7636_v41 = vpop.f32.mrf.mxu1  ;;  %4486 = vmatprep.subr.bf16.mxu1 %v6365_v13  ;;  %v6366_v62 = vld [vmem:[%s6679_s10 + $0x988] ss:$16 sps:$4 sm:$0xff]  }
 0x1cd   : > { %8381 = vst [vmem:[#allocation15_spill] sm:$0xff] %v7636_v41  ;;  %v7640_v55 = vpop.f32.mrf.mxu0  ;;  %4246 = vmatmul.mubr.bf16.gmra.mxu0 %v8383_v36  ;;  %v6369_v41 = vld [vmem:[%s6679_s10 + $0xb88] ss:$16 sps:$4 sm:$0xff]   ;;  %v6377_v36 = vld [vmem:[%s6679_s10 + $0xb6c] ss:$16 sps:$4 sm:$0xff]  }
 0x1ce   : > { %8382 = vst [vmem:[#allocation58_spill] sm:$0xff] %v7640_v55  ;;  %v7643_v6 = vpop.f32.mrf.mxu1  ;;  %4347 = vmatmul.mubr.bf16.gmra.mxu1 %v8385_v46  ;;  %4386 = vmatpush2.bf16.msra.mxu0 %v6360_v16  ;;  %v6374_v55 = vld [vmem:[%s6679_s10 + $0x96c] ss:$16 sps:$4 sm:$0xff]   ;;  %v6372_v46 = vld [vmem:[%s6679_s10 + $0x968] ss:$16 sps:$4 sm:$0xff]  }
 0x1cf   : > { %8384 = vst [vmem:[#allocation16_spill] sm:$0xff] %v7643_v6  ;;  %4487 = vmatpush2.bf16.msra.mxu1 %v6363_v52  ;;  %v7648_v42 = vpop.f32.mrf.mxu0  ;;  %4387 = vmatprep.subr.bf16.mxu0 %v6368_v40  ;;  %v8388_v30 = vld [vmem:[#allocation18_spill] sm:$0xff]  ;;  %v8389_v6 = vld [vmem:[#allocation19_spill] sm:$0xff] }
 0x1d0   : > { %8386 = vst [vmem:[#allocation17_spill] sm:$0xff] %v7648_v42  ;;  %v7650_v13 = vpop.f32.mrf.mxu1  ;;  %4488 = vmatprep.subr.bf16.mxu1 %v6371_v25  ;;  %4255 = vmatprep.mubr.bf16.mxu0 %v8388_v30  ;;  %v6380_v30 = vld [vmem:[%s6679_s10 + $0x94c] ss:$16 sps:$4 sm:$0xff]  }
 0x1d1   : > { %8387 = vst [vmem:[#allocation59_spill] sm:$0xff] %v7650_v13  ;;  %4356 = vmatprep.mubr.bf16.mxu1 %v8389_v6  ;;  %v7656_v16 = vpop.f32.mrf.mxu0  ;;  %v6375_v13 = vld [vmem:[%s6679_s10 + $0xb68] ss:$16 sps:$4 sm:$0xff]   ;;  %v6383_v6 = vld [vmem:[%s6679_s10 + $0xb4c] ss:$16 sps:$4 sm:$0xff]  }
 0x1d2   : > { %8390 = vst [vmem:[#allocation18_spill] sm:$0xff] %v7656_v16  ;;  %v7658_v52 = vpop.f32.mrf.mxu1  ;;  %4388 = vmatpush2.bf16.msra.mxu0 %v6366_v62  ;;  %v8395_v16 = vld [vmem:[#allocation20_spill] sm:$0xff] }
 0x1d3   : > { %8391 = vst [vmem:[#allocation19_spill] sm:$0xff] %v7658_v52  ;;  %4489 = vmatpush2.bf16.msra.mxu1 %v6369_v41  ;;  %v7662_v40 = vpop.f32.mrf.mxu0  ;;  %4389 = vmatprep.subr.bf16.mxu0 %v6374_v55  ;;  %v8397_v41 = vld [vmem:[#allocation21_spill] sm:$0xff] }
 0x1d4   : > { %8392 = vst [vmem:[#allocation60_spill] sm:$0xff] %v7662_v40  ;;  %v7664_v25 = vpop.f32.mrf.mxu1  ;;  %4490 = vmatprep.subr.bf16.mxu1 %v6377_v36  ;;  %v6378_v52 = vld [vmem:[%s6679_s10 + $0x948] ss:$16 sps:$4 sm:$0xff]  }
 0x1d5   : > { %8393 = vst [vmem:[#allocation61_spill] sm:$0xff] %v7664_v25  ;;  %v7668_v42 = vpop.f32.mrf.mxu0  ;;  %4256 = vmatmul.mubr.bf16.gmra.mxu0 %v8395_v16  ;;  %v6381_v25 = vld [vmem:[%s6679_s10 + $0xb48] ss:$16 sps:$4 sm:$0xff]   ;;  %v6389_v16 = vld [vmem:[%s6679_s10 + $0xb2c] ss:$16 sps:$4 sm:$0xff]  }
 0x1d6   : > { %8394 = vst [vmem:[#allocation62_spill] sm:$0xff] %v7668_v42  ;;  %v7671_v62 = vpop.f32.mrf.mxu1  ;;  %4357 = vmatmul.mubr.bf16.gmra.mxu1 %v8397_v41  ;;  %4390 = vmatpush2.bf16.msra.mxu0 %v6372_v46  ;;  %v6386_v42 = vld [vmem:[%s6679_s10 + $0x92c] ss:$16 sps:$4 sm:$0xff]   ;;  %v6384_v41 = vld [vmem:[%s6679_s10 + $0x928] ss:$16 sps:$4 sm:$0xff]  }
 0x1d7   : > { %8396 = vst [vmem:[#allocation20_spill] sm:$0xff] %v7671_v62  ;;  %4491 = vmatpush2.bf16.msra.mxu1 %v6375_v13  ;;  %v7676_v55 = vpop.f32.mrf.mxu0  ;;  %4391 = vmatprep.subr.bf16.mxu0 %v6380_v30  ;;  %v8400_v40 = vld [vmem:[#allocation22_spill] sm:$0xff]  ;;  %v8401_v62 = vld [vmem:[#allocation23_spill] sm:$0xff] }
 0x1d8   : > { %8398 = vst [vmem:[#allocation21_spill] sm:$0xff] %v7676_v55  ;;  %v7678_v36 = vpop.f32.mrf.mxu1  ;;  %4492 = vmatprep.subr.bf16.mxu1 %v6383_v6  ;;  %4397 = vmatprep.mubr.bf16.mxu0 %v8400_v40  ;;  %v6387_v55 = vld [vmem:[%s6679_s10 + $0xb28] ss:$16 sps:$4 sm:$0xff]   ;;  %v6392_v6 = vld [vmem:[%s6679_s10 + $0x90c] ss:$16 sps:$4 sm:$0xff]  }
 0x1d9   : > { %8399 = vst [vmem:[#allocation63_spill] sm:$0xff] %v7678_v36  ;;  %4498 = vmatprep.mubr.bf16.mxu1 %v8401_v62  ;;  %v3655_v13 = vpop.f32.mrf.mxu0  ;;  %v6393_v40 = vld [vmem:[%s6679_s10 + $0xb08] ss:$16 sps:$4 sm:$0xff]   ;;  %v3592_v62 = vadd.f32 %v7500_v61, %v7358_v15  ;;  %v3598_v15 = vadd.f32 %v7522_v59, %v7374_v44 }
 0x1da   : > { %v3756_v46 = vpop.f32.mrf.mxu1  ;;  %4392 = vmatpush2.bf16.msra.mxu0 %v6378_v52  ;;  %v3594_v52 = vadd.f32 %v7508_v28, %v7364_v10  ;;  %v8403_v13 = vld [vmem:[#allocation25_spill] sm:$0xff]  ;;  %v8404_v10 = vld [vmem:[#allocation26_spill] sm:$0xff] }
 0x1db   : > { %4493 = vmatpush2.bf16.msra.mxu1 %v6381_v25  ;;  %4393 = vmatprep.subr.bf16.mxu0 %v6386_v42  ;;  %v3656_v30 = vpop.f32.mrf.mxu0  ;;  %v3693_v42 = vadd.f32 %v7502_v20, %v3592_v62  ;;  %v3596_v25 = vadd.f32 %v7516_v33, %v7368_v11  ;;  %v597_v20 = vld [vmem:[#allocation2 + $0xb0] sm:$0xff]  ;;  %v3602_v33 = vadd.f32 %v7528_v31, %v7378_v29 }
 0x1dc   : > { %4494 = vmatprep.subr.bf16.mxu1 %v6389_v16  ;;  %v3757_v36 = vpop.f32.mrf.mxu1 }
 0x1dd   : > { %v3697_v11 = vadd.f32 %v7518_v34, %v3596_v25  ;;  %v601_v34 = vld [vmem:[#allocation2 + $0x160] sm:$0xff]  ;;  %v3703_v29 = vadd.f32 %v7531_v43, %v3602_v33 }
 0x1de   : > { %4394 = vmatpush2.bf16.msra.mxu0 %v6384_v41 }
 0x1df   : > { %4495 = vmatpush2.bf16.msra.mxu1 %v6387_v55  ;;  %4395 = vmatprep.subr.bf16.mxu0 %v6392_v6  ;;  %v8402_v55 = vld [vmem:[#allocation24_spill] sm:$0xff] }
 0x1e0   : > { %4496 = vmatprep.subr.bf16.mxu1 %v6395_v38  ;;  %v3695_v38 = vadd.f32 %v7510_v45, %v3594_v52  ;;  %v3604_v45 = vadd.f32 %v7536_v17, %v7384_v37  ;;  %v598_v6 = vld [vmem:[#allocation2 + $0xd0] sm:$0xff] }
 0x1e2   : > { %4396 = vmatpush2.bf16.msra.mxu0 %v6390_v35  ;;  %v8405_v35 = vld [vmem:[#allocation27_spill] sm:$0xff]  ;;  %v3705_v17 = vadd.f32 %v7538_v39, %v3604_v45 }
 0x1e3   : > { %4497 = vmatpush2.bf16.msra.mxu1 %v6393_v40  ;;  %v3699_v40 = vadd.f32 %v7524_v7, %v3598_v15  ;;  %v3608_v7 = vadd.f32 %v7550_v48, %v7394_v0  ;;  %v8406_v15 = vld [vmem:[#allocation28_spill] sm:$0xff]  ;;  %v3612_v48 = vadd.f32 %v7556_v53, %v7398_v3 }
 0x1e4   : > { %v609_v53 = vld [vmem:[#allocation2 + $0x148] sm:$0xff] }
 0x1e5   : > { %v3793_v36 = vpop.f32.mrf.mxu0  ;;  %4398 = vmatmul.mubr.bf16.vlgmr.msra.gmra.mxu0 %v8402_v55 }
 0x1e6   : > { %v3894_v16 = vpop.f32.mrf.mxu1  ;;  %4499 = vmatmul.mubr.bf16.vlgmr.msra.gmra.mxu1 %v8403_v13  ;;  %v3794_v61 = vadd.f32 %v3793_v36, %v3693_v42  ;;  %4407 = vmatprep.mubr.bf16.mxu0 %v8404_v10  ;;  %v3606_v36 = vadd.f32 %v7544_v14, %v7388_v4  ;;  %v602_v13 = vld [vmem:[#allocation2 + $0x128] sm:$0xff] }
 0x1e7   : > { %4508 = vmatprep.mubr.bf16.mxu1 %v8405_v35  ;;  %v3795_v28 = vpop.f32.mrf.mxu0  ;;  %v8408_v35 = vld [vmem:[#allocation30_spill] sm:$0xff] }
 0x1e8   : > { %v3896_v46 = vpop.f32.mrf.mxu1  ;;  %v3895_v41 = vadd.f32 %v3894_v16, %v3794_v61  ;;  %v3796_v30 = vadd.f32 %v3795_v28, %v3695_v38  ;;  %v8407_v61 = vld [vmem:[#allocation29_spill] sm:$0xff]  ;;  %v3707_v39 = vadd.f32 %v7546_v21, %v3606_v36  ;;  %v3713_v36 = vadd.f32 %v7559_v54, %v3612_v48 }
 0x1e9   : > { %v3797_v44 = vpop.f32.mrf.mxu0 }
 0x1ea   : > { %v3898_v59 = vpop.f32.mrf.mxu1  ;;  %v4567_v62 = vadd.f32 %v3895_v41, %v597_v20  ;;  %v3897_v52 = vadd.f32 %v3896_v46, %v3796_v30  ;;  %v3798_v42 = vadd.f32 %v3797_v44, %v3697_v11  ;;  %v8409_v20 = vld [vmem:[#allocation31_spill] sm:$0xff]  ;;  %v3614_v30 = vadd.f32 %v7564_v51, %v7404_v57 }
 0x1eb   : > { %v3799_v25 = vpop.f32.mrf.mxu0  ;;  %v605_v46 = vld [vmem:[#allocation2 + $0x108] sm:$0xff] }
 0x1ec   : > { %v3900_v55 = vpop.f32.mrf.mxu1  ;;  %4619 = vst [vmem:[#allocation2 + $0xb0] sm:$0xff] %v4567_v62  ;;  %v4568_v31 = vadd.f32 %v3897_v52, %v598_v6  ;;  %v3899_v16 = vadd.f32 %v3898_v59, %v3798_v42  ;;  %v3800_v37 = vadd.f32 %v3799_v25, %v3699_v40  ;;  %v606_v6 = vld [vmem:[#allocation2 + $0x110] sm:$0xff]  ;;  %v3709_v59 = vadd.f32 %v7552_v58, %v3608_v7  ;;  %v8413_v7 = vld [vmem:[#allocation35_spill] sm:$0xff] }
 0x1ed   : > { %v3803_v38 = vpop.f32.mrf.mxu0  ;;  %4408 = vmatmul.mubr.bf16.gmra.mxu0 %v8406_v15  ;;  %v3616_v52 = vadd.f32 %v7572_v60, %v7408_v8  ;;  %v3715_v25 = vadd.f32 %v7566_v12, %v3614_v30  ;;  %v3618_v58 = vadd.f32 %v7578_v26, %v7414_v22  ;;  %v3622_v26 = vadd.f32 %v7584_v56, %v7418_v32  ;;  %v617_v56 = vld [vmem:[#allocation2 + $0xa0] sm:$0xff] }
 0x1ee   : > { %4509 = vmatmul.mubr.bf16.gmra.mxu1 %v8407_v61  ;;  %v3904_v4 = vpop.f32.mrf.mxu1  ;;  %4620 = vst [vmem:[#allocation2 + $0xd0] sm:$0xff] %v4568_v31  ;;  %v4571_v14 = vadd.f32 %v3899_v16, %v601_v34  ;;  %v3901_v10 = vadd.f32 %v3900_v55, %v3800_v37  ;;  %v3804_v43 = vadd.f32 %v3803_v38, %v3703_v29  ;;  %v610_v29 = vld [vmem:[#allocation2 + $0x100] sm:$0xff]  ;;  %v8410_v31 = vld [vmem:[#allocation32_spill] sm:$0xff]  ;;  %v8411_v16 = vld [vmem:[#allocation33_spill] sm:$0xff] }
 0x1ef   : > { %4417 = vmatprep.mubr.bf16.mxu0 %v8408_v35  ;;  %4518 = vmatprep.mubr.bf16.mxu1 %v8409_v20  ;;  %v3805_v28 = vpop.f32.mrf.mxu0  ;;  %v3717_v12 = vadd.f32 %v7574_v2, %v3616_v52  ;;  %v613_v38 = vld [vmem:[#allocation2 + $0x180] sm:$0xff]  ;;  %v3719_v20 = vadd.f32 %v7580_v27, %v3618_v58  ;;  %v3723_v48 = vadd.f32 %v7587_v5, %v3622_v26 }
 0x1f0   : > { %v3906_v0 = vpop.f32.mrf.mxu1  ;;  %4623 = vst [vmem:[#allocation2 + $0x160] sm:$0xff] %v4571_v14  ;;  %v4572_v11 = vadd.f32 %v3901_v10, %v602_v13  ;;  %v3806_v33 = vadd.f32 %v3805_v28, %v3705_v17  ;;  %v3905_v41 = vadd.f32 %v3904_v4, %v3804_v43  ;;  %v8412_v17 = vld [vmem:[#allocation34_spill] sm:$0xff]  ;;  %v3624_v14 = vadd.f32 %v7592_v9, %v7424_v18  ;;  %v614_v43 = vld [vmem:[#allocation2 + $0x130] sm:$0xff]  ;;  %v8425_v26 = vld [vmem:[#allocation51_spill] sm:$0xff] }
 0x1f1   : > { %v3807_v45 = vpop.f32.mrf.mxu0  ;;  %v3628_v27 = vadd.f32 %v7606_v19, %v7434_v47  ;;  %v618_v30 = vld [vmem:[#allocation2] sm:$0xff]  ;;  %v8416_v19 = vld [vmem:[#allocation48_spill] sm:$0xff] }
 0x1f2   : > { %v3908_v44 = vpop.f32.mrf.mxu1  ;;  %4624 = vst [vmem:[#allocation2 + $0x128] sm:$0xff] %v4572_v11  ;;  %v4575_v21 = vadd.f32 %v3905_v41, %v605_v46  ;;  %v3808_v40 = vadd.f32 %v3807_v45, %v3707_v39  ;;  %v3907_v62 = vadd.f32 %v3906_v0, %v3806_v33  ;;  %v3626_v46 = vadd.f32 %v7600_v23, %v7428_v1 }
 0x1f3   : > { %v3809_v3 = vpop.f32.mrf.mxu0  ;;  %v3725_v33 = vadd.f32 %v7594_v49, %v3624_v14  ;;  %v626_v14 = vld [vmem:[#allocation2 + $0x170] sm:$0xff] }
 0x1f4   : > { %v3910_v42 = vpop.f32.mrf.mxu1  ;;  %4627 = vst [vmem:[#allocation2 + $0x108] sm:$0xff] %v4575_v21  ;;  %v4576_v34 = vadd.f32 %v3907_v62, %v606_v6  ;;  %v3810_v57 = vadd.f32 %v3809_v3, %v3709_v59  ;;  %v3909_v51 = vadd.f32 %v3908_v44, %v3808_v40  ;;  %v8414_v6 = vld [vmem:[#allocation36_spill] sm:$0xff]  ;;  %v8415_v44 = vld [vmem:[#allocation37_spill] sm:$0xff]  ;;  %v3727_v49 = vadd.f32 %v7602_v50, %v3626_v46 }
 0x1f5   : > { %v3813_v55 = vpop.f32.mrf.mxu0  ;;  %4418 = vmatmul.mubr.bf16.gmra.mxu0 %v8410_v31  ;;  %v621_v21 = vld [vmem:[#allocation2 + $0xf0] sm:$0xff] }
 0x1f6   : > { %4519 = vmatmul.mubr.bf16.gmra.mxu1 %v8411_v16  ;;  %v3914_v8 = vpop.f32.mrf.mxu1  ;;  %4628 = vst [vmem:[#allocation2 + $0x110] sm:$0xff] %v4576_v34  ;;  %v4579_v60 = vadd.f32 %v3909_v51, %v609_v53  ;;  %v3814_v37 = vadd.f32 %v3813_v55, %v3713_v36  ;;  %v3911_v54 = vadd.f32 %v3910_v42, %v3810_v57  ;;  %v8417_v40 = vld [vmem:[#allocation8_spill] sm:$0xff]  ;;  %v8418_v3 = vld [vmem:[#allocation49_spill] sm:$0xff]  ;;  %v8419_v53 = vld [vmem:[#allocation10_spill] sm:$0xff] }
 0x1f7   : > { %4427 = vmatprep.mubr.bf16.mxu0 %v8412_v17  ;;  %4528 = vmatprep.mubr.bf16.mxu1 %v8413_v7  ;;  %v3815_v13 = vpop.f32.mrf.mxu0  ;;  %v3632_v62 = vadd.f32 %v8417_v40, %v8416_v19  ;;  %v3634_v42 = vadd.f32 %v8419_v53, %v8418_v3  ;;  %v622_v34 = vld [vmem:[#allocation2 + $0x188] sm:$0xff]  ;;  %v8430_v46 = vld [vmem:[#allocation41_spill] sm:$0xff]  ;;  %v8437_v40 = vld [vmem:[#allocation54_spill] sm:$0xff] }
 0x1f8   : > { %v3916_v22 = vpop.f32.mrf.mxu1  ;;  %4631 = vst [vmem:[#allocation2 + $0x148] sm:$0xff] %v4579_v60  ;;  %v4580_v15 = vadd.f32 %v3911_v54, %v610_v29  ;;  %v3816_v61 = vadd.f32 %v3815_v13, %v3715_v25  ;;  %v3915_v4 = vadd.f32 %v3914_v8, %v3814_v37  ;;  %v8420_v51 = vld [vmem:[#allocation7_spill] sm:$0xff]  ;;  %v8421_v29 = vld [vmem:[#allocation50_spill] sm:$0xff]  ;;  %v8422_v31 = vld [vmem:[#allocation12_spill] sm:$0xff] }
 0x1f9   : > { %v3817_v10 = vpop.f32.mrf.mxu0  ;;  %v3729_v25 = vadd.f32 %v8420_v51, %v3628_v27  ;;  %v3636_v16 = vadd.f32 %v8422_v31, %v8421_v29  ;;  %v625_v60 = vld [vmem:[#allocation2 + $0xb8] sm:$0xff]  ;;  %v8439_v53 = vld [vmem:[#allocation16_spill] sm:$0xff]  ;;  %v8440_v51 = vld [vmem:[#allocation59_spill] sm:$0xff] }
 0x1fa   : > { %v3918_v35 = vpop.f32.mrf.mxu1  ;;  %4632 = vst [vmem:[#allocation2 + $0x100] sm:$0xff] %v4580_v15  ;;  %v4583_v2 = vadd.f32 %v3915_v4, %v613_v38  ;;  %v3818_v39 = vadd.f32 %v3817_v10, %v3717_v12  ;;  %v3917_v28 = vadd.f32 %v3916_v22, %v3816_v61  ;;  %v8423_v54 = vld [vmem:[#allocation9_spill] sm:$0xff]  ;;  %v8424_v38 = vld [vmem:[#allocation11_spill] sm:$0xff]  ;;  %v8426_v15 = vld [vmem:[#allocation14_spill] sm:$0xff] }
 0x1fb   : > { %v3819_v32 = vpop.f32.mrf.mxu0  ;;  %v3733_v17 = vadd.f32 %v8423_v54, %v3632_v62  ;;  %v3735_v22 = vadd.f32 %v8424_v38, %v3634_v42  ;;  %v3638_v61 = vadd.f32 %v8426_v15, %v8425_v26  ;;  %v8427_v10 = vld [vmem:[#allocation38_spill] sm:$0xff] }
 0x1fc   : > { %v3920_v0 = vpop.f32.mrf.mxu1  ;;  %4635 = vst [vmem:[#allocation2 + $0x180] sm:$0xff] %v4583_v2  ;;  %v4584_v11 = vadd.f32 %v3917_v28, %v614_v43  ;;  %v3820_v18 = vadd.f32 %v3819_v32, %v3719_v20  ;;  %v3919_v9 = vadd.f32 %v3918_v35, %v3818_v39  ;;  %v8428_v43 = vld [vmem:[#allocation39_spill] sm:$0xff]  ;;  %v8429_v28 = vld [vmem:[#allocation40_spill] sm:$0xff]  ;;  %v8431_v32 = vld [vmem:[#allocation13_spill] sm:$0xff] }
 0x1fd   : > { %v3823_v41 = vpop.f32.mrf.mxu0  ;;  %4428 = vmatmul.mubr.bf16.gmra.mxu0 %v7257_v24  ;;  %v8438_v62 = vld [vmem:[#allocation18_spill] sm:$0xff] }
 0x1fe   : > { %4529 = vmatmul.mubr.bf16.gmra.mxu1 %v7260_v63  ;;  %v3924_v1 = vpop.f32.mrf.mxu1  ;;  %4636 = vst [vmem:[#allocation2 + $0x130] sm:$0xff] %v4584_v11  ;;  %v4587_v23 = vadd.f32 %v3919_v9, %v617_v56  ;;  %v3824_v45 = vadd.f32 %v3823_v41, %v3723_v48  ;;  %v3921_v5 = vadd.f32 %v3920_v0, %v3820_v18  ;;  %v629_v48 = vld [vmem:[#allocation2 + $0x50] sm:$0xff]  ;;  %v8433_v9 = vld [vmem:[#allocation58_spill] sm:$0xff] }
 0x1ff   : > { %4437 = vmatprep.mubr.bf16.mxu0 %v8414_v6  ;;  %4538 = vmatprep.mubr.bf16.mxu1 %v8415_v44  ;;  %v3825_v59 = vpop.f32.mrf.mxu0  ;;  %v3737_v56 = vadd.f32 %v8431_v32, %v3636_v16  ;;  %v8432_v18 = vld [vmem:[#allocation52_spill] sm:$0xff]  ;;  %v634_v31 = vld [vmem:[#allocation2 + $0x18] sm:$0xff] }
 0x200   : > { %v3926_v47 = vpop.f32.mrf.mxu1  ;;  %4639 = vst [vmem:[#allocation2 + $0xa0] sm:$0xff] %v4587_v23  ;;  %v4588_v24 = vadd.f32 %v3921_v5, %v618_v30  ;;  %v3826_v63 = vadd.f32 %v3825_v59, %v3725_v33  ;;  %v3925_v52 = vadd.f32 %v3924_v1, %v3824_v45  ;;  %v3642_v33 = vadd.f32 %v8433_v9, %v8432_v18  ;;  %v8434_v1 = vld [vmem:[#allocation53_spill] sm:$0xff]  ;;  %v630_v6 = vld [vmem:[#allocation2 + $0x168] sm:$0xff]  ;;  %v8443_v16 = vld [vmem:[#allocation42_spill] sm:$0xff] }
 0x201   : > { %v3827_v36 = vpop.f32.mrf.mxu0  ;;  %v8435_v23 = vld [vmem:[#allocation17_spill] sm:$0xff] }
 0x202   : > { %v3928_v57 = vpop.f32.mrf.mxu1  ;;  %4640 = vst [vmem:[#allocation2] sm:$0xff] %v4588_v24  ;;  %v4591_v50 = vadd.f32 %v3925_v52, %v621_v21  ;;  %v3828_v58 = vadd.f32 %v3827_v36, %v3727_v49  ;;  %v3927_v55 = vadd.f32 %v3926_v47, %v3826_v63  ;;  %v3644_v45 = vadd.f32 %v8435_v23, %v8434_v1  ;;  %v8436_v49 = vld [vmem:[#allocation15_spill] sm:$0xff]  ;;  %v637_v26 = vld [vmem:[#allocation2 + $0x198] sm:$0xff] }
 0x203   : > { %v3829_v8 = vpop.f32.mrf.mxu0  ;;  %v3739_v59 = vadd.f32 %v8436_v49, %v3638_v61  ;;  %v3646_v24 = vadd.f32 %v8438_v62, %v8437_v40  ;;  %v633_v52 = vld [vmem:[#allocation2 + $0x60] sm:$0xff]  ;;  %v3743_v42 = vadd.f32 %v8439_v53, %v3642_v33  ;;  %v8448_v61 = vld [vmem:[#allocation56_spill] sm:$0xff]  ;;  %v8451_v32 = vld [vmem:[#allocation57_spill] sm:$0xff] }
 0x204   : > { %v3930_v37 = vpop.f32.mrf.mxu1  ;;  %4643 = vst [vmem:[#allocation2 + $0xf0] sm:$0xff] %v4591_v50  ;;  %v4592_v7 = vadd.f32 %v3927_v55, %v622_v34  ;;  %v3830_v12 = vadd.f32 %v3829_v8, %v3729_v25  ;;  %v3929_v13 = vadd.f32 %v3928_v57, %v3828_v58  ;;  %v3745_v25 = vadd.f32 %v8440_v51, %v3644_v45  ;;  %v8441_v50 = vld [vmem:[#allocation55_spill] sm:$0xff]  ;;  %v8442_v58 = vld [vmem:[#allocation60_spill] sm:$0xff]  ;;  %v641_v33 = vld [vmem:[#allocation2 + $0xf8] sm:$0xff] }
 0x205   : > { %v3833_v4 = vpop.f32.mrf.mxu0  ;;  %4438 = vmatmul.mubr.bf16.gmra.mxu0 %v8427_v10  ;;  %v3648_v55 = vadd.f32 %v8442_v58, %v8441_v50  ;;  %v8444_v8 = vld [vmem:[#allocation43_spill] sm:$0xff] }
 0x206   : > { %4539 = vmatmul.mubr.bf16.gmra.mxu1 %v8428_v43  ;;  %v3934_v35 = vpop.f32.mrf.mxu1  ;;  %4644 = vst [vmem:[#allocation2 + $0x188] sm:$0xff] %v4592_v7  ;;  %v4595_v20 = vadd.f32 %v3929_v13, %v625_v60  ;;  %v3834_v2 = vadd.f32 %v3833_v4, %v3733_v17  ;;  %v3931_v39 = vadd.f32 %v3930_v37, %v3830_v12  ;;  %v8445_v7 = vld [vmem:[#allocation44_spill] sm:$0xff]  ;;  %v8446_v12 = vld [vmem:[#allocation45_spill] sm:$0xff]  ;;  %v8447_v13 = vld [vmem:[#allocation19_spill] sm:$0xff] }
 0x207   : > { %4447 = vmatprep.mubr.bf16.mxu0 %v8429_v28  ;;  %4548 = vmatprep.mubr.bf16.mxu1 %v8430_v46  ;;  %v3835_v0 = vpop.f32.mrf.mxu0  ;;  %v3747_v38 = vadd.f32 %v8447_v13, %v3646_v24  ;;  %v8449_v4 = vld [vmem:[#allocation62_spill] sm:$0xff]  ;;  %v638_v28 = vld [vmem:[#allocation2 + $0x68] sm:$0xff] }
 0x208   : > { %v3936_v11 = vpop.f32.mrf.mxu1  ;;  %4647 = vst [vmem:[#allocation2 + $0xb8] sm:$0xff] %v4595_v20  ;;  %v4596_v27 = vadd.f32 %v3931_v39, %v626_v14  ;;  %v3836_v41 = vadd.f32 %v3835_v0, %v3735_v22  ;;  %v3935_v30 = vadd.f32 %v3934_v35, %v3834_v2  ;;  %v3652_v14 = vadd.f32 %v8449_v4, %v8448_v61  ;;  %v8450_v20 = vld [vmem:[#allocation61_spill] sm:$0xff]  ;;  %v8455_v49 = vld [vmem:[#allocation47_spill] sm:$0xff] }
 0x209   : > { %v3837_v5 = vpop.f32.mrf.mxu0  ;;  %v3749_v2 = vadd.f32 %v8450_v20, %v3648_v55 }
 0x20a   : > { %v3938_v44 = vpop.f32.mrf.mxu1  ;;  %4648 = vst [vmem:[#allocation2 + $0x170] sm:$0xff] %v4596_v27  ;;  %v4599_v21 = vadd.f32 %v3935_v30, %v629_v48  ;;  %v3838_v47 = vadd.f32 %v3837_v5, %v3737_v56  ;;  %v3937_v19 = vadd.f32 %v3936_v11, %v3836_v41  ;;  %v8452_v56 = vld [vmem:[#allocation21_spill] sm:$0xff]  ;;  %v8453_v41 = vld [vmem:[#allocation20_spill] sm:$0xff] }
 0x20b   : > { %v3839_v63 = vpop.f32.mrf.mxu0  ;;  %v3654_v0 = vadd.f32 %v8452_v56, %v8451_v32  ;;  %v3753_v30 = vadd.f32 %v8453_v41, %v3652_v14 }
 0x20c   : > { %v3940_v3 = vpop.f32.mrf.mxu1  ;;  %4651 = vst [vmem:[#allocation2 + $0x50] sm:$0xff] %v4599_v21  ;;  %v4600_v36 = vadd.f32 %v3937_v19, %v630_v6  ;;  %v3840_v34 = vadd.f32 %v3839_v63, %v3739_v59  ;;  %v3939_v57 = vadd.f32 %v3938_v44, %v3838_v47  ;;  %v642_v6 = vld [vmem:[#allocation2 + $0x28] sm:$0xff]  ;;  %v8454_v44 = vld [vmem:[#allocation46_spill] sm:$0xff]  ;;  %v645_v63 = vld [vmem:[#allocation2 + $0x98] sm:$0x3] }
 0x20d   : > { %v3843_v29 = vpop.f32.mrf.mxu0  ;;  %4448 = vmatmul.mubr.bf16.gmra.mxu0 %v8443_v16  ;;  %v8456_v21 = vld [vmem:[#allocation63_spill] sm:$0xff] }
 0x20e   : > { %4549 = vmatmul.mubr.bf16.gmra.mxu1 %v8444_v8  ;;  %v3944_v60 = vpop.f32.mrf.mxu1  ;;  %4652 = vst [vmem:[#allocation2 + $0x168] sm:$0xff] %v4600_v36  ;;  %v4603_v37 = vadd.f32 %v3939_v57, %v633_v52  ;;  %v3844_v54 = vadd.f32 %v3843_v29, %v3743_v42  ;;  %v3941_v17 = vadd.f32 %v3940_v3, %v3840_v34  ;;  %v646_v36 = vld [vmem:[#allocation2 + $0x150] sm:$0x3] }
 0x20f   : > { %4457 = vmatprep.mubr.bf16.mxu0 %v8445_v7  ;;  %4558 = vmatprep.mubr.bf16.mxu1 %v8446_v12  ;;  %v3845_v22 = vpop.f32.mrf.mxu0  ;;  %v3755_v47 = vadd.f32 %v8456_v21, %v3654_v0 }
 0x210   : > { %v3946_v15 = vpop.f32.mrf.mxu1  ;;  %4655 = vst [vmem:[#allocation2 + $0x60] sm:$0xff] %v4603_v37  ;;  %v4604_v10 = vadd.f32 %v3941_v17, %v634_v31  ;;  %v3846_v43 = vadd.f32 %v3845_v22, %v3745_v25  ;;  %v3945_v35 = vadd.f32 %v3944_v60, %v3844_v54 }
 0x211   : > { %v3847_v39 = vpop.f32.mrf.mxu0 }
 0x212   : > { %v3948_v46 = vpop.f32.mrf.mxu1  ;;  %4656 = vst [vmem:[#allocation2 + $0x18] sm:$0xff] %v4604_v10  ;;  %v4607_v48 = vadd.f32 %v3945_v35, %v637_v26  ;;  %v3848_v11 = vadd.f32 %v3847_v39, %v3747_v38  ;;  %v3947_v18 = vadd.f32 %v3946_v15, %v3846_v43 }
 0x213   : > { %v3849_v9 = vpop.f32.mrf.mxu0 }
 0x214   : > { %v3950_v27 = vpop.f32.mrf.mxu1  ;;  %4659 = vst [vmem:[#allocation2 + $0x198] sm:$0xff] %v4607_v48  ;;  %v4608_v1 = vadd.f32 %v3947_v18, %v638_v28  ;;  %v3850_v23 = vadd.f32 %v3849_v9, %v3749_v2  ;;  %v3949_v45 = vadd.f32 %v3948_v46, %v3848_v11 }
 0x215   : > { %v3853_v5 = vpop.f32.mrf.mxu0  ;;  %4458 = vmatmul.mubr.bf16.gmra.mxu0 %v8454_v44 }
 0x216   : > { %4559 = vmatmul.mubr.bf16.gmra.mxu1 %v8455_v49  ;;  %v3954_v59 = vpop.f32.mrf.mxu1  ;;  %4660 = vst [vmem:[#allocation2 + $0x68] sm:$0xff] %v4608_v1  ;;  %v4611_v19 = vadd.f32 %v3949_v45, %v641_v33  ;;  %v3854_v40 = vadd.f32 %v3853_v5, %v3753_v30  ;;  %v3951_v62 = vadd.f32 %v3950_v27, %v3850_v23 }
 0x217   : > { %v3855_v24 = vpop.f32.mrf.mxu0 }
 0x218   : > { %v3956_v52 = vpop.f32.mrf.mxu1  ;;  %4663 = vst [vmem:[#allocation2 + $0xf8] sm:$0xff] %v4611_v19  ;;  %v4612_v3 = vadd.f32 %v3951_v62, %v642_v6  ;;  %v3856_v53 = vadd.f32 %v3855_v24, %v3755_v47  ;;  %v3955_v42 = vadd.f32 %v3954_v59, %v3854_v40 }
 0x219   : > { %v3857_v34 = vpop.f32.mrf.mxu0 }
 0x21a   : > { %v3958_v57 = vpop.f32.mrf.mxu1  ;;  %4664 = vst [vmem:[#allocation2 + $0x28] sm:$0xff] %v4612_v3  ;;  %v4615_v51 = vadd.f32 %v3955_v42, %v645_v63  ;;  %v3957_v25 = vadd.f32 %v3956_v52, %v3856_v53 }
 0x21b   : > { %v3858_v50 = vpop.f32.mrf.mxu0 }
 0x21c   : > { %v3959_v58 = vpop.f32.mrf.mxu1  ;;  %4667 = vst [vmem:[#allocation2 + $0x98] sm:$0x3] %v4615_v51  ;;  %v4616_v55 = vadd.f32 %v3957_v25, %v646_v36 }
 0x21e   : > { %4668 = vst [vmem:[#allocation2 + $0x150] sm:$0x3] %v4616_v55 }
 0x225   : > { %v3995_v29 = vpop.f32.mrf.mxu0 }
 0x226   : > { %v4096_v31 = vpop.f32.mrf.mxu1 }
 0x227   : > { %v7794_v16 = vadd.f32 %v4096_v31, %v3995_v29  ;;  %v3997_v8 = vpop.f32.mrf.mxu0 }
 0x228   : > { %v4098_v60 = vpop.f32.mrf.mxu1 }
 0x229   : > { %v7796_v37 = vadd.f32 %v4098_v60, %v3997_v8  ;;  %v3999_v54 = vpop.f32.mrf.mxu0 }
 0x22a   : > { %v4100_v17 = vpop.f32.mrf.mxu1 }
 0x22b   : > { %v7798_v7 = vadd.f32 %v4100_v17, %v3999_v54  ;;  %v4001_v12 = vpop.f32.mrf.mxu0 }
 0x22c   : > { %v4102_v13 = vpop.f32.mrf.mxu1 }
 0x22d   : > { %v7800_v38 = vadd.f32 %v4102_v13, %v4001_v12  ;;  %v4005_v22 = vpop.f32.mrf.mxu0 }
 0x22e   : > { %v4106_v26 = vpop.f32.mrf.mxu1 }
 0x22f   : > { %v7802_v15 = vadd.f32 %v4106_v26, %v4005_v22  ;;  %v4007_v61 = vpop.f32.mrf.mxu0 }
 0x230   : > { %v4108_v4 = vpop.f32.mrf.mxu1 }
 0x231   : > { %v7804_v14 = vadd.f32 %v4108_v4, %v4007_v61  ;;  %v4009_v10 = vpop.f32.mrf.mxu0 }
 0x232   : > { %v4110_v43 = vpop.f32.mrf.mxu1 }
 0x233   : > { %v7806_v35 = vadd.f32 %v4110_v43, %v4009_v10  ;;  %v4011_v20 = vpop.f32.mrf.mxu0 }
 0x234   : > { %v4112_v2 = vpop.f32.mrf.mxu1 }
 0x235   : > { %v7808_v39 = vadd.f32 %v4112_v2, %v4011_v20  ;;  %v4015_v28 = vpop.f32.mrf.mxu0 }
 0x236   : > { %v4116_v46 = vpop.f32.mrf.mxu1 }
 0x237   : > { %v7810_v32 = vadd.f32 %v4116_v46, %v4015_v28  ;;  %v4017_v56 = vpop.f32.mrf.mxu0 }
 0x238   : > { %v4118_v0 = vpop.f32.mrf.mxu1 }
 0x239   : > { %v7812_v48 = vadd.f32 %v4118_v0, %v4017_v56  ;;  %v4019_v11 = vpop.f32.mrf.mxu0 }
 0x23a   : > { %v4120_v18 = vpop.f32.mrf.mxu1 }
 0x23b   : > { %v7814_v9 = vadd.f32 %v4120_v18, %v4019_v11  ;;  %v4021_v33 = vpop.f32.mrf.mxu0 }
 0x23c   : > { %v4122_v27 = vpop.f32.mrf.mxu1 }
 0x23d   : > { %v7816_v41 = vadd.f32 %v4122_v27, %v4021_v33  ;;  %v4025_v30 = vpop.f32.mrf.mxu0 }
 0x23e   : > { %v4126_v1 = vpop.f32.mrf.mxu1 }
 0x23f   : > { %v7818_v23 = vadd.f32 %v4126_v1, %v4025_v30  ;;  %v4027_v45 = vpop.f32.mrf.mxu0 }
 0x240   : > { %v4128_v5 = vpop.f32.mrf.mxu1 }
 0x241   : > { %v7820_v6 = vadd.f32 %v4128_v5, %v4027_v45  ;;  %v4029_v44 = vpop.f32.mrf.mxu0 }
 0x242   : > { %v4130_v49 = vpop.f32.mrf.mxu1 }
 0x243   : > { %v7822_v59 = vadd.f32 %v4130_v49, %v4029_v44  ;;  %v4031_v21 = vpop.f32.mrf.mxu0 }
 0x244   : > { %v4132_v47 = vpop.f32.mrf.mxu1 }
 0x245   : > { %v7824_v19 = vadd.f32 %v4132_v47, %v4031_v21  ;;  %v4035_v40 = vpop.f32.mrf.mxu0 }
 0x246   : > { %v4136_v62 = vpop.f32.mrf.mxu1 }
 0x247   : > { %v7826_v24 = vadd.f32 %v4136_v62, %v4035_v40  ;;  %v4037_v63 = vpop.f32.mrf.mxu0 }
 0x248   : > { %v4138_v52 = vpop.f32.mrf.mxu1 }
 0x249   : > { %v7828_v3 = vadd.f32 %v4138_v52, %v4037_v63  ;;  %v4039_v53 = vpop.f32.mrf.mxu0 }
 0x24a   : > { %v4140_v42 = vpop.f32.mrf.mxu1 }
 0x24b   : > { %8457 = vst [vmem:[#allocation22_spill] sm:$0xff] %v7828_v3  ;;  %v7830_v36 = vadd.f32 %v4140_v42, %v4039_v53  ;;  %v4041_v34 = vpop.f32.mrf.mxu0 }
 0x24c   : > { %v4142_v57 = vpop.f32.mrf.mxu1 }
 0x24d   : > { %8458 = vst [vmem:[#allocation23_spill] sm:$0xff] %v7830_v36  ;;  %v7832_v51 = vadd.f32 %v4142_v57, %v4041_v34  ;;  %v4045_v25 = vpop.f32.mrf.mxu0 }
 0x24e   : > { %v4146_v50 = vpop.f32.mrf.mxu1 }
 0x24f   : > { %8459 = vst [vmem:[#allocation24_spill] sm:$0xff] %v7832_v51  ;;  %v7834_v58 = vadd.f32 %v4146_v50, %v4045_v25  ;;  %v4047_v55 = vpop.f32.mrf.mxu0 }
 0x250   : > { %v4148_v29 = vpop.f32.mrf.mxu1 }
 0x251   : > { %8460 = vst [vmem:[#allocation25_spill] sm:$0xff] %v7834_v58  ;;  %v7836_v31 = vadd.f32 %v4148_v29, %v4047_v55  ;;  %v4049_v8 = vpop.f32.mrf.mxu0 }
 0x252   : > { %v4150_v60 = vpop.f32.mrf.mxu1 }
 0x253   : > { %8461 = vst [vmem:[#allocation26_spill] sm:$0xff] %v7836_v31  ;;  %v7838_v54 = vadd.f32 %v4150_v60, %v4049_v8  ;;  %v4051_v17 = vpop.f32.mrf.mxu0 }
 0x254   : > { %v4152_v12 = vpop.f32.mrf.mxu1 }
 0x255   : > { %8462 = vst [vmem:[#allocation27_spill] sm:$0xff] %v7838_v54  ;;  %v7840_v13 = vadd.f32 %v4152_v12, %v4051_v17  ;;  %v4055_v22 = vpop.f32.mrf.mxu0 }
 0x256   : > { %v4156_v26 = vpop.f32.mrf.mxu1 }
 0x257   : > { %8463 = vst [vmem:[#allocation28_spill] sm:$0xff] %v7840_v13  ;;  %v7842_v61 = vadd.f32 %v4156_v26, %v4055_v22  ;;  %v4057_v4 = vpop.f32.mrf.mxu0 }
 0x258   : > { %v4158_v10 = vpop.f32.mrf.mxu1 }
 0x259   : > { %8464 = vst [vmem:[#allocation29_spill] sm:$0xff] %v7842_v61  ;;  %v7844_v43 = vadd.f32 %v4158_v10, %v4057_v4  ;;  %v4059_v20 = vpop.f32.mrf.mxu0 }
 0x25a   : > { %v4160_v2 = vpop.f32.mrf.mxu1 }
 0x25b   : > { %8465 = vst [vmem:[#allocation30_spill] sm:$0xff] %v7844_v43  ;;  %v4060_v28 = vpop.f32.mrf.mxu0 }
 0x25c   : > { %v4161_v46 = vpop.f32.mrf.mxu1 }
 0x265   : > { %v4197_v56 = vpop.f32.mrf.mxu0 }
 0x266   : > { %v4298_v0 = vpop.f32.mrf.mxu1 }
 0x267   : > { %v4199_v11 = vpop.f32.mrf.mxu0 }
 0x268   : > { %v4300_v18 = vpop.f32.mrf.mxu1 }
 0x269   : > { %v4201_v33 = vpop.f32.mrf.mxu0 }
 0x26a   : > { %v7846_v27 = vpop.f32.mrf.mxu1 }
 0x26b   : > { %v4203_v30 = vpop.f32.mrf.mxu0 }
 0x26c   : > { %v7848_v1 = vpop.f32.mrf.mxu1 }
 0x26d   : > { %v4207_v45 = vpop.f32.mrf.mxu0 }
 0x26e   : > { %v7850_v5 = vpop.f32.mrf.mxu1 }
 0x26f   : > { %v7852_v44 = vpop.f32.mrf.mxu0 }
 0x270   : > { %v7854_v49 = vpop.f32.mrf.mxu1 }
 0x271   : > { %v7856_v21 = vpop.f32.mrf.mxu0 }
 0x272   : > { %v7858_v47 = vpop.f32.mrf.mxu1 }
 0x273   : > { %v7860_v40 = vpop.f32.mrf.mxu0 }
 0x274   : > { %v7862_v62 = vpop.f32.mrf.mxu1 }
 0x275   : > { %v7864_v63 = vpop.f32.mrf.mxu0 }
 0x276   : > { %v7866_v52 = vpop.f32.mrf.mxu1 }
 0x277   : > { %v7868_v53 = vpop.f32.mrf.mxu0 }
 0x278   : > { %v7870_v42 = vpop.f32.mrf.mxu1 }
 0x279   : > { %v7872_v34 = vpop.f32.mrf.mxu0 }
 0x27a   : > { %v7874_v57 = vpop.f32.mrf.mxu1 }
 0x27b   : > { %v7876_v25 = vpop.f32.mrf.mxu0 }
 0x27c   : > { %v7878_v50 = vpop.f32.mrf.mxu1 }
 0x27d   : > { %v7880_v55 = vpop.f32.mrf.mxu0 }
 0x27e   : > { %v7882_v29 = vpop.f32.mrf.mxu1 }
 0x27f   : > { %v7884_v8 = vpop.f32.mrf.mxu0 }
 0x280   : > { %v7886_v60 = vpop.f32.mrf.mxu1 }
 0x281   : > { %v7888_v17 = vpop.f32.mrf.mxu0 }
 0x282   : > { %v7890_v12 = vpop.f32.mrf.mxu1 }
 0x283   : > { %v7892_v22 = vpop.f32.mrf.mxu0 }
 0x284   : > { %v7894_v26 = vpop.f32.mrf.mxu1 }
 0x285   : > { %8466 = vst [vmem:[#allocation31_spill] sm:$0xff] %v7894_v26  ;;  %v7896_v4 = vpop.f32.mrf.mxu0 }
 0x286   : > { %8467 = vst [vmem:[#allocation32_spill] sm:$0xff] %v7896_v4  ;;  %v7898_v10 = vpop.f32.mrf.mxu1 }
 0x287   : > { %8468 = vst [vmem:[#allocation33_spill] sm:$0xff] %v7898_v10  ;;  %v7900_v20 = vpop.f32.mrf.mxu0 }
 0x288   : > { %8469 = vst [vmem:[#allocation34_spill] sm:$0xff] %v7900_v20  ;;  %v7902_v2 = vpop.f32.mrf.mxu1 }
 0x289   : > { %8470 = vst [vmem:[#allocation35_spill] sm:$0xff] %v7902_v2  ;;  %v7904_v28 = vpop.f32.mrf.mxu0 }
 0x28a   : > { %8471 = vst [vmem:[#allocation36_spill] sm:$0xff] %v7904_v28  ;;  %v7906_v46 = vpop.f32.mrf.mxu1 }
 0x28b   : > { %8472 = vst [vmem:[#allocation37_spill] sm:$0xff] %v7906_v46  ;;  %v7908_v43 = vpop.f32.mrf.mxu0 }
 0x28c   : > { %8473 = vst [vmem:[#allocation48_spill] sm:$0xff] %v7908_v43  ;;  %v7910_v61 = vpop.f32.mrf.mxu1 }
 0x28d   : > { %8474 = vst [vmem:[#allocation8_spill] sm:$0xff] %v7910_v61  ;;  %v7912_v13 = vpop.f32.mrf.mxu0 }
 0x28e   : > { %8475 = vst [vmem:[#allocation49_spill] sm:$0xff] %v7912_v13  ;;  %v7914_v54 = vpop.f32.mrf.mxu1 }
 0x28f   : > { %8476 = vst [vmem:[#allocation10_spill] sm:$0xff] %v7914_v54  ;;  %v7916_v31 = vpop.f32.mrf.mxu0 }
 0x290   : > { %8477 = vst [vmem:[#allocation7_spill] sm:$0xff] %v7916_v31  ;;  %v7918_v58 = vpop.f32.mrf.mxu1 }
 0x291   : > { %8478 = vst [vmem:[#allocation50_spill] sm:$0xff] %v7918_v58  ;;  %v7920_v51 = vpop.f32.mrf.mxu0 }
 0x292   : > { %8479 = vst [vmem:[#allocation12_spill] sm:$0xff] %v7920_v51  ;;  %v7922_v10 = vpop.f32.mrf.mxu1  ;;  %v4198_v51 = vadd.f32 %v4197_v56, %v7794_v16 }
 0x293   : > { %8480 = vst [vmem:[#allocation9_spill] sm:$0xff] %v7922_v10  ;;  %v7924_v2 = vpop.f32.mrf.mxu0  ;;  %v4200_v10 = vadd.f32 %v4199_v11, %v7796_v37 }
 0x294   : > { %8481 = vst [vmem:[#allocation11_spill] sm:$0xff] %v7924_v2  ;;  %v7926_v28 = vpop.f32.mrf.mxu1  ;;  %v4299_v20 = vadd.f32 %v4298_v0, %v4198_v51  ;;  %v4202_v2 = vadd.f32 %v4201_v33, %v7798_v7  ;;  %v600_v51 = vld [vmem:[#allocation2 + $0x48] sm:$0xff]  ;;  %v603_v33 = vld [vmem:[#allocation2 + $0x40] sm:$0xff] }
 0x295   : > { %8482 = vst [vmem:[#allocation51_spill] sm:$0xff] %v7926_v28  ;;  %v7928_v46 = vpop.f32.mrf.mxu0  ;;  %v4204_v28 = vadd.f32 %v4203_v30, %v7800_v38  ;;  %v4210_v38 = vadd.f32 %v7852_v44, %v7804_v14 }
 0x296   : > { %8483 = vst [vmem:[#allocation14_spill] sm:$0xff] %v7928_v46  ;;  %v7930_v43 = vpop.f32.mrf.mxu1 }
 0x297   : > { %8484 = vst [vmem:[#allocation38_spill] sm:$0xff] %v7930_v43  ;;  %v7932_v61 = vpop.f32.mrf.mxu0  ;;  %v4301_v43 = vadd.f32 %v4300_v18, %v4200_v10  ;;  %v4305_v37 = vadd.f32 %v7848_v1, %v4204_v28  ;;  %v4212_v18 = vadd.f32 %v7856_v21, %v7806_v35  ;;  %v607_v10 = vld [vmem:[#allocation2 + $0x90] sm:$0xff] }
 0x298   : > { %8485 = vst [vmem:[#allocation39_spill] sm:$0xff] %v7932_v61  ;;  %v7934_v13 = vpop.f32.mrf.mxu1  ;;  %v599_v61 = vld [vmem:[#allocation2 + $0x10] sm:$0xff] }
 0x299   : > { %8486 = vst [vmem:[#allocation40_spill] sm:$0xff] %v7934_v13  ;;  %v4261_v54 = vpop.f32.mrf.mxu0 }
 0x29a   : > { %v4362_v31 = vpop.f32.mrf.mxu1 }
 0x29b   : > { %v4262_v36 = vpop.f32.mrf.mxu0  ;;  %v4303_v31 = vadd.f32 %v7846_v27, %v4202_v2  ;;  %v4218_v2 = vadd.f32 %v7864_v63, %v7810_v32  ;;  %v611_v32 = vld [vmem:[#allocation2 + $0x58] sm:$0xff] }
 0x29c   : > { %v4363_v58 = vpop.f32.mrf.mxu1  ;;  %v4208_v36 = vadd.f32 %v4207_v45, %v7802_v15  ;;  %v4214_v45 = vadd.f32 %v7860_v40, %v7808_v39 }
 0x29e   : > { %v4309_v15 = vadd.f32 %v7850_v5, %v4208_v36 }
 0x2a5   : > { %v4399_v46 = vpop.f32.mrf.mxu0 }
 0x2a6   : > { %v4500_v3 = vpop.f32.mrf.mxu1  ;;  %v4400_v26 = vadd.f32 %v4399_v46, %v4299_v20  ;;  %v4315_v46 = vadd.f32 %v7862_v62, %v4214_v45  ;;  %v616_v45 = vld [vmem:[#allocation2 + $0x78] sm:$0xff] }
 0x2a7   : > { %v4401_v4 = vpop.f32.mrf.mxu0 }
 0x2a8   : > { %v4502_v13 = vpop.f32.mrf.mxu1  ;;  %v4501_v58 = vadd.f32 %v4500_v3, %v4400_v26  ;;  %v4402_v16 = vadd.f32 %v4401_v4, %v4301_v43  ;;  %v604_v26 = vld [vmem:[#allocation2 + $0x178] sm:$0xff]  ;;  %v4313_v4 = vadd.f32 %v7858_v47, %v4212_v18 }
 0x2a9   : > { %v4403_v54 = vpop.f32.mrf.mxu0 }
 0x2aa   : > { %v4504_v7 = vpop.f32.mrf.mxu1  ;;  %v4569_v56 = vadd.f32 %v4501_v58, %v599_v61  ;;  %v4503_v0 = vadd.f32 %v4502_v13, %v4402_v16  ;;  %v4404_v11 = vadd.f32 %v4403_v54, %v4303_v31  ;;  %v4311_v13 = vadd.f32 %v7854_v49, %v4210_v38  ;;  %v608_v31 = vld [vmem:[#allocation2 + $0x118] sm:$0xff] }
 0x2ab   : > { %v4405_v27 = vpop.f32.mrf.mxu0  ;;  %v4220_v58 = vadd.f32 %v7868_v53, %v7812_v48  ;;  %v612_v48 = vld [vmem:[#allocation2 + $0xd8] sm:$0xff] }
 0x2ac   : > { %v4506_v30 = vpop.f32.mrf.mxu1  ;;  %4621 = vst [vmem:[#allocation2 + $0x10] sm:$0xff] %v4569_v56  ;;  %v4570_v3 = vadd.f32 %v4503_v0, %v600_v51  ;;  %v4505_v43 = vadd.f32 %v4504_v7, %v4404_v11  ;;  %v4406_v1 = vadd.f32 %v4405_v27, %v4305_v37  ;;  %v4222_v51 = vadd.f32 %v7872_v34, %v7814_v9 }
 0x2ad   : > { %v4409_v14 = vpop.f32.mrf.mxu0  ;;  %v4319_v7 = vadd.f32 %v7866_v52, %v4218_v2  ;;  %v4224_v0 = vadd.f32 %v7876_v25, %v7816_v41  ;;  %v4321_v18 = vadd.f32 %v7870_v42, %v4220_v58  ;;  %v8488_v58 = vld [vmem:[#allocation31_spill] sm:$0xff] }
 0x2ae   : > { %v4510_v61 = vpop.f32.mrf.mxu1  ;;  %4622 = vst [vmem:[#allocation2 + $0x48] sm:$0xff] %v4570_v3  ;;  %v4573_v44 = vadd.f32 %v4505_v43, %v603_v33  ;;  %v4507_v35 = vadd.f32 %v4506_v30, %v4406_v1  ;;  %v4410_v21 = vadd.f32 %v4409_v14, %v4309_v15  ;;  %v4323_v27 = vadd.f32 %v7874_v57, %v4222_v51  ;;  %v615_v30 = vld [vmem:[#allocation2 + $0x138] sm:$0xff] }
 0x2af   : > { %v4411_v5 = vpop.f32.mrf.mxu0  ;;  %v4228_v3 = vadd.f32 %v7880_v55, %v7818_v23  ;;  %v4325_v1 = vadd.f32 %v7878_v50, %v4224_v0  ;;  %v4230_v14 = vadd.f32 %v7884_v8, %v7820_v6  ;;  %v619_v23 = vld [vmem:[#allocation2 + $0x20] sm:$0xff] }
 0x2b0   : > { %v4512_v20 = vpop.f32.mrf.mxu1  ;;  %4625 = vst [vmem:[#allocation2 + $0x40] sm:$0xff] %v4573_v44  ;;  %v4574_v28 = vadd.f32 %v4507_v35, %v604_v26  ;;  %v4511_v39 = vadd.f32 %v4510_v61, %v4410_v21  ;;  %v4412_v40 = vadd.f32 %v4411_v5, %v4311_v13  ;;  %v4232_v44 = vadd.f32 %v7888_v17, %v7822_v59  ;;  %v620_v6 = vld [vmem:[#allocation2 + $0xe0] sm:$0xff] }
 0x2b1   : > { %v4413_v49 = vpop.f32.mrf.mxu0  ;;  %v4329_v21 = vadd.f32 %v7882_v29, %v4228_v3  ;;  %v4234_v5 = vadd.f32 %v7892_v22, %v7824_v19  ;;  %v4331_v2 = vadd.f32 %v7886_v60, %v4230_v14  ;;  %v8489_v51 = vld [vmem:[#allocation22_spill] sm:$0xff]  ;;  %v631_v14 = vld [vmem:[#allocation2 + $0x190] sm:$0xff] }
 0x2b2   : > { %v4514_v36 = vpop.f32.mrf.mxu1  ;;  %4626 = vst [vmem:[#allocation2 + $0x178] sm:$0xff] %v4574_v28  ;;  %v4577_v47 = vadd.f32 %v4511_v39, %v607_v10  ;;  %v4513_v16 = vadd.f32 %v4512_v20, %v4412_v40  ;;  %v4414_v37 = vadd.f32 %v4413_v49, %v4313_v4  ;;  %v4333_v39 = vadd.f32 %v7890_v12, %v4232_v44  ;;  %v623_v40 = vld [vmem:[#allocation2 + $0xa8] sm:$0xff]  ;;  %v8499_v44 = vld [vmem:[#allocation49_spill] sm:$0xff] }
 0x2b3   : > { %v4415_v63 = vpop.f32.mrf.mxu0 }
 0x2b4   : > { %v4516_v54 = vpop.f32.mrf.mxu1  ;;  %4629 = vst [vmem:[#allocation2 + $0x90] sm:$0xff] %v4577_v47  ;;  %v4578_v62 = vadd.f32 %v4513_v16, %v608_v31  ;;  %v4515_v38 = vadd.f32 %v4514_v36, %v4414_v37  ;;  %v4416_v56 = vadd.f32 %v4415_v63, %v4315_v46  ;;  %v8487_v31 = vld [vmem:[#allocation32_spill] sm:$0xff]  ;;  %v4335_v47 = vadd.f32 %v8488_v58, %v4234_v5 }
 0x2b5   : > { %v4419_v53 = vpop.f32.mrf.mxu0  ;;  %v4238_v49 = vadd.f32 %v8487_v31, %v7826_v24  ;;  %v624_v16 = vld [vmem:[#allocation2 + $0x88] sm:$0xff]  ;;  %v627_v24 = vld [vmem:[#allocation2 + $0xc0] sm:$0xff] }
 0x2b6   : > { %v4520_v11 = vpop.f32.mrf.mxu1  ;;  %4630 = vst [vmem:[#allocation2 + $0x118] sm:$0xff] %v4578_v62  ;;  %v4581_v33 = vadd.f32 %v4515_v38, %v611_v32  ;;  %v4517_v9 = vadd.f32 %v4516_v54, %v4416_v56  ;;  %v4420_v34 = vadd.f32 %v4419_v53, %v4319_v7  ;;  %v8490_v32 = vld [vmem:[#allocation34_spill] sm:$0xff]  ;;  %v8491_v62 = vld [vmem:[#allocation23_spill] sm:$0xff]  ;;  %v8492_v38 = vld [vmem:[#allocation36_spill] sm:$0xff] }
 0x2b7   : > { %v4421_v52 = vpop.f32.mrf.mxu0  ;;  %v4240_v63 = vadd.f32 %v8490_v32, %v8489_v51  ;;  %v4242_v56 = vadd.f32 %v8492_v38, %v8491_v62  ;;  %v8493_v53 = vld [vmem:[#allocation33_spill] sm:$0xff]  ;;  %v636_v51 = vld [vmem:[#allocation2 + $0x120] sm:$0xff] }
 0x2b8   : > { %v4522_v15 = vpop.f32.mrf.mxu1  ;;  %4633 = vst [vmem:[#allocation2 + $0x58] sm:$0xff] %v4581_v33  ;;  %v4582_v43 = vadd.f32 %v4517_v9, %v612_v48  ;;  %v4521_v41 = vadd.f32 %v4520_v11, %v4420_v34  ;;  %v4422_v25 = vadd.f32 %v4421_v52, %v4321_v18  ;;  %v4339_v11 = vadd.f32 %v8493_v53, %v4238_v49  ;;  %v8494_v34 = vld [vmem:[#allocation24_spill] sm:$0xff]  ;;  %v628_v52 = vld [vmem:[#allocation2 + $0x140] sm:$0xff] }
 0x2b9   : > { %v4423_v42 = vpop.f32.mrf.mxu0 }
 0x2ba   : > { %v4524_v26 = vpop.f32.mrf.mxu1  ;;  %4634 = vst [vmem:[#allocation2 + $0xd8] sm:$0xff] %v4582_v43  ;;  %v4585_v57 = vadd.f32 %v4521_v41, %v615_v30  ;;  %v4523_v61 = vadd.f32 %v4522_v15, %v4422_v25  ;;  %v4424_v13 = vadd.f32 %v4423_v42, %v4323_v27  ;;  %v8495_v27 = vld [vmem:[#allocation48_spill] sm:$0xff]  ;;  %v8496_v43 = vld [vmem:[#allocation35_spill] sm:$0xff]  ;;  %v8497_v42 = vld [vmem:[#allocation37_spill] sm:$0xff] }
 0x2bb   : > { %v4425_v55 = vpop.f32.mrf.mxu0  ;;  %v4244_v30 = vadd.f32 %v8495_v27, %v8494_v34  ;;  %v4341_v41 = vadd.f32 %v8496_v43, %v4240_v63 }
 0x2bc   : > { %v4526_v35 = vpop.f32.mrf.mxu1  ;;  %4637 = vst [vmem:[#allocation2 + $0x138] sm:$0xff] %v4585_v57  ;;  %v4586_v50 = vadd.f32 %v4523_v61, %v616_v45  ;;  %v4525_v4 = vadd.f32 %v4524_v26, %v4424_v13  ;;  %v4426_v10 = vadd.f32 %v4425_v55, %v4325_v1  ;;  %v4343_v26 = vadd.f32 %v8497_v42, %v4242_v56  ;;  %v8498_v13 = vld [vmem:[#allocation25_spill] sm:$0xff] }
 0x2bd   : > { %v4429_v8 = vpop.f32.mrf.mxu0  ;;  %v8509_v56 = vld [vmem:[#allocation9_spill] sm:$0xff] }
 0x2be   : > { %v4530_v20 = vpop.f32.mrf.mxu1  ;;  %4638 = vst [vmem:[#allocation2 + $0x78] sm:$0xff] %v4586_v50  ;;  %v4589_v28 = vadd.f32 %v4525_v4, %v619_v23  ;;  %v4527_v59 = vadd.f32 %v4526_v35, %v4426_v10  ;;  %v4430_v17 = vadd.f32 %v4429_v8, %v4329_v21  ;;  %v4248_v23 = vadd.f32 %v8499_v44, %v8498_v13  ;;  %v8500_v50 = vld [vmem:[#allocation8_spill] sm:$0xff]  ;;  %v632_v10 = vld [vmem:[#allocation2 + $0x38] sm:$0xff] }
 0x2bf   : > { %v4431_v29 = vpop.f32.mrf.mxu0  ;;  %v4345_v4 = vadd.f32 %v8500_v50, %v4244_v30  ;;  %v8501_v8 = vld [vmem:[#allocation26_spill] sm:$0xff]  ;;  %v8512_v30 = vld [vmem:[#allocation51_spill] sm:$0xff] }
 0x2c0   : > { %v4532_v46 = vpop.f32.mrf.mxu1  ;;  %4641 = vst [vmem:[#allocation2 + $0x20] sm:$0xff] %v4589_v28  ;;  %v4590_v36 = vadd.f32 %v4527_v59, %v620_v6  ;;  %v4531_v19 = vadd.f32 %v4530_v20, %v4430_v17  ;;  %v4432_v22 = vadd.f32 %v4431_v29, %v4331_v2  ;;  %v8502_v20 = vld [vmem:[#allocation7_spill] sm:$0xff]  ;;  %v8515_v13 = vld [vmem:[#allocation38_spill] sm:$0xff] }
 0x2c1   : > { %v4433_v60 = vpop.f32.mrf.mxu0  ;;  %v4250_v2 = vadd.f32 %v8502_v20, %v8501_v8 }
 0x2c2   : > { %v4534_v37 = vpop.f32.mrf.mxu1  ;;  %4642 = vst [vmem:[#allocation2 + $0xe0] sm:$0xff] %v4590_v36  ;;  %v4593_v12 = vadd.f32 %v4531_v19, %v623_v40  ;;  %v4533_v54 = vadd.f32 %v4532_v46, %v4432_v22  ;;  %v4434_v7 = vadd.f32 %v4433_v60, %v4333_v39  ;;  %v8503_v39 = vld [vmem:[#allocation27_spill] sm:$0xff]  ;;  %v8504_v40 = vld [vmem:[#allocation12_spill] sm:$0xff]  ;;  %v635_v46 = vld [vmem:[#allocation2 + $0x158] sm:$0xff] }
 0x2c3   : > { %v4435_v0 = vpop.f32.mrf.mxu0  ;;  %v4252_v29 = vadd.f32 %v8504_v40, %v8503_v39  ;;  %v8505_v36 = vld [vmem:[#allocation10_spill] sm:$0xff]  ;;  %v8507_v60 = vld [vmem:[#allocation11_spill] sm:$0xff] }
 0x2c4   : > { %v4536_v48 = vpop.f32.mrf.mxu1  ;;  %4645 = vst [vmem:[#allocation2 + $0xa8] sm:$0xff] %v4593_v12  ;;  %v4594_v18 = vadd.f32 %v4533_v54, %v624_v16  ;;  %v4535_v33 = vadd.f32 %v4534_v37, %v4434_v7  ;;  %v4436_v9 = vadd.f32 %v4435_v0, %v4335_v47  ;;  %v4349_v19 = vadd.f32 %v8505_v36, %v4248_v23  ;;  %v8506_v16 = vld [vmem:[#allocation28_spill] sm:$0xff]  ;;  %v8508_v12 = vld [vmem:[#allocation50_spill] sm:$0xff] }
 0x2c5   : > { %v4439_v15 = vpop.f32.mrf.mxu0  ;;  %v4254_v37 = vadd.f32 %v8507_v60, %v8506_v16  ;;  %v4351_v54 = vadd.f32 %v8508_v12, %v4250_v2  ;;  %v639_v0 = vld [vmem:[#allocation2 + $0x30] sm:$0xff]  ;;  %v647_v2 = vld [vmem:[#allocation2 + $0xe8] sm:$0x3] }
 0x2c6   : > { %v4540_v3 = vpop.f32.mrf.mxu1  ;;  %4646 = vst [vmem:[#allocation2 + $0x88] sm:$0xff] %v4594_v18  ;;  %v4597_v25 = vadd.f32 %v4535_v33, %v627_v24  ;;  %v4537_v1 = vadd.f32 %v4536_v48, %v4436_v9  ;;  %v4440_v45 = vadd.f32 %v4439_v15, %v4339_v11  ;;  %v4353_v24 = vadd.f32 %v8509_v56, %v4252_v29  ;;  %v8510_v11 = vld [vmem:[#allocation29_spill] sm:$0xff]  ;;  %v8511_v18 = vld [vmem:[#allocation14_spill] sm:$0xff]  ;;  %v640_v15 = vld [vmem:[#allocation2 + $0xc8] sm:$0xff] }
 0x2c7   : > { %v4441_v57 = vpop.f32.mrf.mxu0  ;;  %v4258_v33 = vadd.f32 %v8511_v18, %v8510_v11  ;;  %v648_v29 = vld [vmem:[#allocation2 + $0x70] sm:$0x3] }
 0x2c8   : > { %v4542_v61 = vpop.f32.mrf.mxu1  ;;  %4649 = vst [vmem:[#allocation2 + $0xc0] sm:$0xff] %v4597_v25  ;;  %v4598_v55 = vadd.f32 %v4537_v1, %v628_v52  ;;  %v4541_v35 = vadd.f32 %v4540_v3, %v4440_v45  ;;  %v4442_v21 = vadd.f32 %v4441_v57, %v4341_v41  ;;  %v4355_v52 = vadd.f32 %v8512_v30, %v4254_v37  ;;  %v8513_v41 = vld [vmem:[#allocation30_spill] sm:$0xff]  ;;  %v8514_v25 = vld [vmem:[#allocation39_spill] sm:$0xff] }
 0x2c9   : > { %v4443_v5 = vpop.f32.mrf.mxu0  ;;  %v4260_v1 = vadd.f32 %v8514_v25, %v8513_v41  ;;  %v4359_v44 = vadd.f32 %v8515_v13, %v4258_v33 }
 0x2ca   : > { %v4544_v6 = vpop.f32.mrf.mxu1  ;;  %4650 = vst [vmem:[#allocation2 + $0x140] sm:$0xff] %v4598_v55  ;;  %v4601_v28 = vadd.f32 %v4541_v35, %v631_v14  ;;  %v4543_v59 = vadd.f32 %v4542_v61, %v4442_v21  ;;  %v4444_v17 = vadd.f32 %v4443_v5, %v4343_v26  ;;  %v643_v14 = vld [vmem:[#allocation2 + $0x8] sm:$0xff]  ;;  %v644_v21 = vld [vmem:[#allocation2 + $0x80] sm:$0xff] }
 0x2cb   : > { %v4445_v31 = vpop.f32.mrf.mxu0 }
 0x2cc   : > { %v4546_v49 = vpop.f32.mrf.mxu1  ;;  %4653 = vst [vmem:[#allocation2 + $0x190] sm:$0xff] %v4601_v28  ;;  %v4602_v22 = vadd.f32 %v4543_v59, %v632_v10  ;;  %v4545_v58 = vadd.f32 %v4544_v6, %v4444_v17  ;;  %v4446_v47 = vadd.f32 %v4445_v31, %v4345_v4  ;;  %v8516_v10 = vld [vmem:[#allocation40_spill] sm:$0xff] }
 0x2cd   : > { %v4449_v32 = vpop.f32.mrf.mxu0  ;;  %v4361_v5 = vadd.f32 %v8516_v10, %v4260_v1 }
 0x2ce   : > { %v4550_v63 = vpop.f32.mrf.mxu1  ;;  %4654 = vst [vmem:[#allocation2 + $0x38] sm:$0xff] %v4602_v22  ;;  %v4605_v7 = vadd.f32 %v4545_v58, %v635_v46  ;;  %v4547_v62 = vadd.f32 %v4546_v49, %v4446_v47  ;;  %v4450_v38 = vadd.f32 %v4449_v32, %v4349_v19 }
 0x2cf   : > { %v4451_v48 = vpop.f32.mrf.mxu0 }
 0x2d0   : > { %v4552_v53 = vpop.f32.mrf.mxu1  ;;  %4657 = vst [vmem:[#allocation2 + $0x158] sm:$0xff] %v4605_v7  ;;  %v4606_v9 = vadd.f32 %v4547_v62, %v636_v51  ;;  %v4551_v34 = vadd.f32 %v4550_v63, %v4450_v38  ;;  %v4452_v27 = vadd.f32 %v4451_v48, %v4351_v54 }
 0x2d1   : > { %v4453_v3 = vpop.f32.mrf.mxu0 }
 0x2d2   : > { %v4554_v43 = vpop.f32.mrf.mxu1  ;;  %4658 = vst [vmem:[#allocation2 + $0x120] sm:$0xff] %v4606_v9  ;;  %v4609_v45 = vadd.f32 %v4551_v34, %v639_v0  ;;  %v4553_v42 = vadd.f32 %v4552_v53, %v4452_v27  ;;  %v4454_v26 = vadd.f32 %v4453_v3, %v4353_v24 }
 0x2d3   : > { %v4455_v57 = vpop.f32.mrf.mxu0 }
 0x2d4   : > { %v4556_v61 = vpop.f32.mrf.mxu1  ;;  %4661 = vst [vmem:[#allocation2 + $0x30] sm:$0xff] %v4609_v45  ;;  %v4610_v23 = vadd.f32 %v4553_v42, %v640_v15  ;;  %v4555_v55 = vadd.f32 %v4554_v43, %v4454_v26  ;;  %v4456_v35 = vadd.f32 %v4455_v57, %v4355_v52 }
 0x2d5   : > { %v4459_v50 = vpop.f32.mrf.mxu0 }
 0x2d6   : > { %v4560_v4 = vpop.f32.mrf.mxu1  ;;  %4662 = vst [vmem:[#allocation2 + $0xc8] sm:$0xff] %v4610_v23  ;;  %v4613_v6 = vadd.f32 %v4555_v55, %v643_v14  ;;  %v4557_v8 = vadd.f32 %v4556_v61, %v4456_v35  ;;  %v4460_v20 = vadd.f32 %v4459_v50, %v4359_v44 }
 0x2d7   : > { %v4461_v28 = vpop.f32.mrf.mxu0 }
 0x2d8   : > { %v4562_v59 = vpop.f32.mrf.mxu1  ;;  %4665 = vst [vmem:[#allocation2 + $0x8] sm:$0xff] %v4613_v6  ;;  %v4614_v17 = vadd.f32 %v4557_v8, %v644_v21  ;;  %v4561_v39 = vadd.f32 %v4560_v4, %v4460_v20  ;;  %v4462_v40 = vadd.f32 %v4461_v28, %v4361_v5 }
 0x2d9   : > { %v4463_v46 = vpop.f32.mrf.mxu0 }
 0x2da   : > { %v4564_v31 = vpop.f32.mrf.mxu1  ;;  %4666 = vst [vmem:[#allocation2 + $0x80] sm:$0xff] %v4614_v17  ;;  %v4617_v49 = vadd.f32 %v4561_v39, %v647_v2  ;;  %v4563_v36 = vadd.f32 %v4562_v59, %v4462_v40  ;;  %4674 = sbr.rel (%p5707_p10) target bundleno = 1017 (0x3f9), region = 67 }
 0x2db   : > { %v4464_v19 = vpop.f32.mrf.mxu0 }
 0x2dc   : > { %v4565_v22 = vpop.f32.mrf.mxu1  ;;  %4669 = vst [vmem:[#allocation2 + $0xe8] sm:$0x3] %v4617_v49  ;;  %v4618_v58 = vadd.f32 %v4563_v36, %v648_v29 }
 0x2de   : > { %4670 = vst [vmem:[#allocation2 + $0x70] sm:$0x3] %v4618_v58 }
 0x2df   : > { %v4985_v47 = vld [vmem:[%s8266_s2 + $0xf8] sm:$0xff]  ;;  %v4984_v51 = vld [vmem:[%s8266_s2 + $0xf0] sm:$0xff]  ;;  %v4983_v54 = vld [vmem:[%s8266_s2 + $0xe8] sm:$0xff]  ;;  %vm4813_vm0 = vcmask 1046528   ;;  %vm4732_vm1 = vcmask 1040384   ;;  %vm5165_vm2 = vcmask 74752  }
 0x2e0   : > { %v5017_v16 = vld [vmem:[%s8266_s2 + $0x1f8] sm:$0xff]  ;;  %5715 = vmatprep.subr.mxu0 %v4985_v47  ;;  %v5016_v32 = vld [vmem:[%s8266_s2 + $0x1f0] sm:$0xff]  ;;  %v5015_v7 = vld [vmem:[%s8266_s2 + $0x1e8] sm:$0xff] }
 0x2e1   : > { %v4969_v60 = vld [vmem:[%s8266_s2 + $0x78] sm:$0xff]  ;;  %5750 = vmatprep.subr.mxu1 %v5017_v16  ;;  %v4968_v63 = vld [vmem:[%s8266_s2 + $0x70] sm:$0xff]  ;;  %v4967_v62 = vld [vmem:[%s8266_s2 + $0x68] sm:$0xff] }
 0x2e2   : > { %v5001_v37 = vld [vmem:[%s8266_s2 + $0x178] sm:$0xff]  ;;  %5716 = vmatpush3.msra.mxu0 %v4969_v60  ;;  %v5000_v12 = vld [vmem:[%s8266_s2 + $0x170] sm:$0xff]  ;;  %v4999_v38 = vld [vmem:[%s8266_s2 + $0x168] sm:$0xff] }
 0x2e3   : > { %5751 = vmatpush3.msra.mxu1 %v5001_v37  ;;  %5717 = vmatprep.subr.mxu0 %v4984_v51  ;;  %v4982_v56 = vld [vmem:[%s8266_s2 + $0xe0] sm:$0xff]  ;;  %v4981_v53 = vld [vmem:[%s8266_s2 + $0xd8] sm:$0xff]  ;;  %v4980_v9 = vld [vmem:[%s8266_s2 + $0xd0] sm:$0xff] }
 0x2e4   : > { %5752 = vmatprep.subr.mxu1 %v5016_v32  ;;  %5718 = vmatpush3.msra.mxu0 %v4968_v63  ;;  %v5014_v24 = vld [vmem:[%s8266_s2 + $0x1e0] sm:$0xff]  ;;  %v5013_v11 = vld [vmem:[%s8266_s2 + $0x1d8] sm:$0xff]  ;;  %v5012_v34 = vld [vmem:[%s8266_s2 + $0x1d0] sm:$0xff] }
 0x2e5   : > { %5753 = vmatpush3.msra.mxu1 %v5000_v12  ;;  %5719 = vmatprep.subr.mxu0 %v4983_v54  ;;  %v4966_v0 = vld [vmem:[%s8266_s2 + $0x60] sm:$0xff]  ;;  %v4965_v18 = vld [vmem:[%s8266_s2 + $0x58] sm:$0xff]  ;;  %v4964_v27 = vld [vmem:[%s8266_s2 + $0x50] sm:$0xff] }
 0x2e6   : > { %5754 = vmatprep.subr.mxu1 %v5015_v7  ;;  %v4998_v48 = vld [vmem:[%s8266_s2 + $0x160] sm:$0xff]  ;;  %5720 = vmatpush3.msra.mxu0 %v4967_v62  ;;  %v4997_v33 = vld [vmem:[%s8266_s2 + $0x158] sm:$0xff]  ;;  %v4996_v30 = vld [vmem:[%s8266_s2 + $0x150] sm:$0xff] }
 0x2e7   : > { %5755 = vmatpush3.msra.mxu1 %v4999_v38  ;;  %5721 = vmatprep.subr.mxu0 %v4982_v56  ;;  %v4979_v52 = vld [vmem:[%s8266_s2 + $0xc8] sm:$0xff]  ;;  %v4978_v41 = vld [vmem:[%s8266_s2 + $0xc0] sm:$0xff]  ;;  %v4977_v42 = vld [vmem:[%s8266_s2 + $0xb8] sm:$0xff] }
 0x2e8   : > { %5756 = vmatprep.subr.mxu1 %v5014_v24  ;;  %5722 = vmatpush3.msra.mxu0 %v4966_v0  ;;  %v5011_v15 = vld [vmem:[%s8266_s2 + $0x1c8] sm:$0xff]  ;;  %v5010_v25 = vld [vmem:[%s8266_s2 + $0x1c0] sm:$0xff]  ;;  %v5009_v26 = vld [vmem:[%s8266_s2 + $0x1b8] sm:$0xff] }
 0x2e9   : > { %5757 = vmatpush3.msra.mxu1 %v4998_v48  ;;  %5723 = vmatprep.subr.mxu0 %v4981_v53  ;;  %v4963_v3 = vld [vmem:[%s8266_s2 + $0x48] sm:$0xff]  ;;  %v4962_v1 = vld [vmem:[%s8266_s2 + $0x40] sm:$0xff]  ;;  %v4961_v14 = vld [vmem:[%s8266_s2 + $0x38] sm:$0xff] }
 0x2ea   : > { %5758 = vmatprep.subr.mxu1 %v5013_v11  ;;  %5724 = vmatpush3.msra.mxu0 %v4965_v18  ;;  %v4995_v43 = vld [vmem:[%s8266_s2 + $0x148] sm:$0xff]  ;;  %v4994_v45 = vld [vmem:[%s8266_s2 + $0x140] sm:$0xff]  ;;  %v4993_v57 = vld [vmem:[%s8266_s2 + $0x138] sm:$0xff] }
 0x2eb   : > { %5759 = vmatpush3.msra.mxu1 %v4997_v33  ;;  %5725 = vmatprep.subr.mxu0 %v4980_v9  ;;  %v4976_v61 = vld [vmem:[%s8266_s2 + $0xb0] sm:$0xff]  ;;  %v4975_v55 = vld [vmem:[%s8266_s2 + $0xa8] sm:$0xff]  ;;  %v4974_v4 = vld [vmem:[%s8266_s2 + $0xa0] sm:$0xff] }
 0x2ec   : > { %5760 = vmatprep.subr.mxu1 %v5012_v34  ;;  %5726 = vmatpush3.msra.mxu0 %v4964_v27  ;;  %v5008_v13 = vld [vmem:[%s8266_s2 + $0x1b0] sm:$0xff]  ;;  %v5007_v35 = vld [vmem:[%s8266_s2 + $0x1a8] sm:$0xff]  ;;  %v5006_v10 = vld [vmem:[%s8266_s2 + $0x1a0] sm:$0xff] }
 0x2ed   : > { %5761 = vmatpush3.msra.mxu1 %v4996_v30  ;;  %5727 = vmatprep.subr.mxu0 %v4979_v52  ;;  %v4960_v44 = vld [vmem:[%s8266_s2 + $0x30] sm:$0xff]  ;;  %v4959_v21 = vld [vmem:[%s8266_s2 + $0x28] sm:$0xff]  ;;  %v4958_v5 = vld [vmem:[%s8266_s2 + $0x20] sm:$0xff] }
 0x2ee   : > { %5762 = vmatprep.subr.mxu1 %v5011_v15  ;;  %5728 = vmatpush3.msra.mxu0 %v4963_v3  ;;  %v4992_v23 = vld [vmem:[%s8266_s2 + $0x130] sm:$0xff]  ;;  %v4991_v50 = vld [vmem:[%s8266_s2 + $0x128] sm:$0xff]  ;;  %v4990_v6 = vld [vmem:[%s8266_s2 + $0x120] sm:$0xff] }
 0x2ef   : > { %5763 = vmatpush3.msra.mxu1 %v4995_v43  ;;  %5729 = vmatprep.subr.mxu0 %v4978_v41  ;;  %v4973_v8 = vld [vmem:[%s8266_s2 + $0x98] sm:$0xff]  ;;  %v4676_v59 = vld [vmem:[#allocation2 + $0xd0] sm:$0xff]  ;;  %v4680_v17 = vld [vmem:[#allocation2 + $0x128] sm:$0xff] }
 0x2f0   : > { %5764 = vmatprep.subr.mxu1 %v5010_v25  ;;  %5730 = vmatpush3.msra.mxu0 %v4962_v1  ;;  %v5005_v20 = vld [vmem:[%s8266_s2 + $0x198] sm:$0xff]  ;;  %v4684_v39 = vld [vmem:[#allocation2 + $0x110] sm:$0xff]  ;;  %v4688_v46 = vld [vmem:[#allocation2 + $0x100] sm:$0xff]  ;;  %v4741_v31 = vadd.f32 %v4680_v17, %v4676_v59 }
 0x2f1   : > { %5765 = vmatpush3.msra.mxu1 %v4994_v45  ;;  %5731 = vmatprep.subr.mxu0 %v4977_v42  ;;  %v4957_v2 = vld [vmem:[%s8266_s2 + $0x18] sm:$0xff]  ;;  %v4972_v40 = vld [vmem:[%s8266_s2 + $0x90] sm:$0xff]  ;;  %v4700_v22 = vld [vmem:[#allocation2 + $0x188] sm:$0xff] }
 0x2f2   : > { %5766 = vmatprep.subr.mxu1 %v5009_v26  ;;  %5732 = vmatpush3.msra.mxu0 %v4961_v14  ;;  %v4989_v28 = vld [vmem:[%s8266_s2 + $0x118] sm:$0xff]  ;;  %v5004_v29 = vld [vmem:[%s8266_s2 + $0x190] sm:$0xff]  ;;  %v4708_v47 = vld [vmem:[#allocation2 + $0x168] sm:$0xff]  ;;  %v4742_v63 = vadd.f32 %v4741_v31, %v4684_v39  ;;  %v4817_v12 = vrot.slane %v4700_v22, 1  ;;  %v4746_v1 = vsel %vm4732_vm1, %v4700_v22, 0.0 }
 0x2f3   : > { %5767 = vmatpush3.msra.mxu1 %v4993_v57  ;;  %5733 = vmatprep.subr.mxu0 %v4976_v61  ;;  %v4956_v49 = vld [vmem:[%s8266_s2 + $0x10] sm:$0xff]  ;;  %v4971_v16 = vld [vmem:[%s8266_s2 + $0x88] sm:$0xff]  ;;  %v4712_v37 = vld [vmem:[#allocation2 + $0x18] sm:$0xff]  ;;  %v4828_v56 = vrot.slane %v4708_v47, 1 }
 0x2f4   : > { %5768 = vmatprep.subr.mxu1 %v5008_v13  ;;  %5734 = vmatpush3.msra.mxu0 %v4960_v44  ;;  %v4988_v36 = vld [vmem:[%s8266_s2 + $0x110] sm:$0xff]  ;;  %v5003_v60 = vld [vmem:[%s8266_s2 + $0x188] sm:$0xff]  ;;  %v4836_v24 = vrot.slane %v4712_v37, 1  ;;  %v4970_v53 = vld [vmem:[%s8266_s2 + $0x80] sm:$0xff]  ;;  %v4743_v18 = vadd.f32 %v4742_v63, %v4688_v46 }
 0x2f5   : > { %5769 = vmatpush3.msra.mxu1 %v4992_v23  ;;  %5735 = vmatprep.subr.mxu0 %v4975_v55  ;;  %v4692_v19 = vld [vmem:[#allocation2 + $0x130] sm:$0xff]  ;;  %v4716_v51 = vld [vmem:[#allocation2 + $0x68] sm:$0xff]  ;;  %v5002_v11 = vld [vmem:[%s8266_s2 + $0x180] sm:$0xff] }
 0x2f6   : > { %5770 = vmatprep.subr.mxu1 %v5007_v35  ;;  %5736 = vmatpush3.msra.mxu0 %v4959_v21  ;;  %v4704_v58 = vld [vmem:[#allocation2 + $0x170] sm:$0xff]  ;;  %v4720_v32 = vld [vmem:[#allocation2 + $0x28] sm:$0xff]  ;;  %v4844_v0 = vrot.slane %v4716_v51, 1  ;;  %v4682_v27 = vld [vmem:[#allocation2 + $0x178] sm:$0xff]  ;;  %v4837_v3 = vsel %vm4813_vm0, %v4828_v56, %v4836_v24  ;;  %v4744_v25 = vadd.f32 %v4743_v18, %v4692_v19 }
 0x2f7   : > { %5771 = vmatpush3.msra.mxu1 %v4991_v50  ;;  %5737 = vmatprep.subr.mxu0 %v4974_v4  ;;  %v4818_v54 = vrot.slane %v4704_v58, 1  ;;  %v4955_v7 = vld [vmem:[%s8266_s2 + $0x8] sm:$0xff]  ;;  %v8188_v38 = vld [vmem:[#allocation2 + $0x150] sm:$0x3]  ;;  %v4852_v48 = vrot.slane %v4720_v32, 1  ;;  %v4954_v30 = vld [vmem:[%s8266_s2] sm:$0xff] }
 0x2f8   : > { %5772 = vmatprep.subr.mxu1 %v5006_v10  ;;  %5738 = vmatpush3.msra.mxu0 %v4958_v5  ;;  %v4987_v62 = vld [vmem:[%s8266_s2 + $0x108] sm:$0xff]  ;;  %v4860_v9 = vrot.slane %v8188_v38, 1  ;;  %v4696_v52 = vld [vmem:[#allocation2] sm:$0xff]  ;;  %v4686_v41 = vld [vmem:[#allocation2 + $0x118] sm:$0xff]  ;;  %v4845_v45 = vsel %vm4813_vm0, %v4836_v24, %v4844_v0 }
 0x2f9   : > { %5773 = vmatpush3.msra.mxu1 %v4990_v6  ;;  %5739 = vmatprep.subr.mxu0 %v4973_v8  ;;  %v4819_v33 = vsel %vm4813_vm0, %v4817_v12, %v4818_v54  ;;  %v4678_v34 = vld [vmem:[#allocation2 + $0x48] sm:$0xff]  ;;  %v4829_v15 = vsel %vm4813_vm0, %v4818_v54, %v4828_v56  ;;  %v4986_v43 = vld [vmem:[%s8266_s2 + $0x100] sm:$0xff]  ;;  %v4853_v42 = vsel %vm4813_vm0, %v4844_v0, %v4852_v48  ;;  %v4690_v26 = vld [vmem:[#allocation2 + $0xd8] sm:$0xff] }
 0x2fa   : > { %5774 = vmatprep.subr.mxu1 %v5005_v20  ;;  %5740 = vmatpush3.msra.mxu0 %v4957_v2  ;;  %v4702_v14 = vld [vmem:[#allocation2 + $0x88] sm:$0xff]  ;;  %v4706_v57 = vld [vmem:[#allocation2 + $0x140] sm:$0xff]  ;;  %v4861_v61 = vsel %vm4813_vm0, %v4852_v48, %v4860_v9  ;;  %v4907_v13 = vadd.f32 %v4829_v15, %v4819_v33  ;;  %v4710_v44 = vld [vmem:[#allocation2 + $0x38] sm:$0xff]  ;;  %v4767_v35 = vadd.f32 %v4682_v27, %v4678_v34  ;;  %v4912_v19 = vsel %vm4732_vm1, %v4860_v9, 0.0 }
 0x2fb   : > { %5775 = vmatpush3.msra.mxu1 %v4989_v28  ;;  %5741 = vmatprep.subr.mxu0 %v4972_v40  ;;  %v4714_v23 = vld [vmem:[#allocation2 + $0x120] sm:$0xff]  ;;  %v4718_v55 = vld [vmem:[#allocation2 + $0xc8] sm:$0xff]  ;;  %v4823_v21 = vrot.slane %v4702_v14, 1  ;;  %v4745_v50 = vadd.f32 %v4744_v25, %v4696_v52  ;;  %v4726_v10 = vld [vmem:[#allocation2 + $0x70] sm:$0x3]  ;;  %v4824_v5 = vrot.slane %v4706_v57, 1 }
 0x2fc   : > { %5776 = vmatprep.subr.mxu1 %v5004_v29  ;;  %5742 = vmatpush3.msra.mxu0 %v4956_v49  ;;  %v4722_v4 = vld [vmem:[#allocation2 + $0x80] sm:$0xff]  ;;  %v4832_v6 = vrot.slane %v4710_v44, 1  ;;  %v4840_v8 = vrot.slane %v4714_v23, 1  ;;  %v4908_v20 = vadd.f32 %v4907_v13, %v4837_v3  ;;  %v4768_v2 = vadd.f32 %v4767_v35, %v4686_v41  ;;  %v4694_v39 = vld [vmem:[#allocation2 + $0x78] sm:$0xff]  ;;  %v4675_v31 = vld [vmem:[#allocation2 + $0xb0] sm:$0xff] }
 0x2fd   : > { %5777 = vmatpush3.msra.mxu1 %v4988_v36  ;;  %5743 = vmatprep.subr.mxu0 %v4971_v16  ;;  %v4848_v28 = vrot.slane %v4718_v55, 1  ;;  %v4856_v59 = vrot.slane %v4722_v4, 1  ;;  %v4747_v17 = vadd.f32 %v4746_v1, %v4745_v50  ;;  %v4825_v40 = vsel %vm4813_vm0, %v4823_v21, %v4824_v5  ;;  %v4679_v49 = vld [vmem:[#allocation2 + $0x160] sm:$0xff]  ;;  %v4699_v47 = vld [vmem:[#allocation2 + $0xf0] sm:$0xff]  ;;  %v4683_v63 = vld [vmem:[#allocation2 + $0x108] sm:$0xff] }
 0x2fe   : > { %5778 = vmatprep.subr.mxu1 %v5003_v60  ;;  %5744 = vmatpush3.msra.mxu0 %v4955_v7  ;;  %v4833_v29 = vsel %vm4813_vm0, %v4824_v5, %v4832_v6  ;;  %v4864_v46 = vrot.slane %v4726_v10, 1  ;;  %v4909_v36 = vadd.f32 %v4908_v20, %v4845_v45  ;;  %v4769_v22 = vadd.f32 %v4768_v2, %v4690_v26  ;;  %v4698_v60 = vld [vmem:[#allocation2 + $0xe0] sm:$0xff]  ;;  %v4703_v12 = vld [vmem:[#allocation2 + $0xb8] sm:$0xff]  ;;  %v4707_v38 = vld [vmem:[#allocation2 + $0x50] sm:$0xff] }
 0x2ff   : > { %5779 = vmatpush3.msra.mxu1 %v4987_v62  ;;  %5745 = vmatprep.subr.mxu0 %v4970_v53  ;;  %v4841_v58 = vsel %vm4813_vm0, %v4832_v6, %v4840_v8  ;;  %v4748_v16 = vrot.slane %v4747_v17, 4  ;;  %v4772_v37 = vsel %vm4732_vm1, %v4702_v14, 0.0  ;;  %v4849_v51 = vsel %vm4813_vm0, %v4840_v8, %v4848_v28  ;;  %v4687_v53 = vld [vmem:[#allocation2 + $0x148] sm:$0xff]  ;;  %v4711_v9 = vld [vmem:[#allocation2 + $0x60] sm:$0xff]  ;;  %v4719_v45 = vld [vmem:[#allocation2 + $0xf8] sm:$0xff] }
 0x300   : > { %5780 = vmatprep.subr.mxu1 %v5002_v11  ;;  %5746 = vmatpush3.msra.mxu0 %v4954_v30  ;;  %v4933_v32 = vadd.f32 %v4833_v29, %v4825_v40  ;;  %v4910_v54 = vadd.f32 %v4909_v36, %v4853_v42  ;;  %v4770_v7 = vadd.f32 %v4769_v22, %v4694_v39  ;;  %v4814_v11 = vrot.slane %v4699_v47, 1  ;;  %v4691_v3 = vld [vmem:[#allocation2 + $0x180] sm:$0xff]  ;;  %v4723_v35 = vld [vmem:[#allocation2 + $0x98] sm:$0x3]  ;;  %v4701_v22 = vld [vmem:[#allocation2 + $0xa8] sm:$0xff] }
 0x301   : > { %5781 = vmatpush3.msra.mxu1 %v4986_v43  ;;  %v4857_v62 = vsel %vm4813_vm0, %v4848_v28, %v4856_v59  ;;  %v4727_v56 = vadd.f32 %v4679_v49, %v4675_v31  ;;  %v4749_v24 = vadd.f32 %v4748_v16, %v4747_v17  ;;  %v4865_v0 = vsel %vm4813_vm0, %v4856_v59, %v4864_v46  ;;  %v4715_v43 = vld [vmem:[#allocation2 + $0x198] sm:$0xff]  ;;  %v4677_v28 = vld [vmem:[#allocation2 + $0x10] sm:$0xff]  ;;  %v4681_v59 = vld [vmem:[#allocation2 + $0x40] sm:$0xff] }
 0x302   : > { %v4934_v48 = vadd.f32 %v4933_v32, %v4841_v58  ;;  %v4911_v18 = vadd.f32 %v4910_v54, %v4861_v61  ;;  %v4771_v33 = vadd.f32 %v4770_v7, %v4698_v60  ;;  %v4815_v27 = vrot.slane %v4703_v12, 1  ;;  %v4695_v61 = vld [vmem:[#allocation2 + $0xa0] sm:$0xff]  ;;  %v4689_v12 = vld [vmem:[#allocation2 + $0x58] sm:$0xff]  ;;  %v4709_v7 = vld [vmem:[#allocation2 + $0x190] sm:$0xff] }
 0x303   : > { %v4728_v34 = vadd.f32 %v4727_v56, %v4683_v63  ;;  %v4750_v30 = vrot.slane %v4749_v24, 2  ;;  %v4938_v15 = vsel %vm4732_vm1, %v4864_v46, 0.0  ;;  %v4826_v41 = vrot.slane %v4707_v38, 1  ;;  %v4705_v54 = vld [vmem:[#allocation2 + $0xc0] sm:$0xff] }
 0x304   : > { %v4935_v52 = vadd.f32 %v4934_v48, %v4849_v51  ;;  %v4913_v25 = vadd.f32 %v4912_v19, %v4911_v18  ;;  %v4773_v1 = vadd.f32 %v4772_v37, %v4771_v33  ;;  %v4733_v26 = vsel %vm4732_vm1, %v4699_v47, 0.0  ;;  %v4685_v19 = vld [vmem:[#allocation2 + $0x90] sm:$0xff]  ;;  %v4693_v18 = vld [vmem:[#allocation2 + $0x138] sm:$0xff] }
 0x305   : > { %v4729_v42 = vadd.f32 %v4728_v34, %v4687_v53  ;;  %v4751_v14 = vadd.f32 %v4750_v30, %v4749_v24  ;;  %v4816_v13 = vsel %vm4813_vm0, %v4814_v11, %v4815_v27  ;;  %v4834_v44 = vrot.slane %v4711_v9, 1 }
 0x306   : > { %v4936_v57 = vadd.f32 %v4935_v52, %v4857_v62  ;;  %v4914_v23 = vrot.slane %v4913_v25, 4  ;;  %v4774_v55 = vrot.slane %v4773_v1, 4  ;;  %v4842_v50 = vrot.slane %v4715_v43, 1  ;;  %v4697_v43 = vld [vmem:[#allocation2 + $0x20] sm:$0xff] }
 0x307   : > { %v4730_v21 = vadd.f32 %v4729_v42, %v4691_v3  ;;  %v4752_v4 = vrot.slane %v4751_v14, 1  ;;  %v4827_v5 = vsel %vm4813_vm0, %v4815_v27, %v4826_v41  ;;  %v4850_v6 = vrot.slane %v4719_v45, 1  ;;  %v4717_v42 = vld [vmem:[#allocation2 + $0x30] sm:$0xff] }
 0x308   : > { %v4937_v10 = vadd.f32 %v4936_v57, %v4865_v0  ;;  %v4915_v8 = vadd.f32 %v4914_v23, %v4913_v25  ;;  %v4775_v20 = vadd.f32 %v4774_v55, %v4773_v1  ;;  %v4835_v39 = vsel %vm4813_vm0, %v4826_v41, %v4834_v44  ;;  %v4713_v41 = vld [vmem:[#allocation2 + $0x158] sm:$0xff]  ;;  %v4721_v23 = vld [vmem:[#allocation2 + $0x8] sm:$0xff] }
 0x309   : > { %v4731_v2 = vadd.f32 %v4730_v21, %v4695_v61  ;;  %v4843_v40 = vsel %vm4813_vm0, %v4834_v44, %v4842_v50  ;;  %v4858_v29 = vrot.slane %v4723_v35, 1  ;;  %v4894_v36 = vadd.f32 %v4827_v5, %v4816_v13 }
 0x30a   : > { %v4939_v17 = vadd.f32 %v4938_v15, %v4937_v10  ;;  %v4916_v46 = vrot.slane %v4915_v8, 2  ;;  %v4776_v31 = vrot.slane %v4775_v20, 2  ;;  %v4753_v58 = vadd.f32 %v4752_v4, %v4751_v14 }
 0x30b   : > { %v4734_v49 = vadd.f32 %v4733_v26, %v4731_v2  ;;  %v4851_v16 = vsel %vm4813_vm0, %v4842_v50, %v4850_v6  ;;  %v4754_v60 = vadd.f32 %v4681_v59, %v4677_v28  ;;  %v4895_v63 = vadd.f32 %v4894_v36, %v4835_v39 }
 0x30c   : > { %v4940_v47 = vrot.slane %v4939_v17, 4  ;;  %v4917_v37 = vadd.f32 %v4916_v46, %v4915_v8  ;;  %v4777_v51 = vadd.f32 %v4776_v31, %v4775_v20  ;;  %v4859_v38 = vsel %vm4813_vm0, %v4850_v6, %v4858_v29  ;;  %v4725_v20 = vld [vmem:[#allocation2 + $0xe8] sm:$0x3] }
 0x30d   : > { %v4735_v32 = vrot.slane %v4734_v49, 4  ;;  %v4755_v56 = vadd.f32 %v4754_v60, %v4685_v19  ;;  %v4820_v24 = vrot.slane %v4701_v22, 1  ;;  %v4896_v11 = vadd.f32 %v4895_v63, %v4843_v40 }
 0x30e   : > { %v4941_v62 = vadd.f32 %v4940_v47, %v4939_v17  ;;  %v4918_v0 = vrot.slane %v4917_v37, 1  ;;  %v4778_v48 = vrot.slane %v4777_v51, 1  ;;  %v4821_v34 = vrot.slane %v4705_v54, 1 }
 0x30f   : > { %v4736_v53 = vadd.f32 %v4735_v32, %v4734_v49  ;;  %v4756_v9 = vadd.f32 %v4755_v56, %v4689_v12  ;;  %v4830_v27 = vrot.slane %v4709_v7, 1  ;;  %v4782_v30 = vmul.f32 0.020408163, %v4753_v58 }
 0x310   : > { %v4942_v33 = vrot.slane %v4941_v62, 2  ;;  %v4919_v52 = vadd.f32 %v4918_v0, %v4917_v37  ;;  %v4897_v3 = vadd.f32 %v4896_v11, %v4851_v16  ;;  %v4779_v25 = vadd.f32 %v4778_v48, %v4777_v51 }
 0x311   : > { %v4737_v15 = vrot.slane %v4736_v53, 2  ;;  %v4899_v45 = vsel %vm4732_vm1, %v4858_v29, 0.0  ;;  %v4757_v26 = vadd.f32 %v4756_v9, %v4693_v18  ;;  %v4759_v61 = vsel %vm4732_vm1, %v4701_v22, 0.0 }
 0x312   : > { %v4943_v1 = vadd.f32 %v4942_v33, %v4941_v62  ;;  %v4947_v14 = vmul.f32 0.020408163, %v4919_v52  ;;  %v4898_v57 = vadd.f32 %v4897_v3, %v4859_v38  ;;  %v4822_v13 = vsel %vm4813_vm0, %v4820_v24, %v4821_v34 }
 0x313   : > { %v4758_v55 = vadd.f32 %v4757_v26, %v4697_v43  ;;  %v4831_v35 = vsel %vm4813_vm0, %v4821_v34, %v4830_v27  ;;  %v4838_v21 = vrot.slane %v4713_v41, 1  ;;  %v4738_v4 = vadd.f32 %v4737_v15, %v4736_v53 }
 0x314   : > { %v4944_v44 = vrot.slane %v4943_v1, 1  ;;  %v4951_v50 = vsel %vm4732_vm1, %v4782_v30, %v4947_v14  ;;  %v4900_v10 = vadd.f32 %v4899_v45, %v4898_v57  ;;  %v4846_v5 = vrot.slane %v4717_v42, 1  ;;  %v5708_v45 = vld [vmem:[%s8267_s3] ss:$0 sm:$0xff] }
 0x315   : > { %5089 = vmatprep.mubr.f32.mxu0 %v4951_v50  ;;  %v4784_v6 = vmul.f32 0.020408163, %v4779_v25  ;;  %v4760_v2 = vadd.f32 %v4759_v61, %v4758_v55  ;;  %v4839_v59 = vsel %vm4813_vm0, %v4830_v27, %v4838_v21  ;;  %v4854_v17 = vrot.slane %v4721_v23, 1 }
 0x316   : > { %v4945_v8 = vadd.f32 %v4944_v44, %v4943_v1  ;;  %v4901_v28 = vrot.slane %v4900_v10, 4  ;;  %v4920_v29 = vadd.f32 %v4831_v35, %v4822_v13  ;;  %v4739_v46 = vrot.slane %v4738_v4, 1 }
 0x317   : > { %v4761_v40 = vrot.slane %v4760_v2, 4  ;;  %v4847_v49 = vsel %vm4813_vm0, %v4838_v21, %v4846_v5  ;;  %v4862_v36 = vrot.slane %v4725_v20, 1  ;;  %v4855_v16 = vsel %vm4813_vm0, %v4846_v5, %v4854_v17 }
 0x318   : > { %v4949_v39 = vmul.f32 0.020408163, %v4945_v8  ;;  %v4902_v31 = vadd.f32 %v4901_v28, %v4900_v10  ;;  %v4921_v58 = vadd.f32 %v4920_v29, %v4839_v59  ;;  %v4740_v37 = vadd.f32 %v4739_v46, %v4738_v4 }
 0x319   : > { %v4762_v22 = vadd.f32 %v4761_v40, %v4760_v2  ;;  %v4863_v32 = vsel %vm4813_vm0, %v4854_v17, %v4862_v36  ;;  %v4925_v7 = vsel %vm4732_vm1, %v4862_v36, 0.0 }
 0x31a   : > { %v4953_v19 = vsel %vm4732_vm1, %v4784_v6, %v4949_v39  ;;  %v4903_v47 = vrot.slane %v4902_v31, 2  ;;  %v4922_v60 = vadd.f32 %v4921_v58, %v4847_v49  ;;  %v4781_v38 = vmul.f32 0.020408163, %v4740_v37 }
 0x31b   : > { %5159 = vmatprep.mubr.f32.mxu1 %v4953_v19  ;;  %v4763_v63 = vrot.slane %v4762_v22, 2 }
 0x31c   : > { %v4904_v51 = vadd.f32 %v4903_v47, %v4902_v31  ;;  %v4923_v12 = vadd.f32 %v4922_v60, %v4855_v16 }
 0x31d   : > { %v4764_v24 = vadd.f32 %v4763_v63, %v4762_v22 }
 0x31e   : > { %v4905_v54 = vrot.slane %v4904_v51, 1  ;;  %v4924_v62 = vadd.f32 %v4923_v12, %v4863_v32 }
 0x31f   : > { %v4765_v18 = vrot.slane %v4764_v24, 1 }
 0x320   : > { %v4906_v56 = vadd.f32 %v4905_v54, %v4904_v51  ;;  %v4926_v0 = vadd.f32 %v4925_v7, %v4924_v62 }
 0x321   : > { %v4766_v34 = vadd.f32 %v4765_v18, %v4764_v24 }
 0x322   : > { %v4946_v48 = vmul.f32 0.020408163, %v4906_v56  ;;  %v4927_v53 = vrot.slane %v4926_v0, 4 }
 0x323   : > { %v4783_v52 = vmul.f32 0.020408163, %v4766_v34 }
 0x324   : > { %v4950_v11 = vsel %vm4732_vm1, %v4781_v38, %v4946_v48  ;;  %v4928_v33 = vadd.f32 %v4927_v53, %v4926_v0 }
 0x325   : > { %5090 = vmatmul.mubr.f32.vlgmr.msra.gmra.mxu0 %v4950_v11 }
 0x326   : > { %v4929_v9 = vrot.slane %v4928_v33, 2 }
 0x328   : > { %v4930_v27 = vadd.f32 %v4929_v9, %v4928_v33 }
 0x32a   : > { %v4931_v30 = vrot.slane %v4930_v27, 1 }
 0x32c   : > { %v4932_v15 = vadd.f32 %v4931_v30, %v4930_v27 }
 0x32e   : > { %v4948_v3 = vmul.f32 0.020408163, %v4932_v15 }
 0x330   : > { %v4952_v43 = vsel %vm4732_vm1, %v4783_v52, %v4948_v3 }
 0x331   : > { %5160 = vmatmul.mubr.f32.vlgmr.msra.gmra.mxu1 %v4952_v43 }
 0x3e5   : > { %v5747_v41 = vpop.f32.mrf.mxu0 }
 0x3e7   : > { %v5748_v25 = vpop.f32.mrf.mxu0 }
 0x3e8   : > { %v5749_v1 = vadd.f32 %v5748_v25, %v5747_v41 }
 0x3ea   : > { %v5092_v26 = vadd.f32 %v5749_v1, %v5708_v45 }
 0x3f1   : > { %v5782_v42 = vpop.f32.mrf.mxu1 }
 0x3f3   : > { %v5783_v14 = vpop.f32.mrf.mxu1 }
 0x3f4   : > { %v5784_v57 = vadd.f32 %v5783_v14, %v5782_v42 }
 0x3f6   : > { %v5162_v61 = vadd.f32 %v5784_v57, %v5092_v26 }
 0x3f8   : > { %5166 = vst.msk [vmem:[#allocation4] sm:$0x3] %vm5165_vm2, %v5162_v61 }
 0x3f9 PF: > { %p5791_p11 = scmp.eq.s32.totalorder %s6492_s18, 2  ;;  %s6450_s10 = smov [#allocation4]  }
 0x3fa   : > { %s5174_s11 = sshll.u32 %s6450_s10, 4  ;;  %s5175_s11 = int_to_ptr.vmem [resolvable:$true] %s5174_s11 }
 0x3fb   : > { %s6396_s12 = scalar_lea.vmem %s5175_s11, 32  ;;  %p6403_p1 = scmp.lt.s32.totalorder %s5175_s11, %s5175_s11 }
 0x3fc   : > { %p6397_p12 = scmp.ne.s32.totalorder %s5175_s11, %s6396_s12  ;;  %p6404_p2 = scmp.lt.s32.totalorder %s6396_s12, %s6396_s12 }
 0x3fe   : > { %p6398_p13 = pnand %p6397_p12, %p5791_p11  ;;  %p6405_p3 = por %p6404_p2, %p6403_p1 }
 0x400   : > { %p6399_p0 = pneg %p6398_p13 }
 0x402   : > { %p6406_p4 = pnand %p6405_p3, %p6399_p0 }
 0x404   : > { %6409 = shalt.err (!%p6406_p4)
}
 0x405   : > { %5788 = dma.vmem_to_hbm [thread:$0]  (%p5791_p11), %s5175_s11, 32, %s8268_s4, [#allocation5]  }
 0x406   : > { %6433 = dma.done.wait (%p5791_p11), [#allocation5], 32  }
 0x407   : > { %6435 = vsyncadd (%p5791_p11), [#allocation5], 4294967264 }
 0x408 PF: > { %p12_p5 = scmp.ge.s32.totalorder %s6495_s19, 5   ;;  %s8517_s15 = smov %s6442_s16 }
 0x409   : > { %s8518_s16 = smov %s6504_s22  ;;  %s8519_s17 = smov %s6495_s19 }
 0x40a   :  { %14 = sbr.rel (!%p12_p5) target bundleno = 2 (0x2), region = 102 }
 0x40f   :  { %5187 = vsyncpa [#allocation5], 1 }
 0x410   :  { %5189 = vsyncpa [#allocation5 + $0x1], 1 }

</bundles_post_ra>
